<compile_context>
chip_gen: v7x
topology: tpu7x:2x2x1
jax: 0.10.0
libtpu: 0.0.40
codegen_flags: <defaults>
</compile_context>

<pallas_src>
import functools

import jax
import jax.numpy as jnp
from jax.experimental import pallas as pl
from jax.experimental.pallas import tpu as pltpu

LANE = 128


def basic_block_kernel(x_ref, w1_ref, w2_ref, w3_ref, out_ref, pad_ref, *,
                       N, Ho, Wo, stride, downsample):
    # x_ref  : (N, H+2, W+2, Cp)    spatially zero-padded, channel-padded NHWC input
    # w1_ref : (9*Cp, Kp)           conv1 weights, taps stacked along K (kh, kw, cin)
    # w2_ref : (9*Kp, Kp)           conv2 weights, same K layout
    # w3_ref : (Cp, Kp)             1x1 downsample weights
    # out_ref: (N*Ho*Wo, Kp)        lane-dense 2-D output
    # pad_ref: (N, Ho+2, Wo+2, Kp)  VMEM scratch: conv2's 1-pixel-padded input
    Cp = x_ref.shape[-1]
    Kp = out_ref.shape[-1]
    M = N * Ho * Wo
    f32 = jnp.float32
    eps = 1e-5

    def batchnorm(v):  # v: (M, C) -> per-channel (lane) stats over all rows
        mean = jnp.mean(v, axis=0, keepdims=True)
        var = jnp.mean((v - mean) * (v - mean), axis=0, keepdims=True)
        return (v - mean) * jax.lax.rsqrt(var + eps)

    # ---- conv1: gather the 9 taps, concat along channels (im2col), then one
    #      large-K matmul (K = 9*Cp) instead of 9 small ones. ----
    if stride == 1:
        taps1 = [x_ref[:, kh:kh + Ho, kw:kw + Wo, :].astype(f32)
                 for kh in range(3) for kw in range(3)]
    else:  # stride == 2: strided (sublane) gather ONCE per parity; every tap
           # is then a contiguous slice of one of the 4 compact buffers.
        nrow = {0: Ho + 1, 1: Ho}
        ncol = {0: Wo + 1, 1: Wo}
        par = {(rp, cp): x_ref[:, pl.ds(rp, nrow[rp], stride=2),
                                pl.ds(cp, ncol[cp], stride=2), :].astype(f32)
               for rp in range(2) for cp in range(2)}
        taps1 = []
        for kh in range(3):
            for kw in range(3):
                g = par[(kh % 2, kw % 2)]
                r0, c0 = kh // 2, kw // 2
                taps1.append(g[:, r0:r0 + Ho, c0:c0 + Wo, :])
    center_tap = taps1[4]  # == the strided 1x1-conv input; reused for identity
    p1 = jnp.concatenate(taps1, axis=-1).reshape(M, 9 * Cp)
    h = jnp.dot(p1, w1_ref[...].astype(f32), preferred_element_type=f32)
    h = jnp.maximum(batchnorm(h), 0.0)  # (M, Kp)

    # ---- stage conv2's padded input; zero ONLY the 1-pixel halo ----
    pad_ref[:, 1:Ho + 1, 1:Wo + 1, :] = h.reshape(N, Ho, Wo, Kp)
    zrow = jnp.zeros((N, 1, Wo + 2, Kp), f32)
    pad_ref[:, 0:1, :, :] = zrow
    pad_ref[:, Ho + 1:Ho + 2, :, :] = zrow
    zcol = jnp.zeros((N, Ho, 1, Kp), f32)
    pad_ref[:, 1:Ho + 1, 0:1, :] = zcol
    pad_ref[:, 1:Ho + 1, Wo + 1:Wo + 2, :] = zcol

    # ---- conv2 (stride 1): same im2col -> one matmul (K = 9*Kp) -> bn2 ----
    taps2 = [pad_ref[:, kh:kh + Ho, kw:kw + Wo, :]
             for kh in range(3) for kw in range(3)]
    p2 = jnp.concatenate(taps2, axis=-1).reshape(M, 9 * Kp)
    h2 = batchnorm(jnp.dot(p2, w2_ref[...].astype(f32),
                           preferred_element_type=f32))

    # ---- identity path: center tap IS the 1x1-conv (stride, pad=0) input ----
    ident = center_tap.reshape(M, Cp)
    if downsample:
        ident = batchnorm(jnp.dot(ident, w3_ref[...].astype(f32),
                                  preferred_element_type=f32))
    # else: Cin == Cout and stride == 1, so identity is x itself (Cp == Kp).

    out_ref[...] = jnp.maximum(h2 + ident, 0.0).astype(out_ref.dtype)


def _round_up(x, m):
    return ((x + m - 1) // m) * m


@functools.partial(jax.jit, static_argnames=("stride",))
def basic_block_forward(x_nchw, w1, w2, w3, stride):
    """x_nchw: (N, Cin, H, W); w1: (Cout, Cin, 3, 3); w2: (Cout, Cout, 3, 3);
    w3: (Cout, Cin, 1, 1). Returns (N, Cout, Ho, Wo) in NCHW."""
    N, Cin, H, W = x_nchw.shape
    Cout = w1.shape[0]
    Ho = (H - 1) // stride + 1
    Wo = (W - 1) // stride + 1
    downsample = (Cin != Cout) or (stride != 1)
    Cp = _round_up(Cin, LANE)   # lane-dense channel padding
    Kp = _round_up(Cout, LANE)

    # NCHW -> NHWC; 1-pixel spatial halo for the 3x3 convs; channels -> lane width.
    # TODO(synk): in a full network keep activations NHWC end-to-end so these
    # boundary transposes/pads are not paid per block.
    x = jnp.transpose(x_nchw, (0, 2, 3, 1)).astype(jnp.float32)
    x_pad = jnp.pad(x, ((0, 0), (1, 1), (1, 1), (0, Cp - Cin)))

    def pack3x3(w, cip, cop):
        ci, co = w.shape[1], w.shape[0]
        wk = jnp.transpose(w, (2, 3, 1, 0)).astype(jnp.float32)      # (3,3,ci,co)
        wk = jnp.pad(wk, ((0, 0), (0, 0), (0, cip - ci), (0, cop - co)))
        return wk.reshape(9 * cip, cop)                              # K = (kh, kw, ci)

    w1_k = pack3x3(w1, Cp, Kp)
    w2_k = pack3x3(w2, Kp, Kp)
    w3_k = jnp.pad(jnp.transpose(w3[:, :, 0, 0], (1, 0)).astype(jnp.float32),
                   ((0, Cp - Cin), (0, Kp - Cout)))

    M = N * Ho * Wo
    out2d = pl.pallas_call(
        functools.partial(basic_block_kernel, N=N, Ho=Ho, Wo=Wo,
                          stride=stride, downsample=downsample),
        out_shape=jax.ShapeDtypeStruct((M, Kp), jnp.float32),
        in_specs=[pl.BlockSpec(memory_space=pltpu.MemorySpace.VMEM)] * 4,
        out_specs=pl.BlockSpec(memory_space=pltpu.MemorySpace.VMEM),
        scratch_shapes=[pltpu.VMEM((N, Ho + 2, Wo + 2, Kp), jnp.float32)],
    )(x_pad, w1_k, w2_k, w3_k)

    out = out2d.reshape(N, Ho, Wo, Kp)[..., :Cout]
    return jnp.transpose(out, (0, 3, 1, 2))  # back to NCHW


def reference_forward(x_nchw, w1, w2, w3, stride):
    """Plain-JAX reference (NCHW), mirrors the torch module in training mode."""
    def conv(x, w, s, p):
        return jax.lax.conv_general_dilated(
            x, w, window_strides=(s, s), padding=((p, p), (p, p)),
            dimension_numbers=('NCHW', 'OIHW', 'NCHW'))

    def bn(v):
        mean = jnp.mean(v, axis=(0, 2, 3), keepdims=True)
        var = jnp.mean((v - mean) ** 2, axis=(0, 2, 3), keepdims=True)
        return (v - mean) / jnp.sqrt(var + 1e-5)

    out = jax.nn.relu(bn(conv(x_nchw, w1, stride, 1)))
    out = bn(conv(out, w2, 1, 1))
    if x_nchw.shape[1] != w1.shape[0] or stride != 1:
        ident = bn(conv(x_nchw, w3, stride, 0))
    else:
        ident = x_nchw
    return jax.nn.relu(out + ident)


if __name__ == "__main__":
    key = jax.random.PRNGKey(0)
    N, Cin, Cout, H, W, stride = 2, 4, 8, 16, 16, 2
    k1, k2, k3, kx = jax.random.split(key, 4)

    # kaiming_normal_(mode='fan_out', nonlinearity='relu'): std = sqrt(2 / fan_out)
    w1 = jax.random.normal(k1, (Cout, Cin, 3, 3), jnp.float32) * (2.0 / (Cout * 9)) ** 0.5
    w2 = jax.random.normal(k2, (Cout, Cout, 3, 3), jnp.float32) * (2.0 / (Cout * 9)) ** 0.5
    w3 = jax.random.normal(k3, (Cout, Cin, 1, 1), jnp.float32) * (2.0 / (Cout * 1)) ** 0.5
    x = jax.random.normal(kx, (N, Cin, H, W), jnp.float32)

    out = jax.block_until_ready(basic_block_forward(x, w1, w2, w3, stride))

    assert out.shape == (N, Cout, (H - 1) // stride + 1, (W - 1) // stride + 1)
    ref = reference_forward(x, w1, w2, w3, stride)
    if not jnp.allclose(out, ref, atol=2e-2, rtol=2e-2):
        raise AssertionError("Pallas kernel output mismatches JAX reference")

    print("KERNEL_OK")
</pallas_src>

<mosaic_0001>
module attributes {stable_mosaic.version = 11 : i64} {
  func.func @basic_block_kernel(%arg0: memref<2x18x18x128xf32, #tpu.memory_space<vmem>>, %arg1: memref<1152x128xf32, #tpu.memory_space<vmem>>, %arg2: memref<1152x128xf32, #tpu.memory_space<vmem>>, %arg3: memref<128x128xf32, #tpu.memory_space<vmem>>, %arg4: memref<128x128xf32, #tpu.memory_space<vmem>>, %arg5: memref<2x10x10x128xf32, #tpu.memory_space<vmem>>) attributes {dimension_semantics = [], scalar_prefetch = 0 : i64, scratch_operands = 1 : i64, tpu.core_type = #tpu.core_type<tc>} {
    %c0 = arith.constant 0 : index
    %c0_0 = arith.constant 0 : index
    %c0_1 = arith.constant 0 : index
    %c0_2 = arith.constant 0 : index
    %0 = tpu.strided_load %arg0[%c0, %c0_0, %c0_1, %c0_2] {strides = array<i32: 1, 2, 2, 1>} : memref<2x18x18x128xf32, #tpu.memory_space<vmem>>, vector<2x9x9x128xf32>
    %c0_3 = arith.constant 0 : index
    %c0_4 = arith.constant 0 : index
    %c1 = arith.constant 1 : index
    %c0_5 = arith.constant 0 : index
    %1 = tpu.strided_load %arg0[%c0_3, %c0_4, %c1, %c0_5] {strides = array<i32: 1, 2, 2, 1>} : memref<2x18x18x128xf32, #tpu.memory_space<vmem>>, vector<2x9x8x128xf32>
    %c0_6 = arith.constant 0 : index
    %c1_7 = arith.constant 1 : index
    %c0_8 = arith.constant 0 : index
    %c0_9 = arith.constant 0 : index
    %2 = tpu.strided_load %arg0[%c0_6, %c1_7, %c0_8, %c0_9] {strides = array<i32: 1, 2, 2, 1>} : memref<2x18x18x128xf32, #tpu.memory_space<vmem>>, vector<2x8x9x128xf32>
    %c0_10 = arith.constant 0 : index
    %c1_11 = arith.constant 1 : index
    %c1_12 = arith.constant 1 : index
    %c0_13 = arith.constant 0 : index
    %3 = tpu.strided_load %arg0[%c0_10, %c1_11, %c1_12, %c0_13] {strides = array<i32: 1, 2, 2, 1>} : memref<2x18x18x128xf32, #tpu.memory_space<vmem>>, vector<2x8x8x128xf32>
    %4 = vector.extract_strided_slice %0 {offsets = [0, 0, 0, 0], sizes = [2, 8, 8, 128], strides = [1, 1, 1, 1]} : vector<2x9x9x128xf32> to vector<2x8x8x128xf32>
    %5 = vector.extract_strided_slice %1 {offsets = [0, 0, 0, 0], sizes = [2, 8, 8, 128], strides = [1, 1, 1, 1]} : vector<2x9x8x128xf32> to vector<2x8x8x128xf32>
    %6 = vector.extract_strided_slice %0 {offsets = [0, 0, 1, 0], sizes = [2, 8, 8, 128], strides = [1, 1, 1, 1]} : vector<2x9x9x128xf32> to vector<2x8x8x128xf32>
    %7 = vector.extract_strided_slice %2 {offsets = [0, 0, 0, 0], sizes = [2, 8, 8, 128], strides = [1, 1, 1, 1]} : vector<2x8x9x128xf32> to vector<2x8x8x128xf32>
    %8 = vector.extract_strided_slice %2 {offsets = [0, 0, 1, 0], sizes = [2, 8, 8, 128], strides = [1, 1, 1, 1]} : vector<2x8x9x128xf32> to vector<2x8x8x128xf32>
    %9 = vector.extract_strided_slice %0 {offsets = [0, 1, 0, 0], sizes = [2, 8, 8, 128], strides = [1, 1, 1, 1]} : vector<2x9x9x128xf32> to vector<2x8x8x128xf32>
    %10 = vector.extract_strided_slice %1 {offsets = [0, 1, 0, 0], sizes = [2, 8, 8, 128], strides = [1, 1, 1, 1]} : vector<2x9x8x128xf32> to vector<2x8x8x128xf32>
    %11 = vector.extract_strided_slice %0 {offsets = [0, 1, 1, 0], sizes = [2, 8, 8, 128], strides = [1, 1, 1, 1]} : vector<2x9x9x128xf32> to vector<2x8x8x128xf32>
    %12 = tpu.concatenate %4, %5, %6, %7, %3, %8, %9, %10, %11 in 3 : vector<2x8x8x128xf32>, vector<2x8x8x128xf32>, vector<2x8x8x128xf32>, vector<2x8x8x128xf32>, vector<2x8x8x128xf32>, vector<2x8x8x128xf32>, vector<2x8x8x128xf32>, vector<2x8x8x128xf32>, vector<2x8x8x128xf32> -> vector<2x8x8x1152xf32>
    %13 = vector.shape_cast %12 : vector<2x8x8x1152xf32> to vector<128x1152xf32>
    %c0_14 = arith.constant 0 : index
    %c0_15 = arith.constant 0 : index
    %14 = vector.load %arg1[%c0_14, %c0_15] : memref<1152x128xf32, #tpu.memory_space<vmem>>, vector<1152x128xf32>
    %cst = arith.constant dense<0.000000e+00> : vector<128x128xf32>
    %15 = tpu.matmul %13, %14, %cst {dimension_numbers = #tpu.dot_dimension_numbers<[1], [0], [0], [1], [0, 0, 1, 1], [], []>} : vector<128x1152xf32>, vector<1152x128xf32>, vector<128x128xf32> -> vector<128x128xf32>
    %cst_16 = arith.constant dense<0.000000e+00> : vector<128xf32>
    %16 = vector.multi_reduction <add>, %15, %cst_16 [0] : vector<128x128xf32> to vector<128xf32>
    %17 = vector.shape_cast %16 : vector<128xf32> to vector<1x128xf32>
    %cst_17 = arith.constant 1.280000e+02 : f32
    %18 = vector.broadcast %cst_17 : f32 to vector<1x128xf32>
    %19 = arith.divf %17, %18 : vector<1x128xf32>
    %20 = vector.broadcast %19 : vector<1x128xf32> to vector<128x128xf32>
    %21 = arith.subf %15, %20 : vector<128x128xf32>
    %22 = vector.broadcast %19 : vector<1x128xf32> to vector<128x128xf32>
    %23 = arith.subf %15, %22 : vector<128x128xf32>
    %24 = arith.mulf %21, %23 : vector<128x128xf32>
    %cst_18 = arith.constant dense<0.000000e+00> : vector<128xf32>
    %25 = vector.multi_reduction <add>, %24, %cst_18 [0] : vector<128x128xf32> to vector<128xf32>
    %26 = vector.shape_cast %25 : vector<128xf32> to vector<1x128xf32>
    %cst_19 = arith.constant 1.280000e+02 : f32
    %27 = vector.broadcast %cst_19 : f32 to vector<1x128xf32>
    %28 = arith.divf %26, %27 : vector<1x128xf32>
    %29 = vector.broadcast %19 : vector<1x128xf32> to vector<128x128xf32>
    %30 = arith.subf %15, %29 : vector<128x128xf32>
    %cst_20 = arith.constant 9.99999974E-6 : f32
    %31 = vector.broadcast %cst_20 : f32 to vector<1x128xf32>
    %32 = arith.addf %28, %31 : vector<1x128xf32>
    %33 = math.rsqrt %32 : vector<1x128xf32>
    %34 = vector.broadcast %33 : vector<1x128xf32> to vector<128x128xf32>
    %35 = arith.mulf %30, %34 : vector<128x128xf32>
    %cst_21 = arith.constant 0.000000e+00 : f32
    %36 = vector.broadcast %cst_21 : f32 to vector<128x128xf32>
    %37 = arith.maximumf %35, %36 : vector<128x128xf32>
    %38 = vector.shape_cast %37 : vector<128x128xf32> to vector<2x8x8x128xf32>
    %c0_22 = arith.constant 0 : index
    %c1_23 = arith.constant 1 : index
    %c1_24 = arith.constant 1 : index
    %c0_25 = arith.constant 0 : index
    %39 = vector.load %arg5[%c0_22, %c1_23, %c1_24, %c0_25] : memref<2x10x10x128xf32, #tpu.memory_space<vmem>>, vector<2x8x8x128xf32>
    tpu.vector_store %arg5[%c0_22, %c1_23, %c1_24, %c0_25], %38 {strides = array<i32>} : memref<2x10x10x128xf32, #tpu.memory_space<vmem>>, vector<2x8x8x128xf32>,
    %cst_26 = arith.constant 0.000000e+00 : f32
    %40 = vector.broadcast %cst_26 : f32 to vector<2x1x10x128xf32>
    %c0_27 = arith.constant 0 : index
    %c0_28 = arith.constant 0 : index
    %c0_29 = arith.constant 0 : index
    %c0_30 = arith.constant 0 : index
    %41 = vector.load %arg5[%c0_27, %c0_28, %c0_29, %c0_30] : memref<2x10x10x128xf32, #tpu.memory_space<vmem>>, vector<2x1x10x128xf32>
    tpu.vector_store %arg5[%c0_27, %c0_28, %c0_29, %c0_30], %40 {strides = array<i32>} : memref<2x10x10x128xf32, #tpu.memory_space<vmem>>, vector<2x1x10x128xf32>,
    %c0_31 = arith.constant 0 : index
    %c9 = arith.constant 9 : index
    %c0_32 = arith.constant 0 : index
    %c0_33 = arith.constant 0 : index
    %42 = vector.load %arg5[%c0_31, %c9, %c0_32, %c0_33] : memref<2x10x10x128xf32, #tpu.memory_space<vmem>>, vector<2x1x10x128xf32>
    tpu.vector_store %arg5[%c0_31, %c9, %c0_32, %c0_33], %40 {strides = array<i32>} : memref<2x10x10x128xf32, #tpu.memory_space<vmem>>, vector<2x1x10x128xf32>,
    %cst_34 = arith.constant 0.000000e+00 : f32
    %43 = vector.broadcast %cst_34 : f32 to vector<2x8x1x128xf32>
    %c0_35 = arith.constant 0 : index
    %c1_36 = arith.constant 1 : index
    %c0_37 = arith.constant 0 : index
    %c0_38 = arith.constant 0 : index
    %44 = vector.load %arg5[%c0_35, %c1_36, %c0_37, %c0_38] : memref<2x10x10x128xf32, #tpu.memory_space<vmem>>, vector<2x8x1x128xf32>
    tpu.vector_store %arg5[%c0_35, %c1_36, %c0_37, %c0_38], %43 {strides = array<i32>} : memref<2x10x10x128xf32, #tpu.memory_space<vmem>>, vector<2x8x1x128xf32>,
    %c0_39 = arith.constant 0 : index
    %c1_40 = arith.constant 1 : index
    %c9_41 = arith.constant 9 : index
    %c0_42 = arith.constant 0 : index
    %45 = vector.load %arg5[%c0_39, %c1_40, %c9_41, %c0_42] : memref<2x10x10x128xf32, #tpu.memory_space<vmem>>, vector<2x8x1x128xf32>
    tpu.vector_store %arg5[%c0_39, %c1_40, %c9_41, %c0_42], %43 {strides = array<i32>} : memref<2x10x10x128xf32, #tpu.memory_space<vmem>>, vector<2x8x1x128xf32>,
    %c0_43 = arith.constant 0 : index
    %c0_44 = arith.constant 0 : index
    %c0_45 = arith.constant 0 : index
    %c0_46 = arith.constant 0 : index
    %46 = vector.load %arg5[%c0_43, %c0_44, %c0_45, %c0_46] : memref<2x10x10x128xf32, #tpu.memory_space<vmem>>, vector<2x8x8x128xf32>
    %c0_47 = arith.constant 0 : index
    %c0_48 = arith.constant 0 : index
    %c1_49 = arith.constant 1 : index
    %c0_50 = arith.constant 0 : index
    %47 = vector.load %arg5[%c0_47, %c0_48, %c1_49, %c0_50] : memref<2x10x10x128xf32, #tpu.memory_space<vmem>>, vector<2x8x8x128xf32>
    %c0_51 = arith.constant 0 : index
    %c0_52 = arith.constant 0 : index
    %c2 = arith.constant 2 : index
    %c0_53 = arith.constant 0 : index
    %48 = vector.load %arg5[%c0_51, %c0_52, %c2, %c0_53] : memref<2x10x10x128xf32, #tpu.memory_space<vmem>>, vector<2x8x8x128xf32>
    %c0_54 = arith.constant 0 : index
    %c1_55 = arith.constant 1 : index
    %c0_56 = arith.constant 0 : index
    %c0_57 = arith.constant 0 : index
    %49 = vector.load %arg5[%c0_54, %c1_55, %c0_56, %c0_57] : memref<2x10x10x128xf32, #tpu.memory_space<vmem>>, vector<2x8x8x128xf32>
    %c0_58 = arith.constant 0 : index
    %c1_59 = arith.constant 1 : index
    %c1_60 = arith.constant 1 : index
    %c0_61 = arith.constant 0 : index
    %50 = vector.load %arg5[%c0_58, %c1_59, %c1_60, %c0_61] : memref<2x10x10x128xf32, #tpu.memory_space<vmem>>, vector<2x8x8x128xf32>
    %c0_62 = arith.constant 0 : index
    %c1_63 = arith.constant 1 : index
    %c2_64 = arith.constant 2 : index
    %c0_65 = arith.constant 0 : index
    %51 = vector.load %arg5[%c0_62, %c1_63, %c2_64, %c0_65] : memref<2x10x10x128xf32, #tpu.memory_space<vmem>>, vector<2x8x8x128xf32>
    %c0_66 = arith.constant 0 : index
    %c2_67 = arith.constant 2 : index
    %c0_68 = arith.constant 0 : index
    %c0_69 = arith.constant 0 : index
    %52 = vector.load %arg5[%c0_66, %c2_67, %c0_68, %c0_69] : memref<2x10x10x128xf32, #tpu.memory_space<vmem>>, vector<2x8x8x128xf32>
    %c0_70 = arith.constant 0 : index
    %c2_71 = arith.constant 2 : index
    %c1_72 = arith.constant 1 : index
    %c0_73 = arith.constant 0 : index
    %53 = vector.load %arg5[%c0_70, %c2_71, %c1_72, %c0_73] : memref<2x10x10x128xf32, #tpu.memory_space<vmem>>, vector<2x8x8x128xf32>
    %c0_74 = arith.constant 0 : index
    %c2_75 = arith.constant 2 : index
    %c2_76 = arith.constant 2 : index
    %c0_77 = arith.constant 0 : index
    %54 = vector.load %arg5[%c0_74, %c2_75, %c2_76, %c0_77] : memref<2x10x10x128xf32, #tpu.memory_space<vmem>>, vector<2x8x8x128xf32>
    %55 = tpu.concatenate %46, %47, %48, %49, %50, %51, %52, %53, %54 in 3 : vector<2x8x8x128xf32>, vector<2x8x8x128xf32>, vector<2x8x8x128xf32>, vector<2x8x8x128xf32>, vector<2x8x8x128xf32>, vector<2x8x8x128xf32>, vector<2x8x8x128xf32>, vector<2x8x8x128xf32>, vector<2x8x8x128xf32> -> vector<2x8x8x1152xf32>
    %56 = vector.shape_cast %55 : vector<2x8x8x1152xf32> to vector<128x1152xf32>
    %c0_78 = arith.constant 0 : index
    %c0_79 = arith.constant 0 : index
    %57 = vector.load %arg2[%c0_78, %c0_79] : memref<1152x128xf32, #tpu.memory_space<vmem>>, vector<1152x128xf32>
    %cst_80 = arith.constant dense<0.000000e+00> : vector<128x128xf32>
    %58 = tpu.matmul %56, %57, %cst_80 {dimension_numbers = #tpu.dot_dimension_numbers<[1], [0], [0], [1], [0, 0, 1, 1], [], []>} : vector<128x1152xf32>, vector<1152x128xf32>, vector<128x128xf32> -> vector<128x128xf32>
    %cst_81 = arith.constant dense<0.000000e+00> : vector<128xf32>
    %59 = vector.multi_reduction <add>, %58, %cst_81 [0] : vector<128x128xf32> to vector<128xf32>
    %60 = vector.shape_cast %59 : vector<128xf32> to vector<1x128xf32>
    %cst_82 = arith.constant 1.280000e+02 : f32
    %61 = vector.broadcast %cst_82 : f32 to vector<1x128xf32>
    %62 = arith.divf %60, %61 : vector<1x128xf32>
    %63 = vector.broadcast %62 : vector<1x128xf32> to vector<128x128xf32>
    %64 = arith.subf %58, %63 : vector<128x128xf32>
    %65 = vector.broadcast %62 : vector<1x128xf32> to vector<128x128xf32>
    %66 = arith.subf %58, %65 : vector<128x128xf32>
    %67 = arith.mulf %64, %66 : vector<128x128xf32>
    %cst_83 = arith.constant dense<0.000000e+00> : vector<128xf32>
    %68 = vector.multi_reduction <add>, %67, %cst_83 [0] : vector<128x128xf32> to vector<128xf32>
    %69 = vector.shape_cast %68 : vector<128xf32> to vector<1x128xf32>
    %cst_84 = arith.constant 1.280000e+02 : f32
    %70 = vector.broadcast %cst_84 : f32 to vector<1x128xf32>
    %71 = arith.divf %69, %70 : vector<1x128xf32>
    %72 = vector.broadcast %62 : vector<1x128xf32> to vector<128x128xf32>
    %73 = arith.subf %58, %72 : vector<128x128xf32>
    %cst_85 = arith.constant 9.99999974E-6 : f32
    %74 = vector.broadcast %cst_85 : f32 to vector<1x128xf32>
    %75 = arith.addf %71, %74 : vector<1x128xf32>
    %76 = math.rsqrt %75 : vector<1x128xf32>
    %77 = vector.broadcast %76 : vector<1x128xf32> to vector<128x128xf32>
    %78 = arith.mulf %73, %77 : vector<128x128xf32>
    %79 = vector.shape_cast %3 : vector<2x8x8x128xf32> to vector<128x128xf32>
    %c0_86 = arith.constant 0 : index
    %c0_87 = arith.constant 0 : index
    %80 = vector.load %arg3[%c0_86, %c0_87] : memref<128x128xf32, #tpu.memory_space<vmem>>, vector<128x128xf32>
    %cst_88 = arith.constant dense<0.000000e+00> : vector<128x128xf32>
    %81 = tpu.matmul %79, %80, %cst_88 {dimension_numbers = #tpu.dot_dimension_numbers<[1], [0], [0], [1], [0, 0, 1, 1], [], []>} : vector<128x128xf32>, vector<128x128xf32>, vector<128x128xf32> -> vector<128x128xf32>
    %cst_89 = arith.constant dense<0.000000e+00> : vector<128xf32>
    %82 = vector.multi_reduction <add>, %81, %cst_89 [0] : vector<128x128xf32> to vector<128xf32>
    %83 = vector.shape_cast %82 : vector<128xf32> to vector<1x128xf32>
    %cst_90 = arith.constant 1.280000e+02 : f32
    %84 = vector.broadcast %cst_90 : f32 to vector<1x128xf32>
    %85 = arith.divf %83, %84 : vector<1x128xf32>
    %86 = vector.broadcast %85 : vector<1x128xf32> to vector<128x128xf32>
    %87 = arith.subf %81, %86 : vector<128x128xf32>
    %88 = vector.broadcast %85 : vector<1x128xf32> to vector<128x128xf32>
    %89 = arith.subf %81, %88 : vector<128x128xf32>
    %90 = arith.mulf %87, %89 : vector<128x128xf32>
    %cst_91 = arith.constant dense<0.000000e+00> : vector<128xf32>
    %91 = vector.multi_reduction <add>, %90, %cst_91 [0] : vector<128x128xf32> to vector<128xf32>
    %92 = vector.shape_cast %91 : vector<128xf32> to vector<1x128xf32>
    %cst_92 = arith.constant 1.280000e+02 : f32
    %93 = vector.broadcast %cst_92 : f32 to vector<1x128xf32>
    %94 = arith.divf %92, %93 : vector<1x128xf32>
    %95 = vector.broadcast %85 : vector<1x128xf32> to vector<128x128xf32>
    %96 = arith.subf %81, %95 : vector<128x128xf32>
    %cst_93 = arith.constant 9.99999974E-6 : f32
    %97 = vector.broadcast %cst_93 : f32 to vector<1x128xf32>
    %98 = arith.addf %94, %97 : vector<1x128xf32>
    %99 = math.rsqrt %98 : vector<1x128xf32>
    %100 = vector.broadcast %99 : vector<1x128xf32> to vector<128x128xf32>
    %101 = arith.mulf %96, %100 : vector<128x128xf32>
    %102 = arith.addf %78, %101 : vector<128x128xf32>
    %cst_94 = arith.constant 0.000000e+00 : f32
    %103 = vector.broadcast %cst_94 : f32 to vector<128x128xf32>
    %104 = arith.maximumf %102, %103 : vector<128x128xf32>
    %c0_95 = arith.constant 0 : index
    %c0_96 = arith.constant 0 : index
    %105 = vector.load %arg4[%c0_95, %c0_96] : memref<128x128xf32, #tpu.memory_space<vmem>>, vector<128x128xf32>
    tpu.vector_store %arg4[%c0_95, %c0_96], %104 {strides = array<i32>} : memref<128x128xf32, #tpu.memory_space<vmem>>, vector<128x128xf32>,
    return
  }
}

</mosaic_0001>

<bundles_post_ra>
// kernel: basic_block_forward.1
= control target key start
LH: loop header
LB: loop body
LE: loop exit
PB: predicated region body
PF: predicated region fallthrough
CT: control target
= control target key end

     0   :  { %vm252_vm0 = vcmask 1046528   ;;  %s6845_s1 = inlined_call_operand.vmem [shape: f32[1152,128], index: 1, kind: input, shape index: {}]   ;;  %s6846_s0 = inlined_call_operand.vmem [shape: f32[2,18,18,128], index: 0, kind: input, shape index: {}]   ;;  %s6847_s2 = inlined_call_operand.vmem [shape: f32[1152,128], index: 2, kind: input, shape index: {}]   ;;  %s6848_s3 = inlined_call_operand.vmem [shape: f32[128,128], index: 3, kind: input, shape index: {}]   ;;  %s6849_s4 = inlined_call_operand.vmem [shape: f32[128,128], index: 4, kind: output, shape index: {}]  }
   0x1   :  { %v441_v0 = vld [vmem:[%s6845_s1 + $0x80] sm:$0xff]  ;;  %v442_v1 = vld [vmem:[%s6845_s1 + $0x88] sm:$0xff]  ;;  %v443_v11 = vld [vmem:[%s6845_s1 + $0x90] sm:$0xff] }
   0x2   :  { %v473_v2 = vld [vmem:[%s6845_s1 + $0x180] sm:$0xff]  ;;  %v3930_v3 = vpack.c.bf16 %v442_v1, %v441_v0  ;;  %v474_v4 = vld [vmem:[%s6845_s1 + $0x188] sm:$0xff]  ;;  %v444_v13 = vld [vmem:[%s6845_s1 + $0x98] sm:$0xff] }
   0x3   :  { %v425_v5 = vld [vmem:[%s6845_s1] sm:$0xff]  ;;  %v426_v6 = vld [vmem:[%s6845_s1 + $0x8] sm:$0xff]  ;;  %v3962_v7 = vpack.c.bf16 %v474_v4, %v473_v2  ;;  %v475_v14 = vld [vmem:[%s6845_s1 + $0x190] sm:$0xff]  ;;  %v3934_v16 = vpack.c.bf16 %v444_v13, %v443_v11 }
   0x4   :  { %v3932_v8 = vpack.c.bf16 %v426_v6, %v425_v5  ;;  %v457_v9 = vld [vmem:[%s6845_s1 + $0x100] sm:$0xff]  ;;  %v458_v10 = vld [vmem:[%s6845_s1 + $0x108] sm:$0xff]  ;;  %3931 = vmatprep.subr.bf16.mxu0 %v3930_v3  ;;  %v476_v15 = vld [vmem:[%s6845_s1 + $0x198] sm:$0xff] }
   0x5   :  { %v3964_v12 = vpack.c.bf16 %v458_v10, %v457_v9  ;;  %3963 = vmatprep.subr.bf16.mxu1 %v3962_v7  ;;  %v3966_v17 = vpack.c.bf16 %v476_v15, %v475_v14  ;;  %v427_v18 = vld [vmem:[%s6845_s1 + $0x10] sm:$0xff]  ;;  %v428_v19 = vld [vmem:[%s6845_s1 + $0x18] sm:$0xff]  ;;  %v445_v23 = vld [vmem:[%s6845_s1 + $0xa0] sm:$0xff] }
   0x6   :  { %3933 = vmatpush3.bf16.msra.mxu0 %v3932_v8  ;;  %v459_v20 = vld [vmem:[%s6845_s1 + $0x110] sm:$0xff]  ;;  %v3936_v21 = vpack.c.bf16 %v428_v19, %v427_v18  ;;  %v460_v22 = vld [vmem:[%s6845_s1 + $0x118] sm:$0xff]  ;;  %v446_v24 = vld [vmem:[%s6845_s1 + $0xa8] sm:$0xff] }
   0x7   :  { %3965 = vmatpush3.bf16.msra.mxu1 %v3964_v12  ;;  %3935 = vmatprep.subr.bf16.mxu0 %v3934_v16  ;;  %v3968_v25 = vpack.c.bf16 %v460_v22, %v459_v20  ;;  %v3938_v26 = vpack.c.bf16 %v446_v24, %v445_v23  ;;  %v477_v27 = vld [vmem:[%s6845_s1 + $0x1a0] sm:$0xff]  ;;  %v478_v28 = vld [vmem:[%s6845_s1 + $0x1a8] sm:$0xff]  ;;  %v447_v35 = vld [vmem:[%s6845_s1 + $0xb0] sm:$0xff] }
   0x8   :  { %3967 = vmatprep.subr.bf16.mxu1 %v3966_v17  ;;  %v429_v29 = vld [vmem:[%s6845_s1 + $0x20] sm:$0xff]  ;;  %v3970_v30 = vpack.c.bf16 %v478_v28, %v477_v27  ;;  %v430_v31 = vld [vmem:[%s6845_s1 + $0x28] sm:$0xff]  ;;  %v448_v36 = vld [vmem:[%s6845_s1 + $0xb8] sm:$0xff] }
   0x9   :  { %v461_v32 = vld [vmem:[%s6845_s1 + $0x120] sm:$0xff]  ;;  %v462_v33 = vld [vmem:[%s6845_s1 + $0x128] sm:$0xff]  ;;  %v3940_v34 = vpack.c.bf16 %v430_v31, %v429_v29  ;;  %v479_v37 = vld [vmem:[%s6845_s1 + $0x1b0] sm:$0xff]  ;;  %v3942_v39 = vpack.c.bf16 %v448_v36, %v447_v35 }
   0xa   :  { %3937 = vmatpush3.bf16.msra.mxu0 %v3936_v21  ;;  %v3972_v38 = vpack.c.bf16 %v462_v33, %v461_v32  ;;  %v480_v40 = vld [vmem:[%s6845_s1 + $0x1b8] sm:$0xff]  ;;  %v431_v41 = vld [vmem:[%s6845_s1 + $0x30] sm:$0xff]  ;;  %v449_v46 = vld [vmem:[%s6845_s1 + $0xc0] sm:$0xff] }
   0xb   :  { %3969 = vmatpush3.bf16.msra.mxu1 %v3968_v25  ;;  %3939 = vmatprep.subr.bf16.mxu0 %v3938_v26  ;;  %v432_v42 = vld [vmem:[%s6845_s1 + $0x38] sm:$0xff]  ;;  %v3974_v43 = vpack.c.bf16 %v480_v40, %v479_v37  ;;  %v463_v44 = vld [vmem:[%s6845_s1 + $0x130] sm:$0xff]  ;;  %v450_v47 = vld [vmem:[%s6845_s1 + $0xc8] sm:$0xff] }
   0xc   :  { %3971 = vmatprep.subr.bf16.mxu1 %v3970_v30  ;;  %v464_v45 = vld [vmem:[%s6845_s1 + $0x138] sm:$0xff]  ;;  %v481_v48 = vld [vmem:[%s6845_s1 + $0x1c0] sm:$0xff]  ;;  %v482_v49 = vld [vmem:[%s6845_s1 + $0x1c8] sm:$0xff]  ;;  %v3944_v50 = vpack.c.bf16 %v432_v42, %v431_v41  ;;  %v3946_v52 = vpack.c.bf16 %v450_v47, %v449_v46 }
   0xd   :  { %v3976_v51 = vpack.c.bf16 %v464_v45, %v463_v44  ;;  %v433_v53 = vld [vmem:[%s6845_s1 + $0x40] sm:$0xff]  ;;  %v434_v54 = vld [vmem:[%s6845_s1 + $0x48] sm:$0xff]  ;;  %v3978_v56 = vpack.c.bf16 %v482_v49, %v481_v48  ;;  %v451_v58 = vld [vmem:[%s6845_s1 + $0xd0] sm:$0xff] }
   0xe   :  { %3941 = vmatpush3.bf16.msra.mxu0 %v3940_v34  ;;  %v465_v55 = vld [vmem:[%s6845_s1 + $0x140] sm:$0xff]  ;;  %v466_v57 = vld [vmem:[%s6845_s1 + $0x148] sm:$0xff]  ;;  %v452_v59 = vld [vmem:[%s6845_s1 + $0xd8] sm:$0xff]  ;;  %v3948_v62 = vpack.c.bf16 %v434_v54, %v433_v53 }
   0xf   :  { %3973 = vmatpush3.bf16.msra.mxu1 %v3972_v38  ;;  %3943 = vmatprep.subr.bf16.mxu0 %v3942_v39  ;;  %v483_v60 = vld [vmem:[%s6845_s1 + $0x1d0] sm:$0xff]  ;;  %v484_v61 = vld [vmem:[%s6845_s1 + $0x1d8] sm:$0xff]  ;;  %v3980_v63 = vpack.c.bf16 %v466_v57, %v465_v55  ;;  %v3950_v0 = vpack.c.bf16 %v452_v59, %v451_v58  ;;  %v453_v6 = vld [vmem:[%s6845_s1 + $0xe0] sm:$0xff] }
  0x10   :  { %3975 = vmatprep.subr.bf16.mxu1 %v3974_v43  ;;  %v435_v1 = vld [vmem:[%s6845_s1 + $0x50] sm:$0xff]  ;;  %v436_v2 = vld [vmem:[%s6845_s1 + $0x58] sm:$0xff]  ;;  %v3982_v4 = vpack.c.bf16 %v484_v61, %v483_v60  ;;  %v454_v7 = vld [vmem:[%s6845_s1 + $0xe8] sm:$0xff] }
  0x11   :  { %v467_v3 = vld [vmem:[%s6845_s1 + $0x150] sm:$0xff]  ;;  %v468_v5 = vld [vmem:[%s6845_s1 + $0x158] sm:$0xff]  ;;  %v485_v8 = vld [vmem:[%s6845_s1 + $0x1e0] sm:$0xff]  ;;  %v3952_v10 = vpack.c.bf16 %v436_v2, %v435_v1  ;;  %v3954_v14 = vpack.c.bf16 %v454_v7, %v453_v6 }
  0x12   :  { %3945 = vmatpush3.bf16.msra.mxu0 %v3944_v50  ;;  %v486_v9 = vld [vmem:[%s6845_s1 + $0x1e8] sm:$0xff]  ;;  %v437_v11 = vld [vmem:[%s6845_s1 + $0x60] sm:$0xff]  ;;  %v3984_v13 = vpack.c.bf16 %v468_v5, %v467_v3  ;;  %v455_v20 = vld [vmem:[%s6845_s1 + $0xf0] sm:$0xff] }
  0x13   :  { %3977 = vmatpush3.bf16.msra.mxu1 %v3976_v51  ;;  %3947 = vmatprep.subr.bf16.mxu0 %v3946_v52  ;;  %v438_v12 = vld [vmem:[%s6845_s1 + $0x68] sm:$0xff]  ;;  %v469_v15 = vld [vmem:[%s6845_s1 + $0x160] sm:$0xff]  ;;  %v3986_v18 = vpack.c.bf16 %v486_v9, %v485_v8  ;;  %v456_v21 = vld [vmem:[%s6845_s1 + $0xf8] sm:$0xff] }
  0x14   :  { %3979 = vmatprep.subr.bf16.mxu1 %v3978_v56  ;;  %v2960_v16 = vld [vmem:[%s6846_s0 + $0x1] ss:$2 sm:$0xff]  ;;  %v4519_v17 = vld [vmem:[%s6846_s0 + $0x18] ss:$2 sm:$0xff]  ;;  %v487_v22 = vld [vmem:[%s6845_s1 + $0x1f0] sm:$0xff]  ;;  %v3956_v24 = vpack.c.bf16 %v438_v12, %v437_v11  ;;  %v3958_v28 = vpack.c.bf16 %v456_v21, %v455_v20 }
  0x15   :  { %v470_v19 = vld [vmem:[%s6845_s1 + $0x168] sm:$0xff]  ;;  %633 = vmatprep.mubr.f32.mxu0 %v2960_v16  ;;  %v488_v23 = vld [vmem:[%s6845_s1 + $0x1f8] sm:$0xff]  ;;  %778 = vmatprep.mubr.f32.mxu1 %v4519_v17  ;;  %v439_v25 = vld [vmem:[%s6845_s1 + $0x70] sm:$0xff] }
  0x16   :  { %3949 = vmatpush3.bf16.msra.mxu0 %v3948_v62  ;;  %v440_v26 = vld [vmem:[%s6845_s1 + $0x78] sm:$0xff]  ;;  %v3988_v27 = vpack.c.bf16 %v470_v19, %v469_v15  ;;  %v471_v29 = vld [vmem:[%s6845_s1 + $0x170] sm:$0xff]  ;;  %v17_v31 = vld [vmem:[%s6846_s0] ss:$2 sm:$0xff]  ;;  %v3990_v32 = vpack.c.bf16 %v488_v23, %v487_v22 }
  0x17   :  { %3981 = vmatpush3.bf16.msra.mxu1 %v3980_v63  ;;  %3951 = vmatprep.subr.bf16.mxu0 %v3950_v0  ;;  %v472_v30 = vld [vmem:[%s6845_s1 + $0x178] sm:$0xff]  ;;  %v2925_v33 = vld [vmem:[%s6846_s0 + $0x10] ss:$2 sm:$0x1]  ;;  %v505_v34 = vld [vmem:[%s6845_s1 + $0x280] sm:$0xff]  ;;  %v3960_v36 = vpack.c.bf16 %v440_v26, %v439_v25  ;;  %v253_v38 = vrot.slane %v17_v31, 1 }
  0x18   :  { %3983 = vmatprep.subr.bf16.mxu1 %v3982_v4  ;;  %v506_v35 = vld [vmem:[%s6845_s1 + $0x288] sm:$0xff]  ;;  %v3992_v37 = vpack.c.bf16 %v472_v30, %v471_v29  ;;  %v254_v39 = vrot.slane %v2925_v33, 1  ;;  %v489_v41 = vld [vmem:[%s6845_s1 + $0x200] sm:$0xff]  ;;  %v4570_v43 = vld [vmem:[%s6846_s0 + $0x30] ss:$2 sm:$0xff] }
  0x19   :  { %v3994_v40 = vpack.c.bf16 %v506_v35, %v505_v34  ;;  %v490_v42 = vld [vmem:[%s6845_s1 + $0x208] sm:$0xff]  ;;  %v2927_v44 = vld [vmem:[%s6846_s0 + $0x40] ss:$2 sm:$0x1]  ;;  %v507_v45 = vld [vmem:[%s6845_s1 + $0x290] sm:$0xff]  ;;  %v256_v51 = vrot.slane %v4570_v43, 1 }
  0x1a   :  { %3953 = vmatpush3.bf16.msra.mxu0 %v3952_v10  ;;  %v508_v46 = vld [vmem:[%s6845_s1 + $0x298] sm:$0xff]  ;;  %v3996_v47 = vpack.c.bf16 %v490_v42, %v489_v41  ;;  %v255_v49 = vsel %vm252_vm0, %v253_v38, %v254_v39  ;;  %v4590_v50 = vld [vmem:[%s6846_s0 + $0x48] ss:$2 sm:$0xff]  ;;  %v257_v52 = vrot.slane %v2927_v44, 1  ;;  %v509_v58 = vld [vmem:[%s6845_s1 + $0x2a0] sm:$0xff] }
  0x1b   :  { %3985 = vmatpush3.bf16.msra.mxu1 %v3984_v13  ;;  %3955 = vmatprep.subr.bf16.mxu0 %v3954_v14  ;;  %v4584_v48 = vld [vmem:[%s6846_s0 + $0x31] ss:$2 sm:$0xff]  ;;  %v4596_v53 = vld [vmem:[%s6846_s0 + $0x60] ss:$2 sm:$0xff]  ;;  %v3998_v55 = vpack.c.bf16 %v508_v46, %v507_v45  ;;  %v4616_v60 = vld [vmem:[%s6846_s0 + $0x61] ss:$2 sm:$0xff] }
  0x1c   :  { %3987 = vmatprep.subr.bf16.mxu1 %v3986_v18  ;;  %v2929_v54 = vld [vmem:[%s6846_s0 + $0x70] ss:$2 sm:$0x1]  ;;  %v492_v57 = vld [vmem:[%s6845_s1 + $0x218] sm:$0xff]  ;;  %v510_v59 = vld [vmem:[%s6845_s1 + $0x2a8] sm:$0xff]  ;;  %v4621_v61 = vsel %vm252_vm0, %v256_v51, %v257_v52  ;;  %v259_v63 = vrot.slane %v4596_v53, 1 }
  0x1d   :  { %v491_v56 = vld [vmem:[%s6845_s1 + $0x210] sm:$0xff]  ;;  %v4626_v62 = vld [vmem:[%s6846_s0 + $0x78] ss:$2 sm:$0xff]  ;;  %v260_v0 = vrot.slane %v2929_v54, 1  ;;  %v4002_v4 = vpack.c.bf16 %v510_v59, %v509_v58  ;;  %v494_v6 = vld [vmem:[%s6845_s1 + $0x228] sm:$0xff] }
  0x1e   :  { %3957 = vmatpush3.bf16.msra.mxu0 %v3956_v24  ;;  %v4000_v1 = vpack.c.bf16 %v492_v57, %v491_v56  ;;  %v4632_v2 = vld [vmem:[%s6846_s0 + $0x90] ss:$2 sm:$0xff]  ;;  %v2931_v3 = vld [vmem:[%s6846_s0 + $0xa0] ss:$2 sm:$0x1]  ;;  %v538_v20 = vld [vmem:[%s6845_s1 + $0x388] sm:$0xff] }
  0x1f   :  { %3989 = vmatpush3.bf16.msra.mxu1 %v3988_v27  ;;  %3959 = vmatprep.subr.bf16.mxu0 %v3958_v28  ;;  %v493_v5 = vld [vmem:[%s6845_s1 + $0x220] sm:$0xff]  ;;  %v4647_v7 = vld [vmem:[%s6846_s0 + $0x91] ss:$2 sm:$0xff]  ;;  %v4660_v10 = vld [vmem:[%s6846_s0 + $0xa8] ss:$2 sm:$0xff]  ;;  %v4672_v13 = vsel %vm252_vm0, %v259_v63, %v260_v0  ;;  %v262_v14 = vrot.slane %v4632_v2, 1 }
  0x20   :  { %3991 = vmatprep.subr.bf16.mxu1 %v3990_v32  ;;  %v511_v8 = vld [vmem:[%s6845_s1 + $0x2b0] sm:$0xff]  ;;  %v512_v9 = vld [vmem:[%s6845_s1 + $0x2b8] sm:$0xff]  ;;  %v4665_v11 = vld [vmem:[%s6846_s0 + $0xc0] ss:$2 sm:$0xff]  ;;  %v263_v15 = vrot.slane %v2931_v3, 1  ;;  %v4004_v16 = vpack.c.bf16 %v494_v6, %v493_v5 }
  0x21   :  { %v2933_v12 = vld [vmem:[%s6846_s0 + $0xd0] ss:$2 sm:$0x1]  ;;  %v537_v19 = vld [vmem:[%s6845_s1 + $0x380] sm:$0xff]  ;;  %v4006_v21 = vpack.c.bf16 %v512_v9, %v511_v8  ;;  %v496_v22 = vld [vmem:[%s6845_s1 + $0x238] sm:$0xff]  ;;  %v265_v32 = vrot.slane %v4665_v11, 1 }
  0x22   :  { %3961 = vmatpush3.bf16.msra.mxu0 %v3960_v36  ;;  %v495_v18 = vld [vmem:[%s6845_s1 + $0x230] sm:$0xff]  ;;  %v4026_v23 = vpack.c.bf16 %v538_v20, %v537_v19  ;;  %v521_v24 = vld [vmem:[%s6845_s1 + $0x300] sm:$0xff]  ;;  %v522_v25 = vld [vmem:[%s6845_s1 + $0x308] sm:$0xff]  ;;  %v4709_v30 = vsel %vm252_vm0, %v262_v14, %v263_v15  ;;  %v266_v33 = vrot.slane %v2933_v12, 1 }
  0x23   :  { %3993 = vmatpush3.bf16.msra.mxu1 %v3992_v37  ;;  %3995 = vmatprep.subr.bf16.mxu0 %v3994_v40  ;;  %v4028_v26 = vpack.c.bf16 %v522_v25, %v521_v24  ;;  %v4699_v27 = vld [vmem:[%s6846_s0 + $0xc1] ss:$2 sm:$0xff]  ;;  %v4720_v34 = vld [vmem:[%s6846_s0 + $0xf0] ss:$2 sm:$0xff]  ;;  %v4008_v35 = vpack.c.bf16 %v496_v22, %v495_v18  ;;  %v4735_v40 = vld [vmem:[%s6846_s0 + $0xf1] ss:$2 sm:$0xff] }
  0x24   :  { %v513_v28 = vld [vmem:[%s6845_s1 + $0x2c0] sm:$0xff]  ;;  %v514_v29 = vld [vmem:[%s6845_s1 + $0x2c8] sm:$0xff]  ;;  %4027 = vmatprep.subr.bf16.mxu1 %v4026_v23  ;;  %v539_v41 = vld [vmem:[%s6845_s1 + $0x390] sm:$0xff]  ;;  %v268_v45 = vrot.slane %v4720_v34, 1  ;;  %v4759_v51 = vsel %vm252_vm0, %v265_v32, %v266_v33 }
  0x25   :  { %634 = vmatmul.mubr.f32.vlgmr.msra.gmra.mrb[0].mxu0 %v17_v31  ;;  %v4714_v31 = vld [vmem:[%s6846_s0 + $0xd8] ss:$2 sm:$0xff]  ;;  %v4010_v37 = vpack.c.bf16 %v514_v29, %v513_v28  ;;  %v498_v39 = vld [vmem:[%s6845_s1 + $0x248] sm:$0xff]  ;;  %v515_v58 = vld [vmem:[%s6845_s1 + $0x2d0] sm:$0xff] }
  0x26   :  { %779 = vmatmul.mubr.f32.vlgmr.msra.gmra.mrb[0].mxu1 %v255_v49  ;;  %3997 = vmatpush3.bf16.msra.mxu0 %v3996_v47  ;;  %v2935_v36 = vld [vmem:[%s6846_s0 + $0x100] ss:$2 sm:$0x1]  ;;  %v540_v42 = vld [vmem:[%s6845_s1 + $0x398] sm:$0xff]  ;;  %v4748_v44 = vld [vmem:[%s6846_s0 + $0x108] ss:$2 sm:$0xff] }
  0x27   :  { %638 = vmatprep.mubr.f32.mxu0 %v4584_v48  ;;  %783 = vmatprep.mubr.f32.mxu1 %v4590_v50  ;;  %v497_v38 = vld [vmem:[%s6845_s1 + $0x240] sm:$0xff]  ;;  %v4030_v46 = vpack.c.bf16 %v540_v42, %v539_v41  ;;  %v523_v47 = vld [vmem:[%s6845_s1 + $0x310] sm:$0xff]  ;;  %v524_v49 = vld [vmem:[%s6845_s1 + $0x318] sm:$0xff]  ;;  %v269_v52 = vrot.slane %v2935_v36, 1 }
  0x28   :  { %3999 = vmatprep.subr.bf16.mxu0 %v3998_v55  ;;  %4029 = vmatpush3.bf16.msra.mxu1 %v4028_v26  ;;  %v4764_v54 = vld [vmem:[%s6846_s0 + $0x120] ss:$2 sm:$0xff]  ;;  %v2937_v55 = vld [vmem:[%s6846_s0 + $0x130] ss:$2 sm:$0x1]  ;;  %v4012_v56 = vpack.c.bf16 %v498_v39, %v497_v38  ;;  %v4032_v57 = vpack.c.bf16 %v524_v49, %v523_v47  ;;  %v516_v59 = vld [vmem:[%s6845_s1 + $0x2d8] sm:$0xff] }
  0x29   :  { %639 = vmatmul.mubr.f32.gmra.mrb[2].mxu0 %v4570_v43  ;;  %4031 = vmatprep.subr.bf16.mxu1 %v4030_v46  ;;  %v499_v63 = vld [vmem:[%s6845_s1 + $0x250] sm:$0xff]  ;;  %v4014_v0 = vpack.c.bf16 %v516_v59, %v515_v58  ;;  %v541_v3 = vld [vmem:[%s6845_s1 + $0x3a0] sm:$0xff]  ;;  %v4800_v9 = vsel %vm252_vm0, %v268_v45, %v269_v52  ;;  %v271_v14 = vrot.slane %v4764_v54, 1  ;;  %v272_v15 = vrot.slane %v2937_v55, 1  ;;  %v526_v18 = vld [vmem:[%s6845_s1 + $0x328] sm:$0xff] }
  0x2a   :  { %784 = vmatmul.mubr.f32.gmra.mrb[2].mxu1 %v4621_v61  ;;  %643 = vmatprep.mubr.f32.mxu0 %v4616_v60  ;;  %v4793_v5 = vld [vmem:[%s6846_s0 + $0x121] ss:$2 sm:$0xff]  ;;  %v4805_v12 = vld [vmem:[%s6846_s0 + $0x138] ss:$2 sm:$0xff]  ;;  %v543_v19 = vld [vmem:[%s6845_s1 + $0x3b0] sm:$0xff] }
  0x2b   :  { %788 = vmatprep.mubr.f32.mxu1 %v4626_v62  ;;  %4001 = vmatpush3.bf16.msra.mxu0 %v4000_v1  ;;  %v500_v1 = vld [vmem:[%s6845_s1 + $0x258] sm:$0xff]  ;;  %v525_v8 = vld [vmem:[%s6845_s1 + $0x320] sm:$0xff]  ;;  %v527_v26 = vld [vmem:[%s6845_s1 + $0x330] sm:$0xff] }
  0x2c   :  { %4003 = vmatprep.subr.bf16.mxu0 %v4002_v4  ;;  %4033 = vmatpush3.bf16.msra.mxu1 %v4032_v57  ;;  %v542_v4 = vld [vmem:[%s6845_s1 + $0x3a8] sm:$0xff]  ;;  %v4817_v20 = vld [vmem:[%s6846_s0 + $0x150] ss:$2 sm:$0xff]  ;;  %v4036_v22 = vpack.c.bf16 %v526_v18, %v525_v8  ;;  %v4829_v24 = vld [vmem:[%s6846_s0 + $0x151] ss:$2 sm:$0xff] }
  0x2d   :  { %644 = vmatmul.mubr.f32.gmra.mrb[4].mxu0 %v4596_v53  ;;  %v4034_v6 = vpack.c.bf16 %v542_v4, %v541_v3  ;;  %v544_v23 = vld [vmem:[%s6845_s1 + $0x3b8] sm:$0xff]  ;;  %v4842_v29 = vld [vmem:[%s6846_s0 + $0x168] ss:$2 sm:$0xff]  ;;  %v2943_v33 = vld [vmem:[%s6846_s0 + $0x1c0] ss:$2 sm:$0x1] }
  0x2e   :  { %789 = vmatmul.mubr.f32.gmra.mrb[4].mxu1 %v4672_v13  ;;  %648 = vmatprep.mubr.f32.mxu0 %v4647_v7  ;;  %v4038_v25 = vpack.c.bf16 %v544_v23, %v543_v19  ;;  %v528_v28 = vld [vmem:[%s6845_s1 + $0x338] sm:$0xff]  ;;  %v274_v36 = vrot.slane %v4817_v20, 1  ;;  %v517_v38 = vld [vmem:[%s6845_s1 + $0x2e0] sm:$0xff]  ;;  %v518_v39 = vld [vmem:[%s6845_s1 + $0x2e8] sm:$0xff]  ;;  %v278_v3 = vrot.slane %v2943_v33, 1 }
  0x2f   :  { %793 = vmatprep.mubr.f32.mxu1 %v4660_v10  ;;  %4005 = vmatpush3.bf16.msra.mxu0 %v4004_v16  ;;  %v4016_v16 = vpack.c.bf16 %v500_v1, %v499_v63  ;;  %v4847_v32 = vld [vmem:[%s6846_s0 + $0x1b0] ss:$2 sm:$0xff]  ;;  %v501_v41 = vld [vmem:[%s6845_s1 + $0x260] sm:$0xff]  ;;  %v4040_v42 = vpack.c.bf16 %v528_v28, %v527_v26  ;;  %v4018_v45 = vpack.c.bf16 %v518_v39, %v517_v38  ;;  %v502_v46 = vld [vmem:[%s6845_s1 + $0x268] sm:$0xff] }
  0x30   :  { %4007 = vmatprep.subr.bf16.mxu0 %v4006_v21  ;;  %v2939_v21 = vld [vmem:[%s6846_s0 + $0x160] ss:$2 sm:$0x1]  ;;  %4035 = vmatprep.subr.bf16.mxu1 %v4034_v6  ;;  %v546_v49 = vld [vmem:[%s6845_s1 + $0x3c8] sm:$0xff]  ;;  %v4020_v52 = vpack.c.bf16 %v502_v46, %v501_v41  ;;  %v2969_v57 = vld [vmem:[%s6846_s0 + $0x1b1] ss:$2 sm:$0xff] }
  0x31   :  { %649 = vmatmul.mubr.f32.gmra.mrb[6].mxu0 %v4632_v2  ;;  %4037 = vmatpush3.bf16.msra.mxu1 %v4036_v22  ;;  %v545_v47 = vld [vmem:[%s6845_s1 + $0x3c0] sm:$0xff]  ;;  %v530_v58 = vld [vmem:[%s6845_s1 + $0x348] sm:$0xff]  ;;  %v547_v59 = vld [vmem:[%s6845_s1 + $0x3d0] sm:$0xff]  ;;  %v277_v1 = vrot.slane %v4847_v32, 1 }
  0x32   :  { %794 = vmatmul.mubr.f32.gmra.mrb[6].mxu1 %v4709_v30  ;;  %653 = vmatprep.mubr.f32.mxu0 %v4699_v27  ;;  %v4042_v55 = vpack.c.bf16 %v546_v49, %v545_v47  ;;  %v548_v4 = vld [vmem:[%s6845_s1 + $0x3d8] sm:$0xff]  ;;  %v4906_v6 = vld [vmem:[%s6846_s0 + $0x1e0] ss:$2 sm:$0xff]  ;;  %v2945_v8 = vld [vmem:[%s6846_s0 + $0x1f0] ss:$2 sm:$0x1] }
  0x33   :  { %798 = vmatprep.mubr.f32.mxu1 %v4714_v31  ;;  %4009 = vmatpush3.bf16.msra.mxu0 %v4008_v35  ;;  %v4854_v35 = vsel %vm252_vm0, %v271_v14, %v272_v15  ;;  %v4915_v15 = vld [vmem:[%s6846_s0 + $0x1e1] ss:$2 sm:$0xff]  ;;  %v531_v18 = vld [vmem:[%s6845_s1 + $0x350] sm:$0xff]  ;;  %v532_v19 = vld [vmem:[%s6845_s1 + $0x358] sm:$0xff]  ;;  %v279_v26 = vsel %vm252_vm0, %v277_v1, %v278_v3  ;;  %v280_v28 = vrot.slane %v4906_v6, 1  ;;  %v281_v33 = vrot.slane %v2945_v8, 1 }
  0x34   :  { %4011 = vmatprep.subr.bf16.mxu0 %v4010_v37  ;;  %v275_v37 = vrot.slane %v2939_v21, 1  ;;  %4039 = vmatprep.subr.bf16.mxu1 %v4038_v25  ;;  %v4927_v21 = vld [vmem:[%s6846_s0 + $0x1f8] ss:$2 sm:$0xff]  ;;  %v519_v22 = vld [vmem:[%s6845_s1 + $0x2f0] sm:$0xff]  ;;  %v550_v39 = vld [vmem:[%s6845_s1 + $0x3e8] sm:$0xff] }
  0x35   :  { %654 = vmatmul.mubr.f32.gmra.mrb[8].mxu0 %v4665_v11  ;;  %4041 = vmatpush3.bf16.msra.mxu1 %v4040_v42  ;;  %v520_v23 = vld [vmem:[%s6845_s1 + $0x2f8] sm:$0xff]  ;;  %v503_v25 = vld [vmem:[%s6845_s1 + $0x270] sm:$0xff]  ;;  %v549_v38 = vld [vmem:[%s6845_s1 + $0x3e0] sm:$0xff] }
  0x36   :  { %799 = vmatmul.mubr.f32.gmra.mrb[8].mxu1 %v4759_v51  ;;  %658 = vmatprep.mubr.f32.mxu0 %v4735_v40  ;;  %v4892_v63 = vsel %vm252_vm0, %v274_v36, %v275_v37  ;;  %v4022_v36 = vpack.c.bf16 %v520_v23, %v519_v22  ;;  %v504_v37 = vld [vmem:[%s6845_s1 + $0x278] sm:$0xff]  ;;  %v2947_v42 = vld [vmem:[%s6846_s0 + $0x220] ss:$2 sm:$0x1]  ;;  %v4050_v47 = vpack.c.bf16 %v550_v39, %v549_v38 }
  0x37   :  { %803 = vmatprep.mubr.f32.mxu1 %v4748_v44  ;;  %4013 = vmatpush3.bf16.msra.mxu0 %v4012_v56  ;;  %v529_v56 = vld [vmem:[%s6845_s1 + $0x340] sm:$0xff]  ;;  %v4953_v41 = vld [vmem:[%s6846_s0 + $0x210] ss:$2 sm:$0xff]  ;;  %v4024_v46 = vpack.c.bf16 %v504_v37, %v503_v25  ;;  %v284_v1 = vrot.slane %v2947_v42, 1 }
  0x38   :  { %4015 = vmatprep.subr.bf16.mxu0 %v4014_v0  ;;  %v4897_v0 = vld [vmem:[%s6846_s0 + $0x1c8] ss:$2 sm:$0xff]  ;;  %v4044_v14 = vpack.c.bf16 %v530_v58, %v529_v56  ;;  %4043 = vmatprep.subr.bf16.mxu1 %v4042_v55  ;;  %v533_v49 = vld [vmem:[%s6845_s1 + $0x360] sm:$0xff]  ;;  %v4969_v55 = vld [vmem:[%s6846_s0 + $0x211] ss:$2 sm:$0xff] }
  0x39   :  { %659 = vmatmul.mubr.f32.gmra.mrb[10].mxu0 %v4720_v34  ;;  %v552_v56 = vld [vmem:[%s6845_s1 + $0x3f8] sm:$0xff]  ;;  %v4984_v58 = vld [vmem:[%s6846_s0 + $0x228] ss:$2 sm:$0xff]  ;;  %v553_v3 = vld [vmem:[%s6845_s1 + $0x400] sm:$0xff] }
  0x3a   :  { %804 = vmatmul.mubr.f32.gmra.mrb[10].mxu1 %v4800_v9  ;;  %663 = vmatprep.mubr.f32.mxu0 %v4793_v5  ;;  %v2949_v8 = vld [vmem:[%s6846_s0 + $0x250] ss:$2 sm:$0x1]  ;;  %v536_v22 = vld [vmem:[%s6845_s1 + $0x378] sm:$0xff] }
  0x3b   :  { %808 = vmatprep.mubr.f32.mxu1 %v4805_v12  ;;  %4017 = vmatpush3.bf16.msra.mxu0 %v4016_v16  ;;  %v4046_v16 = vpack.c.bf16 %v548_v4, %v547_v59  ;;  %v283_v59 = vrot.slane %v4953_v41, 1  ;;  %v4993_v4 = vld [vmem:[%s6846_s0 + $0x240] ss:$2 sm:$0xff]  ;;  %v5031_v37 = vld [vmem:[%s6846_s0 + $0x270] ss:$2 sm:$0xff] }
  0x3c   :  { %4019 = vmatprep.subr.bf16.mxu0 %v4018_v45  ;;  %4045 = vmatpush3.bf16.msra.mxu1 %v4044_v14  ;;  %v4048_v45 = vpack.c.bf16 %v532_v19, %v531_v18  ;;  %v535_v19 = vld [vmem:[%s6845_s1 + $0x370] sm:$0xff]  ;;  %v2951_v38 = vld [vmem:[%s6846_s0 + $0x280] ss:$2 sm:$0x1] }
  0x3d   :  { %664 = vmatmul.mubr.f32.gmra.mrb[12].mxu0 %v4764_v54  ;;  %4047 = vmatprep.subr.bf16.mxu1 %v4046_v16  ;;  %v554_v16 = vld [vmem:[%s6845_s1 + $0x408] sm:$0xff]  ;;  %v5014_v25 = vsel %vm252_vm0, %v283_v59, %v284_v1  ;;  %v4056_v39 = vpack.c.bf16 %v536_v22, %v535_v19  ;;  %v5077_v1 = vld [vmem:[%s6846_s0 + $0x2b8] ss:$2 sm:$0xff] }
  0x3e   :  { %809 = vmatmul.mubr.f32.gmra.mrb[12].mxu1 %v4854_v35  ;;  %668 = vmatprep.mubr.f32.mxu0 %v4829_v24  ;;  %v5008_v23 = vpack.c.bf16 %v554_v16, %v553_v3  ;;  %6856 = vst [vmem:[#allocation3_spill] sm:$0xff] %v5014_v25  ;;  %v5072_v59 = vld [vmem:[%s6846_s0 + $0x2a1] ss:$2 sm:$0xff]  ;;  %v2955_v16 = vld [vmem:[%s6846_s0 + $0x2e0] ss:$2 sm:$0x1] }
  0x3f   :  { %813 = vmatprep.mubr.f32.mxu1 %v4842_v29  ;;  %4021 = vmatpush3.bf16.msra.mxu0 %v4020_v52  ;;  %v534_v52 = vld [vmem:[%s6845_s1 + $0x368] sm:$0xff] }
  0x40   :  { %4023 = vmatprep.subr.bf16.mxu0 %v4022_v36  ;;  %4049 = vmatpush3.bf16.msra.mxu1 %v4048_v45  ;;  %v4052_v14 = vpack.c.bf16 %v534_v52, %v533_v49  ;;  %v287_v36 = vrot.slane %v2949_v8, 1  ;;  %v5046_v45 = vld [vmem:[%s6846_s0 + $0x271] ss:$2 sm:$0xff]  ;;  %v290_v49 = vrot.slane %v2951_v38, 1  ;;  %v5057_v52 = vld [vmem:[%s6846_s0 + $0x2a0] ss:$2 sm:$0xff] }
  0x41   :  { %669 = vmatmul.mubr.f32.gmra.mrb[14].mxu0 %v4817_v20  ;;  %4051 = vmatprep.subr.bf16.mxu1 %v4050_v47  ;;  %v289_v47 = vrot.slane %v5031_v37, 1  ;;  %v292_v3 = vrot.slane %v5057_v52, 1  ;;  %v5103_v22 = vld [vmem:[%s6846_s0 + $0x2e8] ss:$2 sm:$0xff] }
  0x42   :  { %814 = vmatmul.mubr.f32.gmra.mrb[14].mxu1 %v4892_v63  ;;  %673 = vmatprep.mubr.f32.mxu0 %v2969_v57  ;;  %v4979_v57 = vsel %vm252_vm0, %v280_v28, %v281_v33  ;;  %v5024_v28 = vld [vmem:[%s6846_s0 + $0x258] ss:$2 sm:$0xff]  ;;  %v286_v33 = vrot.slane %v4993_v4, 1 }
  0x43   :  { %818 = vmatprep.mubr.f32.mxu1 %v4897_v0  ;;  %4025 = vmatpush3.bf16.msra.mxu0 %v4024_v46  ;;  %v5051_v46 = vld [vmem:[%s6846_s0 + $0x288] ss:$2 sm:$0xff] }
  0x44   :  { %4059 = vmatprep.subr.bf16.mxu0 %v5008_v23  ;;  %4053 = vmatpush3.bf16.msra.mxu1 %v4052_v14  ;;  %v5041_v42 = vsel %vm252_vm0, %v286_v33, %v287_v36  ;;  %v5083_v14 = vld [vmem:[%s6846_s0 + $0x2d0] ss:$2 sm:$0xff]  ;;  %v296_v36 = vrot.slane %v2955_v16, 1  ;;  %v5109_v38 = vld [vmem:[%s6846_s0 + $0x300] ss:$2 sm:$0xff] }
  0x45   :  { %674 = vmatmul.mubr.f32.gmra.mrb[16].mxu0 %v4847_v32  ;;  %v551_v32 = vld [vmem:[%s6845_s1 + $0x3f0] sm:$0xff]  ;;  %6857 = vst [vmem:[#allocation4_spill] sm:$0xff] %v5041_v42  ;;  %v295_v33 = vrot.slane %v5083_v14, 1 }
  0x46   :  { %819 = vmatmul.mubr.f32.gmra.mrb[16].mxu1 %v279_v26  ;;  %678 = vmatprep.mubr.f32.mxu0 %v4915_v15  ;;  %v4054_v18 = vpack.c.bf16 %v552_v56, %v551_v32  ;;  %v5019_v26 = vld [vmem:[%s6846_s0 + $0x241] ss:$2 sm:$0xff]  ;;  %v2953_v32 = vld [vmem:[%s6846_s0 + $0x2b0] ss:$2 sm:$0x1]  ;;  %v5067_v56 = vsel %vm252_vm0, %v289_v47, %v290_v49  ;;  %v349_v49 = vrot.slane %v4519_v17, 1 }
  0x47   :  { %823 = vmatprep.mubr.f32.mxu1 %v4927_v21  ;;  %6858 = vst [vmem:[#allocation5_spill] sm:$0xff] %v5067_v56  ;;  %v293_v8 = vrot.slane %v2953_v32, 1  ;;  %v2979_v47 = vld [vmem:[%s6846_s0 + $0x28] ss:$2 sm:$0x1]  ;;  %v5123_v32 = vsel %vm252_vm0, %v295_v33, %v296_v36 }
  0x48   :  { %4055 = vmatprep.subr.bf16.mxu1 %v4054_v18  ;;  %v5094_v18 = vld [vmem:[%s6846_s0 + $0x2d1] ss:$2 sm:$0xff]  ;;  %6860 = vst [vmem:[#allocation7_spill] sm:$0xff] %v5123_v32  ;;  %v5134_v17 = vld [vmem:[%s6846_s0 + $0x318] ss:$2 sm:$0xff] }
  0x49   :  { %679 = vmatmul.mubr.f32.gmra.mrb[18].mxu0 %v4906_v6  ;;  %4057 = vmatpush3.bf16.msra.mxu1 %v4056_v39  ;;  %v5098_v19 = vsel %vm252_vm0, %v292_v3, %v293_v8  ;;  %v2957_v39 = vld [vmem:[%s6846_s0 + $0x310] ss:$2 sm:$0x1]  ;;  %v5128_v3 = vld [vmem:[%s6846_s0 + $0x301] ss:$2 sm:$0xff]  ;;  %v298_v8 = vrot.slane %v5109_v38, 1 }
  0x4a   :  { %824 = vmatmul.mubr.f32.gmra.mrb[18].mxu1 %v4979_v57  ;;  %683 = vmatprep.mubr.f32.mxu0 %v4969_v55  ;;  %6859 = vst [vmem:[#allocation6_spill] sm:$0xff] %v5098_v19  ;;  %v299_v16 = vrot.slane %v2957_v39, 1  ;;  %v2981_v33 = vld [vmem:[%s6846_s0 + $0x58] ss:$2 sm:$0x1] }
  0x4b   :  { %828 = vmatprep.mubr.f32.mxu1 %v4984_v58 }
  0x4c   :  { %v5144_v36 = vsel %vm252_vm0, %v298_v8, %v299_v16  ;;  %v556_v8 = vld [vmem:[%s6845_s1 + $0x418] sm:$0xff] }
  0x4d   :  { %684 = vmatmul.mubr.f32.gmra.mrb[20].mxu0 %v4953_v41  ;;  %6861 = vst [vmem:[#allocation8_spill] sm:$0xff] %v5144_v36 }
  0x4e   :  { %829 = vmatmul.mubr.f32.gmra.mrb[20].mxu1 %v5014_v25  ;;  %688 = vmatprep.mubr.f32.mxu0 %v5019_v26  ;;  %v2985_v25 = vld [vmem:[%s6846_s0 + $0xb8] ss:$2 sm:$0x1] }
  0x4f   :  { %833 = vmatprep.mubr.f32.mxu1 %v5024_v28 }
  0x51   :  { %689 = vmatmul.mubr.f32.gmra.mrb[22].mxu0 %v4993_v4 }
  0x52   :  { %834 = vmatmul.mubr.f32.gmra.mrb[22].mxu1 %v5041_v42  ;;  %693 = vmatprep.mubr.f32.mxu0 %v5046_v45  ;;  %v2983_v42 = vld [vmem:[%s6846_s0 + $0x88] ss:$2 sm:$0x1] }
  0x53   :  { %838 = vmatprep.mubr.f32.mxu1 %v5051_v46 }
  0x55   :  { %694 = vmatmul.mubr.f32.gmra.mrb[24].mxu0 %v5031_v37 }
  0x56   :  { %839 = vmatmul.mubr.f32.gmra.mrb[24].mxu1 %v5067_v56  ;;  %698 = vmatprep.mubr.f32.mxu0 %v5072_v59  ;;  %v350_v56 = vrot.slane %v2979_v47, 1  ;;  %v352_v47 = vrot.slane %v4590_v50, 1  ;;  %v3010_v50 = vld [vmem:[%s6846_s0 + $0x19] ss:$2 sm:$0xff] }
  0x57   :  { %843 = vmatprep.mubr.f32.mxu1 %v5077_v1 }
  0x58   :  { %v351_v39 = vsel %vm252_vm0, %v349_v49, %v350_v56  ;;  %v355_v56 = vrot.slane %v4626_v62, 1  ;;  %v356_v49 = vrot.slane %v2983_v42, 1  ;;  %v358_v62 = vrot.slane %v4660_v10, 1  ;;  %v560_v10 = vld [vmem:[%s6845_s1 + $0x438] sm:$0xff] }
  0x59   :  { %699 = vmatmul.mubr.f32.gmra.mrb[26].mxu0 %v5057_v52 }
  0x5a   :  { %844 = vmatmul.mubr.f32.gmra.mrb[26].mxu1 %v5098_v19  ;;  %703 = vmatprep.mubr.f32.mxu0 %v5094_v18  ;;  %v353_v19 = vrot.slane %v2981_v33, 1  ;;  %v357_v42 = vsel %vm252_vm0, %v355_v56, %v356_v49  ;;  %v364_v56 = vrot.slane %v4748_v44, 1  ;;  %v564_v44 = vld [vmem:[%s6845_s1 + $0x458] sm:$0xff] }
  0x5b   :  { %848 = vmatprep.mubr.f32.mxu1 %v5103_v22 }
  0x5c   :  { %v354_v16 = vsel %vm252_vm0, %v352_v47, %v353_v19  ;;  %v359_v19 = vrot.slane %v2985_v25, 1  ;;  %v361_v25 = vrot.slane %v4714_v31, 1  ;;  %v562_v31 = vld [vmem:[%s6845_s1 + $0x448] sm:$0xff] }
  0x5d   :  { %704 = vmatmul.mubr.f32.gmra.mrb[28].mxu0 %v5083_v14 }
  0x5e   :  { %849 = vmatmul.mubr.f32.gmra.mrb[28].mxu1 %v5123_v32  ;;  %708 = vmatprep.mubr.f32.mxu0 %v5128_v3  ;;  %v555_v32 = vld [vmem:[%s6845_s1 + $0x410] sm:$0xff] }
  0x5f   :  { %853 = vmatprep.mubr.f32.mxu1 %v5134_v17  ;;  %v4062_v33 = vpack.c.bf16 %v556_v8, %v555_v32  ;;  %v2987_v32 = vld [vmem:[%s6846_s0 + $0xe8] ss:$2 sm:$0x1]  ;;  %v2989_v8 = vld [vmem:[%s6846_s0 + $0x118] ss:$2 sm:$0x1] }
  0x60   :  { %v362_v47 = vrot.slane %v2987_v32, 1 }
  0x61   :  { %709 = vmatmul.mubr.f32.gmra.mrb[30].mxu0 %v5109_v38 }
  0x62   :  { %854 = vmatmul.mubr.f32.gmra.mrb[30].mxu1 %v5144_v36  ;;  %923 = vmatprep.mubr.f32.mxu0 %v351_v39  ;;  %v557_v39 = vld [vmem:[%s6845_s1 + $0x420] sm:$0xff]  ;;  %v558_v36 = vld [vmem:[%s6845_s1 + $0x428] sm:$0xff]  ;;  %v363_v49 = vsel %vm252_vm0, %v361_v25, %v362_v47 }
  0x63   :  { %1068 = vmatprep.mubr.f32.mxu1 %v4584_v48  ;;  %v3011_v48 = vld [vmem:[%s6846_s0 + $0x49] ss:$2 sm:$0xff] }
  0x65   :  { %924 = vmatmul.mubr.f32.vlgmr.msra.gmra.mrb[32].mxu0 %v3010_v50 }
  0x66   :  { %4061 = vmatpush3.bf16.msra.mxu0 %v5008_v23  ;;  %1069 = vmatmul.mubr.f32.vlgmr.msra.gmra.mrb[32].mxu1 %v4570_v43  ;;  %v4066_v23 = vpack.c.bf16 %v558_v36, %v557_v39  ;;  %v559_v43 = vld [vmem:[%s6845_s1 + $0x430] sm:$0xff]  ;;  %v360_v36 = vsel %vm252_vm0, %v358_v62, %v359_v19  ;;  %v2993_v19 = vld [vmem:[%s6846_s0 + $0x178] ss:$2 sm:$0x1] }
  0x67   :  { %928 = vmatprep.mubr.f32.mxu0 %v354_v16  ;;  %1073 = vmatprep.mubr.f32.mxu1 %v4616_v60  ;;  %v3012_v60 = vld [vmem:[%s6846_s0 + $0x79] ss:$2 sm:$0xff]  ;;  %v4070_v50 = vpack.c.bf16 %v560_v10, %v559_v43  ;;  %v365_v16 = vrot.slane %v2989_v8, 1  ;;  %v371_v10 = vrot.slane %v2993_v19, 1 }
  0x68   :  { %4063 = vmatprep.subr.bf16.mxu0 %v4062_v33  ;;  %v3007_v19 = vld [vmem:[%s6846_s0 + $0x2f8] ss:$2 sm:$0x1] }
  0x69   :  { %929 = vmatmul.mubr.f32.gmra.mrb[34].mxu0 %v3011_v48  ;;  %v367_v48 = vrot.slane %v4805_v12, 1  ;;  %v366_v62 = vsel %vm252_vm0, %v364_v56, %v365_v16  ;;  %v566_v12 = vld [vmem:[%s6845_s1 + $0x468] sm:$0xff] }
  0x6a   :  { %1074 = vmatmul.mubr.f32.gmra.mrb[34].mxu1 %v4596_v53  ;;  %933 = vmatprep.mubr.f32.mxu0 %v357_v42  ;;  %v561_v53 = vld [vmem:[%s6845_s1 + $0x440] sm:$0xff] }
  0x6b   :  { %1078 = vmatprep.mubr.f32.mxu1 %v4647_v7  ;;  %4065 = vmatpush3.bf16.msra.mxu0 %v4062_v33  ;;  %v3013_v7 = vld [vmem:[%s6846_s0 + $0xa9] ss:$2 sm:$0xff]  ;;  %v2991_v33 = vld [vmem:[%s6846_s0 + $0x148] ss:$2 sm:$0x1]  ;;  %v4074_v39 = vpack.c.bf16 %v562_v31, %v561_v53 }
  0x6c   :  { %4067 = vmatprep.subr.bf16.mxu0 %v4066_v23  ;;  %v368_v42 = vrot.slane %v2991_v33, 1  ;;  %v5276_v31 = vld [vmem:[%s6846_s0 + $0x180] ss:$2 sm:$0xff] }
  0x6d   :  { %934 = vmatmul.mubr.f32.gmra.mrb[36].mxu0 %v3012_v60  ;;  %v2995_v60 = vld [vmem:[%s6846_s0 + $0x1d8] ss:$2 sm:$0x1] }
  0x6e   :  { %1079 = vmatmul.mubr.f32.gmra.mrb[36].mxu1 %v4632_v2  ;;  %938 = vmatprep.mubr.f32.mxu0 %v360_v36  ;;  %v563_v2 = vld [vmem:[%s6845_s1 + $0x450] sm:$0xff]  ;;  %v369_v43 = vsel %vm252_vm0, %v367_v48, %v368_v42  ;;  %v373_v36 = vrot.slane %v4897_v0, 1  ;;  %v374_v8 = vrot.slane %v2995_v60, 1  ;;  %v376_v0 = vrot.slane %v4927_v21, 1  ;;  %v6867_v60 = vld [vmem:[#allocation8_spill] sm:$0xff] }
  0x6f   :  { %1083 = vmatprep.mubr.f32.mxu1 %v4699_v27  ;;  %4069 = vmatpush3.bf16.msra.mxu0 %v4066_v23  ;;  %v3014_v27 = vld [vmem:[%s6846_s0 + $0xd9] ss:$2 sm:$0xff]  ;;  %v4078_v32 = vpack.c.bf16 %v564_v44, %v563_v2  ;;  %v370_v23 = vrot.slane %v4842_v29, 1  ;;  %v3018_v21 = vld [vmem:[%s6846_s0 + $0x1c9] ss:$2 sm:$0xff]  ;;  %v385_v48 = vrot.slane %v5051_v46, 1 }
  0x70   :  { %4071 = vmatprep.subr.bf16.mxu0 %v4070_v50  ;;  %v568_v29 = vld [vmem:[%s6845_s1 + $0x478] sm:$0xff]  ;;  %v388_v42 = vrot.slane %v5077_v1, 1  ;;  %v392_v1 = vrot.slane %v3007_v19, 1 }
  0x71   :  { %939 = vmatmul.mubr.f32.gmra.mrb[38].mxu0 %v3013_v7  ;;  %v372_v47 = vsel %vm252_vm0, %v370_v23, %v371_v10  ;;  %v375_v7 = vsel %vm252_vm0, %v373_v36, %v374_v8  ;;  %v3019_v2 = vld [vmem:[%s6846_s0 + $0x1f9] ss:$2 sm:$0xff] }
  0x72   :  { %1084 = vmatmul.mubr.f32.gmra.mrb[38].mxu1 %v4665_v11  ;;  %943 = vmatprep.mubr.f32.mxu0 %v363_v49  ;;  %v565_v11 = vld [vmem:[%s6845_s1 + $0x460] sm:$0xff]  ;;  %v379_v49 = vrot.slane %v4984_v58, 1  ;;  %v382_v58 = vrot.slane %v5024_v28, 1  ;;  %v6865_v10 = vld [vmem:[#allocation6_spill] sm:$0xff] }
  0x73   :  { %1088 = vmatprep.mubr.f32.mxu1 %v4735_v40  ;;  %4073 = vmatpush3.bf16.msra.mxu0 %v4070_v50  ;;  %v3015_v40 = vld [vmem:[%s6846_s0 + $0x109] ss:$2 sm:$0xff]  ;;  %v4082_v25 = vpack.c.bf16 %v566_v12, %v565_v11  ;;  %v3009_v11 = vld [vmem:[%s6846_s0 + $0x328] ss:$2 sm:$0x1]  ;;  %v394_v12 = vrot.slane %v5134_v17, 1 }
  0x74   :  { %4075 = vmatprep.subr.bf16.mxu0 %v4074_v39  ;;  %v2968_v50 = vld [vmem:[%s6846_s0 + $0x181] ss:$2 sm:$0xff]  ;;  %v2977_v17 = vld [vmem:[%s6846_s0 + $0x331] ss:$2 sm:$0xff] }
  0x75   :  { %944 = vmatmul.mubr.f32.gmra.mrb[40].mxu0 %v3014_v27  ;;  %v3003_v27 = vld [vmem:[%s6846_s0 + $0x298] ss:$2 sm:$0x1] }
  0x76   :  { %1089 = vmatmul.mubr.f32.gmra.mrb[40].mxu1 %v4720_v34  ;;  %948 = vmatprep.mubr.f32.mxu0 %v366_v62  ;;  %v567_v34 = vld [vmem:[%s6845_s1 + $0x470] sm:$0xff]  ;;  %v386_v28 = vrot.slane %v3003_v27, 1  ;;  %v3005_v62 = vld [vmem:[%s6846_s0 + $0x2c8] ss:$2 sm:$0x1] }
  0x77   :  { %1093 = vmatprep.mubr.f32.mxu1 %v4793_v5  ;;  %4077 = vmatpush3.bf16.msra.mxu0 %v4074_v39  ;;  %v3016_v5 = vld [vmem:[%s6846_s0 + $0x139] ss:$2 sm:$0xff]  ;;  %v4086_v53 = vpack.c.bf16 %v568_v29, %v567_v34  ;;  %v3001_v39 = vld [vmem:[%s6846_s0 + $0x268] ss:$2 sm:$0x1]  ;;  %v389_v46 = vrot.slane %v3005_v62, 1 }
  0x78   :  { %4079 = vmatprep.subr.bf16.mxu0 %v4078_v32  ;;  %v383_v44 = vrot.slane %v3001_v39, 1 }
  0x79   :  { %949 = vmatmul.mubr.f32.gmra.mrb[42].mxu0 %v3015_v40 }
  0x7a   :  { %1094 = vmatmul.mubr.f32.gmra.mrb[42].mxu1 %v4764_v54  ;;  %953 = vmatprep.mubr.f32.mxu0 %v369_v43  ;;  %v2997_v54 = vld [vmem:[%s6846_s0 + $0x208] ss:$2 sm:$0x1]  ;;  %v6864_v43 = vld [vmem:[#allocation5_spill] sm:$0xff] }
  0x7b   :  { %1098 = vmatprep.mubr.f32.mxu1 %v4829_v24  ;;  %4081 = vmatpush3.bf16.msra.mxu0 %v4078_v32  ;;  %v3017_v24 = vld [vmem:[%s6846_s0 + $0x169] ss:$2 sm:$0xff]  ;;  %v377_v56 = vrot.slane %v2997_v54, 1  ;;  %v391_v32 = vrot.slane %v5103_v22, 1  ;;  %v395_v22 = vrot.slane %v3009_v11, 1 }
  0x7c   :  { %4083 = vmatprep.subr.bf16.mxu0 %v4082_v25 }
  0x7d   :  { %954 = vmatmul.mubr.f32.gmra.mrb[44].mxu0 %v3016_v5  ;;  %v378_v16 = vsel %vm252_vm0, %v376_v0, %v377_v56  ;;  %v396_v40 = vsel %vm252_vm0, %v394_v12, %v395_v22 }
  0x7e   :  { %1099 = vmatmul.mubr.f32.gmra.mrb[44].mxu1 %v4817_v20  ;;  %958 = vmatprep.mubr.f32.mxu0 %v372_v47  ;;  %v2999_v20 = vld [vmem:[%s6846_s0 + $0x238] ss:$2 sm:$0x1] }
  0x7f   :  { %1103 = vmatprep.mubr.f32.mxu1 %v2968_v50  ;;  %4085 = vmatpush3.bf16.msra.mxu0 %v4082_v25  ;;  %v380_v33 = vrot.slane %v2999_v20, 1 }
  0x80   :  { %4087 = vmatprep.subr.bf16.mxu0 %v4086_v53 }
  0x81   :  { %959 = vmatmul.mubr.f32.gmra.mrb[46].mxu0 %v3017_v24 }
  0x82   :  { %1104 = vmatmul.mubr.f32.gmra.mrb[46].mxu1 %v5276_v31  ;;  %963 = vmatprep.mubr.f32.mxu0 %v375_v7 }
  0x83   :  { %1108 = vmatprep.mubr.f32.mxu1 %v4915_v15  ;;  %4089 = vmatpush3.bf16.msra.mxu0 %v4086_v53  ;;  %v381_v15 = vsel %vm252_vm0, %v379_v49, %v380_v33 }
  0x85   :  { %964 = vmatmul.mubr.f32.gmra.mrb[48].mxu0 %v3018_v21 }
  0x86   :  { %1109 = vmatmul.mubr.f32.gmra.mrb[48].mxu1 %v4906_v6  ;;  %968 = vmatprep.mubr.f32.mxu0 %v378_v16  ;;  %v3020_v6 = vld [vmem:[%s6846_s0 + $0x229] ss:$2 sm:$0xff] }
  0x87   :  { %1113 = vmatprep.mubr.f32.mxu1 %v4969_v55  ;;  %v384_v55 = vsel %vm252_vm0, %v382_v58, %v383_v44 }
  0x89   :  { %969 = vmatmul.mubr.f32.gmra.mrb[50].mxu0 %v3019_v2 }
  0x8a   :  { %1114 = vmatmul.mubr.f32.gmra.mrb[50].mxu1 %v4953_v41  ;;  %973 = vmatprep.mubr.f32.mxu0 %v381_v15  ;;  %v3021_v41 = vld [vmem:[%s6846_s0 + $0x259] ss:$2 sm:$0xff] }
  0x8b   :  { %1118 = vmatprep.mubr.f32.mxu1 %v5019_v26  ;;  %v387_v26 = vsel %vm252_vm0, %v385_v48, %v386_v28 }
  0x8d   :  { %974 = vmatmul.mubr.f32.gmra.mrb[52].mxu0 %v3020_v6 }
  0x8e   :  { %1119 = vmatmul.mubr.f32.gmra.mrb[52].mxu1 %v4993_v4  ;;  %978 = vmatprep.mubr.f32.mxu0 %v384_v55  ;;  %v3022_v4 = vld [vmem:[%s6846_s0 + $0x289] ss:$2 sm:$0xff] }
  0x8f   :  { %1123 = vmatprep.mubr.f32.mxu1 %v5046_v45  ;;  %v390_v45 = vsel %vm252_vm0, %v388_v42, %v389_v46 }
  0x91   :  { %979 = vmatmul.mubr.f32.gmra.mrb[54].mxu0 %v3021_v41 }
  0x92   :  { %1124 = vmatmul.mubr.f32.gmra.mrb[54].mxu1 %v5031_v37  ;;  %983 = vmatprep.mubr.f32.mxu0 %v387_v26  ;;  %v3023_v37 = vld [vmem:[%s6846_s0 + $0x2b9] ss:$2 sm:$0xff] }
  0x93   :  { %1128 = vmatprep.mubr.f32.mxu1 %v5072_v59  ;;  %v393_v59 = vsel %vm252_vm0, %v391_v32, %v392_v1 }
  0x95   :  { %984 = vmatmul.mubr.f32.gmra.mrb[56].mxu0 %v3022_v4 }
  0x96   :  { %1129 = vmatmul.mubr.f32.gmra.mrb[56].mxu1 %v5057_v52  ;;  %988 = vmatprep.mubr.f32.mxu0 %v390_v45  ;;  %v3024_v52 = vld [vmem:[%s6846_s0 + $0x2e9] ss:$2 sm:$0xff] }
  0x97   :  { %1133 = vmatprep.mubr.f32.mxu1 %v5094_v18  ;;  %v2958_v18 = vld [vmem:[%s6846_s0 + $0x330] ss:$2 sm:$0xff] }
  0x99   :  { %989 = vmatmul.mubr.f32.gmra.mrb[58].mxu0 %v3023_v37 }
  0x9a   :  { %1134 = vmatmul.mubr.f32.gmra.mrb[58].mxu1 %v5083_v14  ;;  %993 = vmatprep.mubr.f32.mxu0 %v393_v59  ;;  %v3025_v14 = vld [vmem:[%s6846_s0 + $0x319] ss:$2 sm:$0xff] }
  0x9b   :  { %1138 = vmatprep.mubr.f32.mxu1 %v5128_v3  ;;  %v417_v3 = vrot.slane %v5276_v31, 1 }
  0x9d   :  { %994 = vmatmul.mubr.f32.gmra.mrb[60].mxu0 %v3024_v52 }
  0x9e   :  { %1139 = vmatmul.mubr.f32.gmra.mrb[60].mxu1 %v5109_v38  ;;  %998 = vmatprep.mubr.f32.mxu0 %v396_v40  ;;  %v2941_v38 = vld [vmem:[%s6846_s0 + $0x190] ss:$2 sm:$0x1] }
  0x9f   :  { %1143 = vmatprep.mubr.f32.mxu1 %v2977_v17  ;;  %v418_v23 = vrot.slane %v2941_v38, 1 }
  0xa1   :  { %999 = vmatmul.mubr.f32.gmra.mrb[62].mxu0 %v3025_v14 }
  0xa2   :  { %1144 = vmatmul.mubr.f32.gmra.mrb[62].mxu1 %v2958_v18  ;;  %3794 = vmatprep.mubr.f32.mxu0 %v4621_v61  ;;  %v419_v61 = vsel %vm252_vm0, %v417_v3, %v418_v23 }
  0xa5   :  { %3795 = vmatmul.mubr.f32.vlgmr.msra.gmra.mrb[64].mxu0 %v4672_v13  ;;  %v6862_v13 = vld [vmem:[#allocation3_spill] sm:$0xff] }
  0xa6   :  { %3797 = vmatprep.mubr.f32.mxu0 %v4709_v30  ;;  %v6863_v30 = vld [vmem:[#allocation4_spill] sm:$0xff] }
  0xa9   :  { %3798 = vmatmul.mubr.f32.gmra.mrb[66].mxu0 %v4759_v51  ;;  %v2959_v51 = vld [vmem:[%s6846_s0 + $0x340] ss:$2 sm:$0x1] }
  0xaa   :  { %3800 = vmatprep.mubr.f32.mxu0 %v4800_v9  ;;  %v420_v9 = vrot.slane %v2958_v18, 1 }
  0xad   :  { %3801 = vmatmul.mubr.f32.gmra.mrb[68].mxu0 %v4854_v35  ;;  %v421_v35 = vrot.slane %v2959_v51, 1 }
  0xae   :  { %3803 = vmatprep.mubr.f32.mxu0 %v4892_v63  ;;  %v6866_v63 = vld [vmem:[#allocation7_spill] sm:$0xff] }
  0xb1   :  { %3804 = vmatmul.mubr.f32.gmra.mrb[70].mxu0 %v419_v61 }
  0xb2   :  { %3806 = vmatprep.mubr.f32.mxu0 %v4979_v57  ;;  %v422_v57 = vsel %vm252_vm0, %v420_v9, %v421_v35 }
  0xb5   :  { %3807 = vmatmul.mubr.f32.gmra.mrb[72].mxu0 %v6862_v13 }
  0xb6   :  { %3809 = vmatprep.mubr.f32.mxu0 %v6863_v30 }
  0xb9   :  { %3810 = vmatmul.mubr.f32.gmra.mrb[74].mxu0 %v6864_v43 }
  0xba   :  { %3812 = vmatprep.mubr.f32.mxu0 %v6865_v10 }
  0xbd   :  { %3813 = vmatmul.mubr.f32.gmra.mrb[76].mxu0 %v6866_v63 }
  0xbe   :  { %3815 = vmatprep.mubr.f32.mxu0 %v6867_v60 }
  0xc1   :  { %3816 = vmatmul.mubr.f32.gmra.mrb[78].mxu0 %v422_v57 }
  0xf8   :  { %v3058_v25 = vpop.f32.mrb[0].mxu0 }
  0xf9   :  { %v3138_v34 = vpop.f32.mrb[0].mxu1  ;;  %v3059_v29 = vpop.f32.mrb[1].mxu0 }
  0xfa   :  { %v3060_v5 = vadd.f32 %v3059_v29, %v3058_v25  ;;  %v3139_v36 = vpop.f32.mrb[1].mxu1 }
  0xfb   :  { %v3140_v47 = vadd.f32 %v3139_v36, %v3138_v34 }
  0xfc   :  { %v3061_v8 = vpop.f32.mrb[2].mxu0 }
  0xfd   :  { %v5378_v50 = vadd.f32 %v3140_v47, %v3060_v5  ;;  %v3141_v54 = vpop.f32.mrb[2].mxu1  ;;  %v3062_v53 = vpop.f32.mrb[3].mxu0 }
  0xfe   :  { %v3063_v24 = vadd.f32 %v3062_v53, %v3061_v8  ;;  %v3142_v0 = vpop.f32.mrb[3].mxu1 }
  0xff   :  { %v3143_v31 = vadd.f32 %v3142_v0, %v3141_v54 }
 0x100   :  { %v3064_v7 = vpop.f32.mrb[4].mxu0 }
 0x101   :  { %v5380_v56 = vadd.f32 %v3143_v31, %v3063_v24  ;;  %v3144_v20 = vpop.f32.mrb[4].mxu1  ;;  %v3065_v21 = vpop.f32.mrb[5].mxu0 }
 0x102   :  { %v3066_v49 = vadd.f32 %v3065_v21, %v3064_v7  ;;  %v3145_v16 = vpop.f32.mrb[5].mxu1 }
 0x103   :  { %v3146_v33 = vadd.f32 %v3145_v16, %v3144_v20 }
 0x104   :  { %v3067_v39 = vpop.f32.mrb[6].mxu0 }
 0x105   :  { %v5382_v2 = vadd.f32 %v3146_v33, %v3066_v49  ;;  %v3147_v58 = vpop.f32.mrb[6].mxu1  ;;  %v3068_v15 = vpop.f32.mrb[7].mxu0 }
 0x106   :  { %v3069_v44 = vadd.f32 %v3068_v15, %v3067_v39  ;;  %v3148_v27 = vpop.f32.mrb[7].mxu1 }
 0x107   :  { %v3149_v6 = vadd.f32 %v3148_v27, %v3147_v58 }
 0x108   :  { %v3070_v48 = vpop.f32.mrb[8].mxu0 }
 0x109   :  { %v5384_v55 = vadd.f32 %v3149_v6, %v3069_v44  ;;  %v3150_v28 = vpop.f32.mrb[8].mxu1  ;;  %v3071_v62 = vpop.f32.mrb[9].mxu0 }
 0x10a   :  { %v3072_v41 = vadd.f32 %v3071_v62, %v3070_v48  ;;  %v3151_v42 = vpop.f32.mrb[9].mxu1 }
 0x10b   :  { %v3152_v26 = vadd.f32 %v3151_v42, %v3150_v28 }
 0x10c   :  { %v3073_v46 = vpop.f32.mrb[10].mxu0 }
 0x10d   :  { %v5386_v19 = vadd.f32 %v3152_v26, %v3072_v41  ;;  %v3153_v4 = vpop.f32.mrb[10].mxu1  ;;  %v3074_v32 = vpop.f32.mrb[11].mxu0 }
 0x10e   :  { %v3075_v45 = vadd.f32 %v3074_v32, %v3073_v46  ;;  %v3154_v1 = vpop.f32.mrb[11].mxu1 }
 0x10f   :  { %v3155_v11 = vadd.f32 %v3154_v1, %v3153_v4 }
 0x110   :  { %v3076_v37 = vpop.f32.mrb[12].mxu0 }
 0x111   :  { %v5388_v12 = vadd.f32 %v3155_v11, %v3075_v45  ;;  %v3156_v59 = vpop.f32.mrb[12].mxu1  ;;  %v3077_v22 = vpop.f32.mrb[13].mxu0 }
 0x112   :  { %v3078_v52 = vadd.f32 %v3077_v22, %v3076_v37  ;;  %v3157_v40 = vpop.f32.mrb[13].mxu1 }
 0x113   :  { %v3158_v17 = vadd.f32 %v3157_v40, %v3156_v59 }
 0x114   :  { %v3079_v14 = vpop.f32.mrb[14].mxu0 }
 0x115   :  { %v5390_v18 = vadd.f32 %v3158_v17, %v3078_v52  ;;  %v3159_v38 = vpop.f32.mrb[14].mxu1  ;;  %v3080_v3 = vpop.f32.mrb[15].mxu0 }
 0x116   :  { %v3081_v23 = vadd.f32 %v3080_v3, %v3079_v14  ;;  %v3160_v61 = vpop.f32.mrb[15].mxu1 }
 0x117   :  { %v3161_v13 = vadd.f32 %v3160_v61, %v3159_v38 }
 0x118   :  { %v3082_v30 = vpop.f32.mrb[16].mxu0 }
 0x119   :  { %v5392_v51 = vadd.f32 %v3161_v13, %v3081_v23  ;;  %v3162_v43 = vpop.f32.mrb[16].mxu1  ;;  %v3083_v9 = vpop.f32.mrb[17].mxu0 }
 0x11a   :  { %v3084_v10 = vadd.f32 %v3083_v9, %v3082_v30  ;;  %v3163_v35 = vpop.f32.mrb[17].mxu1 }
 0x11b   :  { %v3164_v63 = vadd.f32 %v3163_v35, %v3162_v43 }
 0x11c   :  { %v3085_v60 = vpop.f32.mrb[18].mxu0 }
 0x11d   :  { %v5394_v57 = vadd.f32 %v3164_v63, %v3084_v10  ;;  %v3165_v25 = vpop.f32.mrb[18].mxu1  ;;  %v3086_v34 = vpop.f32.mrb[19].mxu0 }
 0x11e   :  { %v3087_v29 = vadd.f32 %v3086_v34, %v3085_v60  ;;  %v3166_v5 = vpop.f32.mrb[19].mxu1 }
 0x11f   :  { %v3167_v36 = vadd.f32 %v3166_v5, %v3165_v25 }
 0x120   :  { %v3088_v47 = vpop.f32.mrb[20].mxu0 }
 0x121   :  { %v5396_v8 = vadd.f32 %v3167_v36, %v3087_v29  ;;  %v3168_v54 = vpop.f32.mrb[20].mxu1  ;;  %v3089_v53 = vpop.f32.mrb[21].mxu0 }
 0x122   :  { %v3090_v24 = vadd.f32 %v3089_v53, %v3088_v47  ;;  %v3169_v0 = vpop.f32.mrb[21].mxu1 }
 0x123   :  { %v3170_v31 = vadd.f32 %v3169_v0, %v3168_v54 }
 0x124   :  { %v3091_v7 = vpop.f32.mrb[22].mxu0 }
 0x125   :  { %v5398_v20 = vadd.f32 %v3170_v31, %v3090_v24  ;;  %v3171_v21 = vpop.f32.mrb[22].mxu1  ;;  %v3092_v49 = vpop.f32.mrb[23].mxu0 }
 0x126   :  { %v3093_v16 = vadd.f32 %v3092_v49, %v3091_v7  ;;  %v3172_v33 = vpop.f32.mrb[23].mxu1 }
 0x127   :  { %v3173_v39 = vadd.f32 %v3172_v33, %v3171_v21 }
 0x128   :  { %v3094_v58 = vpop.f32.mrb[24].mxu0 }
 0x129   :  { %v5400_v15 = vadd.f32 %v3173_v39, %v3093_v16  ;;  %v3174_v44 = vpop.f32.mrb[24].mxu1  ;;  %v3095_v27 = vpop.f32.mrb[25].mxu0 }
 0x12a   :  { %v3096_v6 = vadd.f32 %v3095_v27, %v3094_v58  ;;  %v3175_v48 = vpop.f32.mrb[25].mxu1 }
 0x12b   :  { %v3176_v28 = vadd.f32 %v3175_v48, %v3174_v44 }
 0x12c   :  { %v3097_v62 = vpop.f32.mrb[26].mxu0 }
 0x12d   :  { %v5402_v41 = vadd.f32 %v3176_v28, %v3096_v6  ;;  %v3177_v42 = vpop.f32.mrb[26].mxu1  ;;  %v3098_v26 = vpop.f32.mrb[27].mxu0 }
 0x12e   :  { %v3099_v46 = vadd.f32 %v3098_v26, %v3097_v62  ;;  %v3178_v4 = vpop.f32.mrb[27].mxu1 }
 0x12f   :  { %v3179_v32 = vadd.f32 %v3178_v4, %v3177_v42 }
 0x130   :  { %v3100_v45 = vpop.f32.mrb[28].mxu0 }
 0x131   :  { %v5404_v1 = vadd.f32 %v3179_v32, %v3099_v46  ;;  %v3180_v11 = vpop.f32.mrb[28].mxu1  ;;  %v3101_v37 = vpop.f32.mrb[29].mxu0 }
 0x132   :  { %v3102_v59 = vadd.f32 %v3101_v37, %v3100_v45  ;;  %v3181_v22 = vpop.f32.mrb[29].mxu1 }
 0x133   :  { %v3182_v52 = vadd.f32 %v3181_v22, %v3180_v11 }
 0x134   :  { %v3103_v40 = vpop.f32.mrb[30].mxu0 }
 0x135   :  { %v5406_v17 = vadd.f32 %v3182_v52, %v3102_v59  ;;  %v3183_v14 = vpop.f32.mrb[30].mxu1  ;;  %v3104_v38 = vpop.f32.mrb[31].mxu0 }
 0x136   :  { %v3105_v3 = vadd.f32 %v3104_v38, %v3103_v40  ;;  %v3184_v23 = vpop.f32.mrb[31].mxu1 }
 0x137   :  { %v3185_v61 = vadd.f32 %v3184_v23, %v3183_v14  ;;  %v1625_v14 = vld [vmem:[%s6847_s2 + $0x88] sm:$0xff]  ;;  %v1608_v23 = vld [vmem:[%s6847_s2] sm:$0xff] }
 0x138   :  { %v3218_v13 = vpop.f32.mrb[32].mxu0 }
 0x139   :  { %v5408_v30 = vadd.f32 %v3185_v61, %v3105_v3  ;;  %v3219_v43 = vpop.f32.mrb[33].mxu0  ;;  %v3298_v9 = vpop.f32.mrb[32].mxu1  ;;  %v1609_v61 = vld [vmem:[%s6847_s2 + $0x8] sm:$0xff] }
 0x13a   :  { %v3220_v10 = vadd.f32 %v3219_v43, %v3218_v13  ;;  %v3299_v35 = vpop.f32.mrb[33].mxu1 }
 0x13b   :  { %v3300_v63 = vadd.f32 %v3299_v35, %v3298_v9  ;;  %v4092_v9 = vpack.c.bf16 %v1609_v61, %v1608_v23 }
 0x13c   :  { %v926_v60 = vadd.f32 %v3220_v10, %v5378_v50  ;;  %v3221_v25 = vpop.f32.mrb[34].mxu0 }
 0x13d   :  { %v3222_v34 = vpop.f32.mrb[35].mxu0  ;;  %v3301_v29 = vpop.f32.mrb[34].mxu1 }
 0x13e   :  { %v3223_v5 = vadd.f32 %v3222_v34, %v3221_v25  ;;  %v3302_v36 = vpop.f32.mrb[35].mxu1  ;;  %v5411_v47 = vadd.f32 %v3300_v63, %v926_v60  ;;  %v1627_v25 = vld [vmem:[%s6847_s2 + $0x98] sm:$0xff] }
 0x13f   :  { %v3303_v54 = vadd.f32 %v3302_v36, %v3301_v29  ;;  %v1610_v36 = vld [vmem:[%s6847_s2 + $0x10] sm:$0xff] }
 0x140   :  { %v931_v53 = vadd.f32 %v3223_v5, %v5380_v56  ;;  %v3224_v24 = vpop.f32.mrb[36].mxu0 }
 0x141   :  { %v3225_v0 = vpop.f32.mrb[37].mxu0  ;;  %v3304_v31 = vpop.f32.mrb[36].mxu1 }
 0x142   :  { %v3226_v7 = vadd.f32 %v3225_v0, %v3224_v24  ;;  %v3305_v21 = vpop.f32.mrb[37].mxu1  ;;  %v5414_v49 = vadd.f32 %v3303_v54, %v931_v53  ;;  %v1611_v54 = vld [vmem:[%s6847_s2 + $0x18] sm:$0xff] }
 0x143   :  { %v3306_v16 = vadd.f32 %v3305_v21, %v3304_v31  ;;  %v4096_v0 = vpack.c.bf16 %v1611_v54, %v1610_v36 }
 0x144   :  { %v936_v50 = vadd.f32 %v3226_v7, %v5382_v2  ;;  %v3227_v33 = vpop.f32.mrb[38].mxu0 }
 0x145   :  { %v3228_v39 = vpop.f32.mrb[39].mxu0  ;;  %v3307_v58 = vpop.f32.mrb[38].mxu1 }
 0x146   :  { %v3229_v44 = vadd.f32 %v3228_v39, %v3227_v33  ;;  %v3308_v27 = vpop.f32.mrb[39].mxu1  ;;  %v5417_v6 = vadd.f32 %v3306_v16, %v936_v50  ;;  %v1629_v50 = vld [vmem:[%s6847_s2 + $0xa8] sm:$0xff] }
 0x147   :  { %v3309_v48 = vadd.f32 %v3308_v27, %v3307_v58  ;;  %v1613_v27 = vld [vmem:[%s6847_s2 + $0x28] sm:$0xff] }
 0x148   :  { %v941_v56 = vadd.f32 %v3229_v44, %v5384_v55  ;;  %v3230_v28 = vpop.f32.mrb[40].mxu0  ;;  %v1624_v55 = vld [vmem:[%s6847_s2 + $0x80] sm:$0xff] }
 0x149   :  { %v3231_v62 = vpop.f32.mrb[41].mxu0  ;;  %v3310_v42 = vpop.f32.mrb[40].mxu1  ;;  %v1612_v44 = vld [vmem:[%s6847_s2 + $0x20] sm:$0xff] }
 0x14a   :  { %v3232_v26 = vadd.f32 %v3231_v62, %v3230_v28  ;;  %v3311_v46 = vpop.f32.mrb[41].mxu1  ;;  %v5420_v4 = vadd.f32 %v3309_v48, %v941_v56  ;;  %v4100_v28 = vpack.c.bf16 %v1613_v27, %v1612_v44  ;;  %v1656_v62 = vld [vmem:[%s6847_s2 + $0x180] sm:$0xff]  ;;  %v1645_v27 = vld [vmem:[%s6847_s2 + $0x128] sm:$0xff] }
 0x14b   :  { %v3312_v32 = vadd.f32 %v3311_v46, %v3310_v42  ;;  %v1644_v44 = vld [vmem:[%s6847_s2 + $0x120] sm:$0xff] }
 0x14c   :  { %v946_v2 = vadd.f32 %v3232_v26, %v5386_v19  ;;  %v3233_v45 = vpop.f32.mrb[42].mxu0  ;;  %v4090_v19 = vpack.c.bf16 %v1625_v14, %v1624_v55 }
 0x14d   :  { %v3234_v11 = vpop.f32.mrb[43].mxu0  ;;  %v3313_v37 = vpop.f32.mrb[42].mxu1 }
 0x14e   :  { %v3235_v59 = vadd.f32 %v3234_v11, %v3233_v45  ;;  %v3314_v22 = vpop.f32.mrb[43].mxu1  ;;  %v5423_v52 = vadd.f32 %v3312_v32, %v946_v2  ;;  %4091 = vmatprep.subr.bf16.mxu1 %v4090_v19  ;;  %v1640_v2 = vld [vmem:[%s6847_s2 + $0x100] sm:$0xff]  ;;  %v1641_v45 = vld [vmem:[%s6847_s2 + $0x108] sm:$0xff] }
 0x14f   :  { %v3315_v40 = vadd.f32 %v3314_v22, %v3313_v37  ;;  %4093 = vmatpush3.bf16.msra.mxu1 %v4092_v9  ;;  %v1630_v37 = vld [vmem:[%s6847_s2 + $0xb0] sm:$0xff]  ;;  %v4124_v22 = vpack.c.bf16 %v1641_v45, %v1640_v2  ;;  %v1619_v2 = vld [vmem:[%s6847_s2 + $0x58] sm:$0xff] }
 0x150   :  { %v951_v38 = vadd.f32 %v3235_v59, %v5388_v12  ;;  %v3236_v3 = vpop.f32.mrb[44].mxu0  ;;  %v1626_v12 = vld [vmem:[%s6847_s2 + $0x90] sm:$0xff]  ;;  %v1631_v59 = vld [vmem:[%s6847_s2 + $0xb8] sm:$0xff] }
 0x151   :  { %v3237_v13 = vpop.f32.mrb[45].mxu0  ;;  %v3316_v43 = vpop.f32.mrb[44].mxu1  ;;  %v4094_v5 = vpack.c.bf16 %v1627_v25, %v1626_v12  ;;  %v4102_v14 = vpack.c.bf16 %v1631_v59, %v1630_v37  ;;  %v1643_v12 = vld [vmem:[%s6847_s2 + $0x118] sm:$0xff]  ;;  %v1662_v59 = vld [vmem:[%s6847_s2 + $0x1b0] sm:$0xff] }
 0x152   :  { %v3238_v10 = vadd.f32 %v3237_v13, %v3236_v3  ;;  %v3317_v35 = vpop.f32.mrb[45].mxu1  ;;  %v5438_v63 = vadd.f32 %v3315_v40, %v951_v38  ;;  %v1614_v38 = vld [vmem:[%s6847_s2 + $0x30] sm:$0xff]  ;;  %v1615_v3 = vld [vmem:[%s6847_s2 + $0x38] sm:$0xff] }
 0x153   :  { %v3318_v60 = vadd.f32 %v3317_v35, %v3316_v43  ;;  %4095 = vmatprep.subr.bf16.mxu1 %v4094_v5  ;;  %v4104_v61 = vpack.c.bf16 %v1615_v3, %v1614_v38  ;;  %v1658_v13 = vld [vmem:[%s6847_s2 + $0x190] sm:$0xff]  ;;  %v1647_v3 = vld [vmem:[%s6847_s2 + $0x138] sm:$0xff] }
 0x154   :  { %v956_v34 = vadd.f32 %v3238_v10, %v5390_v18  ;;  %v3239_v29 = vpop.f32.mrb[46].mxu0  ;;  %4097 = vmatpush3.bf16.msra.mxu1 %v4096_v0  ;;  %v1628_v18 = vld [vmem:[%s6847_s2 + $0xa0] sm:$0xff]  ;;  %v1617_v0 = vld [vmem:[%s6847_s2 + $0x48] sm:$0xff]  ;;  %v1646_v38 = vld [vmem:[%s6847_s2 + $0x130] sm:$0xff] }
 0x155   :  { %v3240_v53 = vpop.f32.mrb[47].mxu0  ;;  %v3319_v24 = vpop.f32.mrb[46].mxu1  ;;  %v4098_v58 = vpack.c.bf16 %v1629_v50, %v1628_v18  ;;  %v1660_v18 = vld [vmem:[%s6847_s2 + $0x1a0] sm:$0xff] }
 0x156   :  { %v3241_v31 = vadd.f32 %v3240_v53, %v3239_v29  ;;  %v3320_v7 = vpop.f32.mrb[47].mxu1  ;;  %v5453_v21 = vadd.f32 %v3318_v60, %v956_v34  ;;  %v1642_v60 = vld [vmem:[%s6847_s2 + $0x110] sm:$0xff]  ;;  %v1632_v34 = vld [vmem:[%s6847_s2 + $0xc0] sm:$0xff]  ;;  %v1633_v29 = vld [vmem:[%s6847_s2 + $0xc8] sm:$0xff] }
 0x157   :  { %v3321_v16 = vadd.f32 %v3320_v7, %v3319_v24  ;;  %4099 = vmatprep.subr.bf16.mxu1 %v4098_v58  ;;  %v4128_v5 = vpack.c.bf16 %v1643_v12, %v1642_v60  ;;  %v4106_v53 = vpack.c.bf16 %v1633_v29, %v1632_v34  ;;  %v1616_v24 = vld [vmem:[%s6847_s2 + $0x40] sm:$0xff]  ;;  %v1621_v60 = vld [vmem:[%s6847_s2 + $0x68] sm:$0xff] }
 0x158   :  { %v961_v33 = vadd.f32 %v3241_v31, %v5392_v51  ;;  %v3242_v39 = vpop.f32.mrb[48].mxu0  ;;  %v1657_v51 = vld [vmem:[%s6847_s2 + $0x188] sm:$0xff]  ;;  %4101 = vmatpush3.bf16.msra.mxu1 %v4100_v28  ;;  %v1635_v28 = vld [vmem:[%s6847_s2 + $0xd8] sm:$0xff]  ;;  %v1664_v29 = vld [vmem:[%s6847_s2 + $0x1c0] sm:$0xff] }
 0x159   :  { %v3243_v48 = vpop.f32.mrb[49].mxu0  ;;  %v3322_v56 = vpop.f32.mrb[48].mxu1  ;;  %v4122_v32 = vpack.c.bf16 %v1657_v51, %v1656_v62  ;;  %4103 = vmatprep.subr.bf16.mxu1 %v4102_v14  ;;  %v4132_v62 = vpack.c.bf16 %v1645_v27, %v1644_v44  ;;  %v1622_v44 = vld [vmem:[%s6847_s2 + $0x70] sm:$0xff]  ;;  %v1623_v27 = vld [vmem:[%s6847_s2 + $0x78] sm:$0xff] }
 0x15a   :  { %v3244_v42 = vadd.f32 %v3243_v48, %v3242_v39  ;;  %v3323_v26 = vpop.f32.mrb[49].mxu1  ;;  %v5474_v46 = vadd.f32 %v3321_v16, %v961_v33  ;;  %v4108_v16 = vpack.c.bf16 %v1617_v0, %v1616_v24  ;;  %v1648_v0 = vld [vmem:[%s6847_s2 + $0x140] sm:$0xff] }
 0x15b   :  { %v3324_v11 = vadd.f32 %v3323_v26, %v3322_v56  ;;  %4123 = vmatprep.subr.bf16.mxu0 %v4122_v32  ;;  %v1634_v56 = vld [vmem:[%s6847_s2 + $0xd0] sm:$0xff] }
 0x15c   :  { %v966_v40 = vadd.f32 %v3244_v42, %v5394_v57  ;;  %v3245_v55 = vpop.f32.mrb[50].mxu0  ;;  %4125 = vmatpush3.bf16.msra.mxu0 %v4124_v22  ;;  %v1659_v57 = vld [vmem:[%s6847_s2 + $0x198] sm:$0xff]  ;;  %4105 = vmatpush3.bf16.msra.mxu1 %v4104_v61  ;;  %v4110_v26 = vpack.c.bf16 %v1635_v28, %v1634_v56  ;;  %v1618_v32 = vld [vmem:[%s6847_s2 + $0x50] sm:$0xff]  ;;  %v1637_v61 = vld [vmem:[%s6847_s2 + $0xe8] sm:$0xff] }
 0x15d   :  { %v3246_v19 = vpop.f32.mrb[51].mxu0  ;;  %v3325_v23 = vpop.f32.mrb[50].mxu1  ;;  %v4126_v35 = vpack.c.bf16 %v1659_v57, %v1658_v13  ;;  %4107 = vmatprep.subr.bf16.mxu1 %v4106_v53  ;;  %v4112_v37 = vpack.c.bf16 %v1619_v2, %v1618_v32  ;;  %v4136_v13 = vpack.c.bf16 %v1647_v3, %v1646_v38  ;;  %v1666_v28 = vld [vmem:[%s6847_s2 + $0x1d0] sm:$0xff]  ;;  %v1668_v38 = vld [vmem:[%s6847_s2 + $0x1e0] sm:$0xff]  ;;  %v1669_v3 = vld [vmem:[%s6847_s2 + $0x1e8] sm:$0xff] }
 0x15e   :  { %v3247_v43 = vadd.f32 %v3246_v19, %v3245_v55  ;;  %v3326_v9 = vpop.f32.mrb[51].mxu1  ;;  %v5501_v10 = vadd.f32 %v3324_v11, %v966_v40  ;;  %v1650_v2 = vld [vmem:[%s6847_s2 + $0x150] sm:$0xff] }
 0x15f   :  { %v3327_v25 = vadd.f32 %v3326_v9, %v3325_v23  ;;  %4127 = vmatprep.subr.bf16.mxu0 %v4126_v35  ;;  %v1636_v23 = vld [vmem:[%s6847_s2 + $0xe0] sm:$0xff] }
 0x160   :  { %v971_v36 = vadd.f32 %v3247_v43, %v5396_v8  ;;  %v3248_v54 = vpop.f32.mrb[52].mxu0  ;;  %4129 = vmatpush3.bf16.msra.mxu0 %v4128_v5  ;;  %v1661_v8 = vld [vmem:[%s6847_s2 + $0x1a8] sm:$0xff]  ;;  %4109 = vmatpush3.bf16.msra.mxu1 %v4108_v16  ;;  %v4114_v9 = vpack.c.bf16 %v1637_v61, %v1636_v23  ;;  %v1620_v35 = vld [vmem:[%s6847_s2 + $0x60] sm:$0xff]  ;;  %v4322_v5 = vmov 0.0  }
 0x161   :  { %v3249_v31 = vpop.f32.mrb[53].mxu0  ;;  %v3328_v7 = vpop.f32.mrb[52].mxu1  ;;  %v4130_v58 = vpack.c.bf16 %v1661_v8, %v1660_v18  ;;  %4111 = vmatprep.subr.bf16.mxu1 %v4110_v26  ;;  %v4116_v34 = vpack.c.bf16 %v1621_v60, %v1620_v35  ;;  %1422 = vst [vmem:[#allocation2] sm:$0xff] %v4322_v5  ;;  %1423 = vst [vmem:[#allocation2 + $0x8] sm:$0x3] %v4322_v5  ;;  %v1638_v18 = vld [vmem:[%s6847_s2 + $0xf0] sm:$0xff] }
 0x162   :  { %v3250_v50 = vadd.f32 %v3249_v31, %v3248_v54  ;;  %v3329_v33 = vpop.f32.mrb[53].mxu1  ;;  %v5528_v39 = vadd.f32 %v3327_v25, %v971_v36  ;;  %1424 = vst [vmem:[#allocation2 + $0xa0] sm:$0xff] %v4322_v5  ;;  %1425 = vst [vmem:[#allocation2 + $0xa8] sm:$0x3] %v4322_v5  ;;  %v1649_v31 = vld [vmem:[%s6847_s2 + $0x148] sm:$0xff]  ;;  %v1639_v8 = vld [vmem:[%s6847_s2 + $0xf8] sm:$0xff] }
 0x163   :  { %v3330_v48 = vadd.f32 %v3329_v33, %v3328_v7  ;;  %4131 = vmatprep.subr.bf16.mxu0 %v4130_v58  ;;  %1427 = vst [vmem:[#allocation2 + $0x90] sm:$0xff] %v4322_v5  ;;  %1428 = vst [vmem:[#allocation2 + $0x98] sm:$0x3] %v4322_v5  ;;  %v4140_v16 = vpack.c.bf16 %v1649_v31, %v1648_v0  ;;  %v4118_v58 = vpack.c.bf16 %v1639_v8, %v1638_v18  ;;  %v1670_v35 = vld [vmem:[%s6847_s2 + $0x1f0] sm:$0xff]  ;;  %v1671_v60 = vld [vmem:[%s6847_s2 + $0x1f8] sm:$0xff] }
 0x164   :  { %v976_v51 = vadd.f32 %v3250_v50, %v5398_v20  ;;  %v3251_v42 = vpop.f32.mrb[54].mxu0  ;;  %4133 = vmatpush3.bf16.msra.mxu0 %v4132_v62  ;;  %v1663_v20 = vld [vmem:[%s6847_s2 + $0x1b8] sm:$0xff]  ;;  %4113 = vmatpush3.bf16.msra.mxu1 %v4112_v37  ;;  %1429 = vst [vmem:[#allocation2 + $0x130] sm:$0xff] %v4322_v5  ;;  %1430 = vst [vmem:[#allocation2 + $0x138] sm:$0x3] %v4322_v5  ;;  %v4120_v62 = vpack.c.bf16 %v1623_v27, %v1622_v44 }
 0x165   :  { %v3252_v45 = vpop.f32.mrb[55].mxu0  ;;  %v3331_v11 = vpop.f32.mrb[54].mxu1  ;;  %v4134_v14 = vpack.c.bf16 %v1663_v20, %v1662_v59  ;;  %1431 = vst [vmem:[#allocation2 + $0x10] sm:$0x1] %v4322_v5  ;;  %1432 = vst [vmem:[#allocation2 + $0x20] sm:$0x1] %v4322_v5  ;;  %4115 = vmatprep.subr.bf16.mxu1 %v4114_v9 }
 0x166   :  { %v3253_v22 = vadd.f32 %v3252_v45, %v3251_v42  ;;  %v3332_v40 = vpop.f32.mrb[55].mxu1  ;;  %v5555_v55 = vadd.f32 %v3330_v48, %v976_v51  ;;  %1433 = vst [vmem:[#allocation2 + $0x30] sm:$0x1] %v4322_v5  ;;  %1434 = vst [vmem:[#allocation2 + $0x40] sm:$0x1] %v4322_v5  ;;  %v1651_v45 = vld [vmem:[%s6847_s2 + $0x158] sm:$0xff] }
 0x167   :  { %v3333_v19 = vadd.f32 %v3332_v40, %v3331_v11  ;;  %4135 = vmatprep.subr.bf16.mxu0 %v4134_v14  ;;  %1435 = vst [vmem:[#allocation2 + $0x50] sm:$0x1] %v4322_v5  ;;  %1436 = vst [vmem:[#allocation2 + $0x60] sm:$0x1] %v4322_v5  ;;  %v4144_v37 = vpack.c.bf16 %v1651_v45, %v1650_v2 }
 0x168   :  { %v981_v57 = vadd.f32 %v3253_v22, %v5400_v15  ;;  %v3254_v43 = vpop.f32.mrb[56].mxu0  ;;  %4137 = vmatpush3.bf16.msra.mxu0 %v4136_v13  ;;  %v1665_v15 = vld [vmem:[%s6847_s2 + $0x1c8] sm:$0xff]  ;;  %1437 = vst [vmem:[#allocation2 + $0x70] sm:$0x1] %v4322_v5  ;;  %1438 = vst [vmem:[#allocation2 + $0x80] sm:$0x1] %v4322_v5  ;;  %4117 = vmatpush3.bf16.msra.mxu1 %v4116_v34 }
 0x169   :  { %v3255_v12 = vpop.f32.mrb[57].mxu0  ;;  %v3334_v25 = vpop.f32.mrb[56].mxu1  ;;  %1439 = vst [vmem:[#allocation2 + $0xb0] sm:$0x1] %v4322_v5  ;;  %1440 = vst [vmem:[#allocation2 + $0xc0] sm:$0x1] %v4322_v5  ;;  %v4138_v24 = vpack.c.bf16 %v1665_v15, %v1664_v29  ;;  %4119 = vmatprep.subr.bf16.mxu1 %v4118_v58  ;;  %v4150_v29 = vpack.c.bf16 %v1671_v60, %v1670_v35 }
 0x16a   :  { %1441 = vst [vmem:[#allocation2 + $0xd0] sm:$0x1] %v4322_v5  ;;  %1442 = vst [vmem:[#allocation2 + $0xe0] sm:$0x1] %v4322_v5  ;;  %v3256_v36 = vadd.f32 %v3255_v12, %v3254_v43  ;;  %v3335_v54 = vpop.f32.mrb[57].mxu1  ;;  %v5622_v53 = vadd.f32 %v3333_v19, %v981_v57  ;;  %v1479_v22 = vld [vmem:[#allocation2 + $0x1] sm:$0xff] }
 0x16b   :  { %1443 = vst [vmem:[#allocation2 + $0xf0] sm:$0x1] %v4322_v5  ;;  %1444 = vst [vmem:[#allocation2 + $0x100] sm:$0x1] %v4322_v5  ;;  %v3336_v7 = vadd.f32 %v3335_v54, %v3334_v25  ;;  %4139 = vmatprep.subr.bf16.mxu0 %v4138_v24  ;;  %1816 = vmatprep.mubr.f32.mxu1 %v1479_v22  ;;  %v1652_v13 = vld [vmem:[%s6847_s2 + $0x160] sm:$0xff]  ;;  %v1653_v57 = vld [vmem:[%s6847_s2 + $0x168] sm:$0xff] }
 0x16c   :  { %1445 = vst [vmem:[#allocation2 + $0x110] sm:$0x1] %v4322_v5  ;;  %1446 = vst [vmem:[#allocation2 + $0x120] sm:$0x1] %v4322_v5  ;;  %v986_v50 = vadd.f32 %v3256_v36, %v5402_v41  ;;  %v3257_v33 = vpop.f32.mrb[58].mxu0  ;;  %4141 = vmatpush3.bf16.msra.mxu0 %v4140_v16  ;;  %v1667_v41 = vld [vmem:[%s6847_s2 + $0x1d8] sm:$0xff]  ;;  %4121 = vmatpush3.bf16.msra.mxu1 %v4120_v62  ;;  %v4148_v9 = vpack.c.bf16 %v1653_v57, %v1652_v13 }
 0x16d   :  { %1447 = vst [vmem:[#allocation2 + $0x19] sm:$0x1] %v4322_v5  ;;  %1448 = vst [vmem:[#allocation2 + $0x29] sm:$0x1] %v4322_v5  ;;  %v3258_v48 = vpop.f32.mrb[59].mxu0  ;;  %v3337_v56 = vpop.f32.mrb[58].mxu1  ;;  %v4142_v32 = vpack.c.bf16 %v1667_v41, %v1666_v28 }
 0x16e   :  { %1449 = vst [vmem:[#allocation2 + $0x39] sm:$0x1] %v4322_v5  ;;  %1450 = vst [vmem:[#allocation2 + $0x49] sm:$0x1] %v4322_v5  ;;  %v3259_v51 = vadd.f32 %v3258_v48, %v3257_v33  ;;  %v3338_v42 = vpop.f32.mrb[59].mxu1  ;;  %v5649_v26 = vadd.f32 %v3336_v7, %v986_v50  ;;  %v1688_v12 = vld [vmem:[%s6847_s2 + $0x280] sm:$0xff] }
 0x16f   :  { %1451 = vst [vmem:[#allocation2 + $0x59] sm:$0x1] %v4322_v5  ;;  %1452 = vst [vmem:[#allocation2 + $0x69] sm:$0x1] %v4322_v5  ;;  %v3339_v11 = vadd.f32 %v3338_v42, %v3337_v56  ;;  %4143 = vmatprep.subr.bf16.mxu0 %v4142_v32  ;;  %1817 = vmatmul.mubr.f32.vlgmr.msra.gmra.mrb[64].mxu1 %v4322_v5  ;;  %v1689_v15 = vld [vmem:[%s6847_s2 + $0x288] sm:$0xff]  ;;  %v1654_v36 = vld [vmem:[%s6847_s2 + $0x170] sm:$0xff] }
 0x170   :  { %1453 = vst [vmem:[#allocation2 + $0x79] sm:$0x1] %v4322_v5  ;;  %1454 = vst [vmem:[#allocation2 + $0x89] sm:$0x1] %v4322_v5  ;;  %v991_v59 = vadd.f32 %v3259_v51, %v5404_v1  ;;  %v3260_v20 = vpop.f32.mrb[60].mxu0  ;;  %4145 = vmatpush3.bf16.msra.mxu0 %v4144_v37  ;;  %v4146_v1 = vpack.c.bf16 %v1669_v3, %v1668_v38  ;;  %v1655_v54 = vld [vmem:[%s6847_s2 + $0x178] sm:$0xff]  ;;  %v4154_v31 = vpack.c.bf16 %v1689_v15, %v1688_v12 }
 0x171   :  { %1455 = vst [vmem:[#allocation2 + $0xb9] sm:$0x1] %v4322_v5  ;;  %1456 = vst [vmem:[#allocation2 + $0xc9] sm:$0x1] %v4322_v5  ;;  %v3261_v40 = vpop.f32.mrb[61].mxu0  ;;  %v3340_v14 = vpop.f32.mrb[60].mxu1 }
 0x172   :  { %1457 = vst [vmem:[#allocation2 + $0xd9] sm:$0x1] %v4322_v5  ;;  %1458 = vst [vmem:[#allocation2 + $0xe9] sm:$0x1] %v4322_v5  ;;  %v3262_v19 = vadd.f32 %v3261_v40, %v3260_v20  ;;  %v3341_v23 = vpop.f32.mrb[61].mxu1  ;;  %v5664_v61 = vadd.f32 %v3339_v11, %v991_v59  ;;  %4147 = vmatprep.subr.bf16.mxu0 %v4146_v1  ;;  %v1672_v7 = vld [vmem:[%s6847_s2 + $0x200] sm:$0xff]  ;;  %4155 = vmatprep.subr.bf16.mxu1 %v4154_v31 }
 0x173   :  { %1459 = vst [vmem:[#allocation2 + $0xf9] sm:$0x1] %v4322_v5  ;;  %1460 = vst [vmem:[#allocation2 + $0x109] sm:$0x1] %v4322_v5  ;;  %v3342_v43 = vadd.f32 %v3341_v23, %v3340_v14  ;;  %v1673_v16 = vld [vmem:[%s6847_s2 + $0x208] sm:$0xff]  ;;  %v1720_v35 = vld [vmem:[%s6847_s2 + $0x380] sm:$0xff] }
 0x174   :  { %1461 = vst [vmem:[#allocation2 + $0x119] sm:$0x1] %v4322_v5  ;;  %1462 = vst [vmem:[#allocation2 + $0x129] sm:$0x1] %v4322_v5  ;;  %v996_v25 = vadd.f32 %v3262_v19, %v5406_v17  ;;  %v3263_v34 = vpop.f32.mrb[62].mxu0  ;;  %4149 = vmatpush3.bf16.msra.mxu0 %v4148_v9  ;;  %v4152_v17 = vpack.c.bf16 %v1655_v54, %v1654_v36  ;;  %v4156_v33 = vpack.c.bf16 %v1673_v16, %v1672_v7  ;;  %v1693_v9 = vld [vmem:[%s6847_s2 + $0x2a8] sm:$0xff] }
 0x175   :  { %v3264_v24 = vpop.f32.mrb[63].mxu0  ;;  %v3343_v0 = vpop.f32.mrb[62].mxu1  ;;  %4151 = vmatprep.subr.bf16.mxu0 %v4150_v29  ;;  %v1676_v60 = vld [vmem:[%s6847_s2 + $0x220] sm:$0xff]  ;;  %v1677_v12 = vld [vmem:[%s6847_s2 + $0x228] sm:$0xff] }
 0x176   :  { %v3265_v18 = vadd.f32 %v3264_v24, %v3263_v34  ;;  %v3344_v8 = vpop.f32.mrb[63].mxu1  ;;  %v5698_v50 = vadd.f32 %v3342_v43, %v996_v25  ;;  %4157 = vmatpush3.bf16.msra.mxu1 %v4156_v33  ;;  %v4164_v15 = vpack.c.bf16 %v1677_v12, %v1676_v60 }
 0x177   :  { %v3345_v58 = vadd.f32 %v3344_v8, %v3343_v0 }
 0x178   :  { %v1001_v44 = vadd.f32 %v3265_v18, %v5408_v30  ;;  %v3796_v27 = vpop.f32.mrb[64].mxu0  ;;  %4153 = vmatpush3.bf16.msra.mxu0 %v4152_v17 }
 0x179   :  { %v5702_v48 = vadd.f32 %v3796_v27, %v5414_v49  ;;  %v1215_v56 = vpop.f32.mrb[65].mxu0 }
 0x17a   :  { %v5705_v28 = vadd.f32 %v1215_v56, %v5411_v47  ;;  %v5707_v41 = vadd.f32 %v3345_v58, %v1001_v44  ;;  %v1678_v58 = vld [vmem:[%s6847_s2 + $0x230] sm:$0xff] }
 0x17c   :  { %v1294_v62 = vadd.f32 %v5702_v48, %v5705_v28  ;;  %v3799_v51 = vpop.f32.mrb[66].mxu0 }
 0x17d   :  { %v5712_v42 = vadd.f32 %v3799_v51, %v5420_v4  ;;  %v1225_v30 = vpop.f32.mrb[67].mxu0  ;;  %v1690_v4 = vld [vmem:[%s6847_s2 + $0x290] sm:$0xff] }
 0x17e   :  { %v5715_v32 = vadd.f32 %v1225_v30, %v5417_v6  ;;  %v1691_v6 = vld [vmem:[%s6847_s2 + $0x298] sm:$0xff] }
 0x17f   :  { %v4158_v59 = vpack.c.bf16 %v1691_v6, %v1690_v4 }
 0x180   :  { %v1295_v49 = vadd.f32 %v1294_v62, %v5715_v32  ;;  %v3802_v2 = vpop.f32.mrb[68].mxu0 }
 0x181   :  { %v5719_v45 = vadd.f32 %v3802_v2, %v5438_v63  ;;  %v1235_v47 = vpop.f32.mrb[69].mxu0  ;;  %v1674_v63 = vld [vmem:[%s6847_s2 + $0x210] sm:$0xff]  ;;  %4159 = vmatprep.subr.bf16.mxu1 %v4158_v59 }
 0x182   :  { %v5722_v11 = vadd.f32 %v1235_v47, %v5423_v52  ;;  %v1296_v37 = vadd.f32 %v1295_v49, %v5712_v42  ;;  %v1675_v52 = vld [vmem:[%s6847_s2 + $0x218] sm:$0xff]  ;;  %v1696_v47 = vld [vmem:[%s6847_s2 + $0x2c0] sm:$0xff] }
 0x183   :  { %v4160_v40 = vpack.c.bf16 %v1675_v52, %v1674_v63 }
 0x184   :  { %v1297_v20 = vadd.f32 %v1296_v37, %v5722_v11  ;;  %v3805_v22 = vpop.f32.mrb[70].mxu0  ;;  %v1697_v37 = vld [vmem:[%s6847_s2 + $0x2c8] sm:$0xff] }
 0x185   :  { %v5739_v14 = vadd.f32 %v3805_v22, %v5474_v46  ;;  %v1245_v38 = vpop.f32.mrb[71].mxu0  ;;  %4161 = vmatpush3.bf16.msra.mxu1 %v4160_v40  ;;  %v4170_v4 = vpack.c.bf16 %v1697_v37, %v1696_v47  ;;  %v1698_v22 = vld [vmem:[%s6847_s2 + $0x2d0] sm:$0xff]  ;;  %v1699_v40 = vld [vmem:[%s6847_s2 + $0x2d8] sm:$0xff] }
 0x186   :  { %v5742_v3 = vadd.f32 %v1245_v38, %v5453_v21  ;;  %v1298_v19 = vadd.f32 %v1297_v20, %v5719_v45  ;;  %v1692_v21 = vld [vmem:[%s6847_s2 + $0x2a0] sm:$0xff]  ;;  %v4174_v38 = vpack.c.bf16 %v1699_v40, %v1698_v22 }
 0x188   :  { %v1299_v23 = vadd.f32 %v1298_v19, %v5742_v3  ;;  %v3808_v1 = vpop.f32.mrb[72].mxu0  ;;  %v1682_v19 = vld [vmem:[%s6847_s2 + $0x250] sm:$0xff] }
 0x189   :  { %v5747_v13 = vadd.f32 %v3808_v1, %v5528_v39  ;;  %v1255_v57 = vpop.f32.mrb[73].mxu0  ;;  %v4162_v39 = vpack.c.bf16 %v1693_v9, %v1692_v21 }
 0x18a   :  { %v5750_v43 = vadd.f32 %v1255_v57, %v5501_v10  ;;  %v1300_v46 = vadd.f32 %v1299_v23, %v5739_v14  ;;  %v1721_v10 = vld [vmem:[%s6847_s2 + $0x388] sm:$0xff]  ;;  %v1683_v23 = vld [vmem:[%s6847_s2 + $0x258] sm:$0xff] }
 0x18b   :  { %v4186_v29 = vpack.c.bf16 %v1721_v10, %v1720_v35  ;;  %4163 = vmatprep.subr.bf16.mxu1 %v4162_v39  ;;  %v4176_v57 = vpack.c.bf16 %v1683_v23, %v1682_v19 }
 0x18c   :  { %v1301_v25 = vadd.f32 %v1300_v46, %v5750_v43  ;;  %v3811_v34 = vpop.f32.mrb[74].mxu0  ;;  %4165 = vmatpush3.bf16.msra.mxu1 %v4164_v15  ;;  %v1701_v15 = vld [vmem:[%s6847_s2 + $0x2e8] sm:$0xff] }
 0x18d   :  { %v5773_v36 = vadd.f32 %v3811_v34, %v5622_v53  ;;  %v1265_v54 = vpop.f32.mrb[75].mxu0  ;;  %4187 = vmatprep.subr.bf16.mxu0 %v4186_v29  ;;  %v1694_v53 = vld [vmem:[%s6847_s2 + $0x2b0] sm:$0xff] }
 0x18e   :  { %v1266_v24 = vadd.f32 %v1265_v54, %v5555_v55  ;;  %v1302_v0 = vadd.f32 %v1301_v25, %v5747_v13  ;;  %v1695_v55 = vld [vmem:[%s6847_s2 + $0x2b8] sm:$0xff]  ;;  %v1685_v54 = vld [vmem:[%s6847_s2 + $0x268] sm:$0xff] }
 0x18f   :  { %v4166_v33 = vpack.c.bf16 %v1695_v55, %v1694_v53  ;;  %v1687_v53 = vld [vmem:[%s6847_s2 + $0x278] sm:$0xff] }
 0x190   :  { %v1303_v31 = vadd.f32 %v1302_v0, %v1266_v24  ;;  %v3814_v17 = vpop.f32.mrb[76].mxu0 }
 0x191   :  { %v1281_v7 = vadd.f32 %v3814_v17, %v5664_v61  ;;  %v1275_v16 = vpop.f32.mrb[77].mxu0  ;;  %v1679_v61 = vld [vmem:[%s6847_s2 + $0x238] sm:$0xff]  ;;  %4167 = vmatprep.subr.bf16.mxu1 %v4166_v33 }
 0x192   :  { %v1276_v18 = vadd.f32 %v1275_v16, %v5649_v26  ;;  %v1304_v8 = vadd.f32 %v1303_v31, %v5773_v36  ;;  %v4168_v27 = vpack.c.bf16 %v1679_v61, %v1678_v58  ;;  %v1703_v16 = vld [vmem:[%s6847_s2 + $0x2f8] sm:$0xff] }
 0x194   :  { %v1305_v26 = vadd.f32 %v1304_v8, %v1276_v18  ;;  %v3817_v44 = vpop.f32.mrb[78].mxu0  ;;  %4169 = vmatpush3.bf16.msra.mxu1 %v4168_v27  ;;  %v1686_v8 = vld [vmem:[%s6847_s2 + $0x270] sm:$0xff] }
 0x195   :  { %v1291_v56 = vadd.f32 %v3817_v44, %v5707_v41  ;;  %v1285_v62 = vpop.f32.mrb[79].mxu0  ;;  %v1680_v41 = vld [vmem:[%s6847_s2 + $0x240] sm:$0xff]  ;;  %4171 = vmatprep.subr.bf16.mxu1 %v4170_v4  ;;  %v4184_v58 = vpack.c.bf16 %v1687_v53, %v1686_v8 }
 0x196   :  { %v1286_v51 = vadd.f32 %v1285_v62, %v5698_v50  ;;  %v1306_v30 = vadd.f32 %v1305_v26, %v1281_v7  ;;  %v1681_v50 = vld [vmem:[%s6847_s2 + $0x248] sm:$0xff] }
 0x197   :  { %v4172_v59 = vpack.c.bf16 %v1681_v50, %v1680_v41 }
 0x198   :  { %v1307_v49 = vadd.f32 %v1306_v30, %v1286_v51  ;;  %v1737_v30 = vld [vmem:[%s6847_s2 + $0x408] sm:$0xff] }
 0x199   :  { %4173 = vmatpush3.bf16.msra.mxu1 %v4172_v59 }
 0x19a   :  { %v1308_v2 = vadd.f32 %v1307_v49, %v1291_v56  ;;  %4175 = vmatprep.subr.bf16.mxu1 %v4174_v38 }
 0x19c   :  { %v1309_v6 = vrot.slane %v1308_v2, 4 }
 0x19d   :  { %4177 = vmatpush3.bf16.msra.mxu1 %v4176_v57 }
 0x19e   :  { %v1310_v63 = vadd.f32 %v1309_v6, %v1308_v2 }
 0x1a0   :  { %v1311_v52 = vrot.slane %v1310_v63, 2 }
 0x1a2   :  { %v1312_v20 = vadd.f32 %v1311_v52, %v1310_v63 }
 0x1a4   :  { %v1313_v1 = vrot.slane %v1312_v20, 1 }
 0x1a6   :  { %v1314_v46 = vadd.f32 %v1313_v1, %v1312_v20 }
 0x1a8   :  { %v1316_v21 = vmul.f32 0.0078125, %v1314_v46 }
 0x1aa   :  { %v5819_v9 = vsub.f32 %v5705_v28, %v1316_v21  ;;  %v5822_v35 = vsub.f32 %v5702_v48, %v1316_v21  ;;  %v5825_v39 = vsub.f32 %v5715_v32, %v1316_v21  ;;  %v5828_v10 = vsub.f32 %v5712_v42, %v1316_v21 }
 0x1ab   :  { %v5831_v60 = vsub.f32 %v5722_v11, %v1316_v21  ;;  %v5834_v12 = vsub.f32 %v5719_v45, %v1316_v21  ;;  %v5837_v25 = vsub.f32 %v5742_v3, %v1316_v21  ;;  %v5840_v28 = vsub.f32 %v5739_v14, %v1316_v21 }
 0x1ac   :  { %v5843_v48 = vsub.f32 %v5750_v43, %v1316_v21  ;;  %v5846_v32 = vsub.f32 %v5747_v13, %v1316_v21  ;;  %v5848_v42 = vsub.f32 %v1266_v24, %v1316_v21  ;;  %v5851_v11 = vsub.f32 %v5773_v36, %v1316_v21  ;;  %v1700_v43 = vld [vmem:[%s6847_s2 + $0x2e0] sm:$0xff] }
 0x1ad   :  { %v5853_v34 = vsub.f32 %v1276_v18, %v1316_v21  ;;  %v5855_v45 = vsub.f32 %v1281_v7, %v1316_v21  ;;  %v5857_v3 = vsub.f32 %v1286_v51, %v1316_v21  ;;  %v5859_v29 = vsub.f32 %v1291_v56, %v1316_v21  ;;  %v1684_v36 = vld [vmem:[%s6847_s2 + $0x260] sm:$0xff]  ;;  %v1702_v7 = vld [vmem:[%s6847_s2 + $0x2f0] sm:$0xff] }
 0x1ae   :  { %v1333_v14 = vmul.f32 %v5819_v9, %v5819_v9  ;;  %v1334_v13 = vmul.f32 %v5822_v35, %v5822_v35  ;;  %v1335_v24 = vmul.f32 %v5825_v39, %v5825_v39  ;;  %v4178_v31 = vpack.c.bf16 %v1701_v15, %v1700_v43  ;;  %v1736_v51 = vld [vmem:[%s6847_s2 + $0x400] sm:$0xff] }
 0x1af   :  { %v4180_v17 = vpack.c.bf16 %v1685_v54, %v1684_v36  ;;  %v4182_v18 = vpack.c.bf16 %v1703_v16, %v1702_v7  ;;  %v1336_v55 = vmul.f32 %v5828_v10, %v5828_v10  ;;  %v1337_v61 = vmul.f32 %v5831_v60, %v5831_v60 }
 0x1b0   :  { %v1349_v0 = vadd.f32 %v1334_v13, %v1333_v14  ;;  %4179 = vmatprep.subr.bf16.mxu1 %v4178_v31  ;;  %v1338_v44 = vmul.f32 %v5834_v12, %v5834_v12  ;;  %v1339_v56 = vmul.f32 %v5837_v25, %v5837_v25  ;;  %v1340_v49 = vmul.f32 %v5840_v28, %v5840_v28 }
 0x1b1   :  { %4181 = vmatpush3.bf16.msra.mxu1 %v4180_v17  ;;  %v5907_v47 = vpack.c.bf16 %v1737_v30, %v1736_v51  ;;  %v1341_v37 = vmul.f32 %v5843_v48, %v5843_v48  ;;  %v1342_v41 = vmul.f32 %v5846_v32, %v5846_v32  ;;  %v1343_v6 = vmul.f32 %v5848_v42, %v5848_v42  ;;  %v1704_v51 = vld [vmem:[%s6847_s2 + $0x300] sm:$0xff]  ;;  %v1705_v30 = vld [vmem:[%s6847_s2 + $0x308] sm:$0xff] }
 0x1b2   :  { %v1350_v33 = vadd.f32 %v1349_v0, %v1335_v24  ;;  %4183 = vmatprep.subr.bf16.mxu1 %v4182_v18  ;;  %v1344_v63 = vmul.f32 %v5851_v11, %v5851_v11  ;;  %v1345_v20 = vmul.f32 %v5853_v34, %v5853_v34  ;;  %v1346_v40 = vmul.f32 %v5855_v45, %v5855_v45 }
 0x1b3   :  { %v1347_v19 = vmul.f32 %v5857_v3, %v5857_v3  ;;  %v1348_v1 = vmul.f32 %v5859_v29, %v5859_v29 }
 0x1b4   :  { %v1351_v26 = vadd.f32 %v1350_v33, %v1336_v55 }
 0x1b5   :  { %4185 = vmatpush3.bf16.msra.mxu1 %v4184_v58 }
 0x1b6   :  { %v1352_v27 = vadd.f32 %v1351_v26, %v1337_v61  ;;  %4219 = vmatprep.subr.bf16.mxu1 %v5907_v47 }
 0x1b8   :  { %v1353_v62 = vadd.f32 %v1352_v27, %v1338_v44 }
 0x1ba   :  { %v1354_v2 = vadd.f32 %v1353_v62, %v1339_v56 }
 0x1bc   :  { %v1355_v4 = vadd.f32 %v1354_v2, %v1340_v49  ;;  %v1722_v49 = vld [vmem:[%s6847_s2 + $0x390] sm:$0xff]  ;;  %v1723_v2 = vld [vmem:[%s6847_s2 + $0x398] sm:$0xff] }
 0x1be   :  { %v1356_v50 = vadd.f32 %v1355_v4, %v1341_v37  ;;  %v1495_v37 = vld [vmem:[#allocation2 + $0x2] sm:$0xff]  ;;  %v4188_v4 = vpack.c.bf16 %v1705_v30, %v1704_v51  ;;  %v1715_v51 = vld [vmem:[%s6847_s2 + $0x358] sm:$0xff] }
 0x1c0   :  { %v1357_v59 = vadd.f32 %v1356_v50, %v1342_v41  ;;  %v4190_v50 = vpack.c.bf16 %v1723_v2, %v1722_v49  ;;  %v1732_v49 = vld [vmem:[%s6847_s2 + $0x3e0] sm:$0xff]  ;;  %v1733_v2 = vld [vmem:[%s6847_s2 + $0x3e8] sm:$0xff] }
 0x1c2   :  { %v1358_v52 = vadd.f32 %v1357_v59, %v1343_v6  ;;  %v1706_v6 = vld [vmem:[%s6847_s2 + $0x310] sm:$0xff]  ;;  %v1707_v59 = vld [vmem:[%s6847_s2 + $0x318] sm:$0xff] }
 0x1c4   :  { %v1359_v22 = vadd.f32 %v1358_v52, %v1344_v63  ;;  %v1724_v63 = vld [vmem:[%s6847_s2 + $0x3a0] sm:$0xff]  ;;  %v1725_v52 = vld [vmem:[%s6847_s2 + $0x3a8] sm:$0xff] }
 0x1c6   :  { %v1360_v38 = vadd.f32 %v1359_v22, %v1345_v20  ;;  %v4192_v22 = vpack.c.bf16 %v1707_v59, %v1706_v6  ;;  %v1717_v6 = vld [vmem:[%s6847_s2 + $0x368] sm:$0xff] }
 0x1c8   :  { %v1361_v23 = vadd.f32 %v1360_v38, %v1346_v40  ;;  %v4194_v40 = vpack.c.bf16 %v1725_v52, %v1724_v63  ;;  %v1708_v38 = vld [vmem:[%s6847_s2 + $0x320] sm:$0xff]  ;;  %v1734_v63 = vld [vmem:[%s6847_s2 + $0x3f0] sm:$0xff]  ;;  %v1735_v52 = vld [vmem:[%s6847_s2 + $0x3f8] sm:$0xff] }
 0x1ca   :  { %v1362_v57 = vadd.f32 %v1361_v23, %v1347_v19  ;;  %v1709_v19 = vld [vmem:[%s6847_s2 + $0x328] sm:$0xff] }
 0x1cc   :  { %v1363_v46 = vadd.f32 %v1362_v57, %v1348_v1  ;;  %v1726_v1 = vld [vmem:[%s6847_s2 + $0x3b0] sm:$0xff]  ;;  %v1727_v57 = vld [vmem:[%s6847_s2 + $0x3b8] sm:$0xff] }
 0x1ce   :  { %v1364_v21 = vrot.slane %v1363_v46, 4 }
 0x1d0   :  { %v1365_v14 = vadd.f32 %v1364_v21, %v1363_v46  ;;  %v4196_v21 = vpack.c.bf16 %v1709_v19, %v1708_v38  ;;  %v4214_v19 = vpack.c.bf16 %v1735_v52, %v1734_v63  ;;  %v2580_v52 = vld [vmem:[%s6848_s3 + $0x48] sm:$0xff] }
 0x1d2   :  { %v1366_v13 = vrot.slane %v1365_v14, 2 }
 0x1d4   :  { %v1367_v43 = vadd.f32 %v1366_v13, %v1365_v14  ;;  %v4198_v14 = vpack.c.bf16 %v1727_v57, %v1726_v1  ;;  %v1710_v13 = vld [vmem:[%s6847_s2 + $0x330] sm:$0xff]  ;;  %v1719_v57 = vld [vmem:[%s6847_s2 + $0x378] sm:$0xff] }
 0x1d5   :  { %v1718_v1 = vld [vmem:[%s6847_s2 + $0x370] sm:$0xff] }
 0x1d6   :  { %v1368_v15 = vrot.slane %v1367_v43, 1 }
 0x1d8   :  { %v1369_v36 = vadd.f32 %v1368_v15, %v1367_v43  ;;  %v1711_v43 = vld [vmem:[%s6847_s2 + $0x338] sm:$0xff] }
 0x1da   :  { %v1370_v54 = vmul.f32 0.0078125, %v1369_v36  ;;  %v1728_v36 = vld [vmem:[%s6847_s2 + $0x3c0] sm:$0xff] }
 0x1dc   :  { %v1371_v24 = vadd.f32 1e-05, %v1370_v54  ;;  %v1729_v54 = vld [vmem:[%s6847_s2 + $0x3c8] sm:$0xff] }
 0x1de   :  { %4299 = vrsqrt.f32 %v1371_v24 }
 0x1e8   :  { %v4300_v0 = vpop.eup %4299 }
 0x1e9   :  { %v1376_v31 = vmul.f32 %v4300_v0, %v5828_v10  ;;  %v1377_v17 = vmul.f32 %v4300_v0, %v5831_v60  ;;  %v1378_v7 = vmul.f32 %v4300_v0, %v5834_v12  ;;  %v5930_v16 = vmul.f32 %v4300_v0, %v5837_v25 }
 0x1ea   :  { %v1380_v18 = vmul.f32 %v4300_v0, %v5840_v28  ;;  %v5934_v8 = vmul.f32 %v4300_v0, %v5843_v48  ;;  %v5937_v53 = vmul.f32 %v4300_v0, %v5846_v32  ;;  %v5940_v55 = vmul.f32 %v4300_v0, %v5848_v42 }
 0x1eb   :  { %v5943_v10 = vmul.f32 %v4300_v0, %v5851_v11  ;;  %v5946_v60 = vmul.f32 %v4300_v0, %v5853_v34  ;;  %v5949_v12 = vmul.f32 %v4300_v0, %v5855_v45  ;;  %v5952_v25 = vmul.f32 %v4300_v0, %v5857_v3 }
 0x1ec   :  { %v1388_v28 = vmul.f32 %v4300_v0, %v5859_v29  ;;  %v5955_v48 = vmax.f32 %v1377_v17, 0.0  ;;  %v5957_v32 = vmax.f32 %v1378_v7, 0.0  ;;  %v1395_v42 = vmax.f32 %v5930_v16, 0.0  ;;  %v1712_v17 = vld [vmem:[%s6847_s2 + $0x340] sm:$0xff]  ;;  %v1713_v7 = vld [vmem:[%s6847_s2 + $0x348] sm:$0xff] }
 0x1ed   :  { %v1396_v33 = vmax.f32 %v1380_v18, 0.0  ;;  %v1397_v11 = vmax.f32 %v5934_v8, 0.0  ;;  %v1398_v34 = vmax.f32 %v5937_v53, 0.0  ;;  %v1399_v58 = vmax.f32 %v5940_v55, 0.0 }
 0x1ee   :  { %v1400_v45 = vmax.f32 %v5943_v10, 0.0  ;;  %v1401_v3 = vmax.f32 %v5946_v60, 0.0  ;;  %v1402_v61 = vmax.f32 %v5949_v12, 0.0  ;;  %v1403_v29 = vmax.f32 %v5952_v25, 0.0  ;;  %1410 = vst [vmem:[#allocation2 + $0x51] sm:$0xff] %v5955_v48  ;;  %1411 = vst [vmem:[#allocation2 + $0x61] sm:$0xff] %v5957_v32 }
 0x1ef   :  { %1412 = vst [vmem:[#allocation2 + $0x71] sm:$0xff] %v1395_v42  ;;  %v1404_v26 = vmax.f32 %v1388_v28, 0.0  ;;  %1413 = vst [vmem:[#allocation2 + $0x81] sm:$0xff] %v1396_v33  ;;  %v1373_v44 = vmul.f32 %v4300_v0, %v5819_v9  ;;  %v1374_v27 = vmul.f32 %v4300_v0, %v5822_v35  ;;  %v1375_v56 = vmul.f32 %v4300_v0, %v5825_v39  ;;  %v1730_v28 = vld [vmem:[%s6847_s2 + $0x3d0] sm:$0xff]  ;;  %v1731_v33 = vld [vmem:[%s6847_s2 + $0x3d8] sm:$0xff] }
 0x1f0   :  { %1414 = vst [vmem:[#allocation2 + $0xb1] sm:$0xff] %v1397_v11  ;;  %1415 = vst [vmem:[#allocation2 + $0xc1] sm:$0xff] %v1398_v34  ;;  %v5988_v62 = vmax.f32 %v1376_v31, 0.0  ;;  %v4200_v0 = vpack.c.bf16 %v1711_v43, %v1710_v13  ;;  %v4202_v31 = vpack.c.bf16 %v1729_v54, %v1728_v36  ;;  %v4216_v13 = vpack.c.bf16 %v1719_v57, %v1718_v1  ;;  %v1749_v1 = vld [vmem:[%s6847_s2 + $0x468] sm:$0xff] }
 0x1f1   :  { %1416 = vst [vmem:[#allocation2 + $0xd1] sm:$0xff] %v1399_v58  ;;  %1417 = vst [vmem:[#allocation2 + $0xe1] sm:$0xff] %v1400_v45  ;;  %v5990_v9 = vmax.f32 %v1373_v44, 0.0  ;;  %v5992_v35 = vmax.f32 %v1374_v27, 0.0  ;;  %v5994_v39 = vmax.f32 %v1375_v56, 0.0  ;;  %v4204_v44 = vpack.c.bf16 %v1713_v7, %v1712_v17  ;;  %v1714_v56 = vld [vmem:[%s6847_s2 + $0x350] sm:$0xff] }
 0x1f2   :  { %1418 = vst [vmem:[#allocation2 + $0xf1] sm:$0xff] %v1401_v3  ;;  %1419 = vst [vmem:[#allocation2 + $0x101] sm:$0xff] %v1402_v61  ;;  %v4206_v27 = vpack.c.bf16 %v1731_v33, %v1730_v28  ;;  %v1740_v7 = vld [vmem:[%s6847_s2 + $0x420] sm:$0xff]  ;;  %v1741_v28 = vld [vmem:[%s6847_s2 + $0x428] sm:$0xff] }
 0x1f3   :  { %1420 = vst [vmem:[#allocation2 + $0x111] sm:$0xff] %v1403_v29  ;;  %1421 = vst [vmem:[#allocation2 + $0x121] sm:$0xff] %v1404_v26  ;;  %1821 = vmatprep.mubr.f32.mxu1 %v5990_v9  ;;  %v4226_v33 = vpack.c.bf16 %v1741_v28, %v1740_v7  ;;  %v2585_v28 = vld [vmem:[%s6848_s3 + $0x70] sm:$0xff] }
 0x1f4   :  { %1409 = vst [vmem:[#allocation2 + $0x41] sm:$0xff] %v5988_v62  ;;  %1406 = vst [vmem:[#allocation2 + $0x11] sm:$0xff] %v5990_v9 }
 0x1f5   :  { %1407 = vst [vmem:[#allocation2 + $0x21] sm:$0xff] %v5992_v35  ;;  %1408 = vst [vmem:[#allocation2 + $0x31] sm:$0xff] %v5994_v39  ;;  %v6086_v26 = vld [vmem:[#allocation2 + $0x50] sm:$0xff]  ;;  %v6137_v16 = vld [vmem:[#allocation2 + $0x62] sm:$0xff] }
 0x1f6   :  { %v6116_v59 = vld [vmem:[#allocation2 + $0x52] sm:$0xff]  ;;  %v1582_v7 = vld [vmem:[#allocation2 + $0x81] sm:$0xff] }
 0x1f7   :  { %v6152_v36 = vld [vmem:[#allocation2 + $0x72] sm:$0xff]  ;;  %v6173_v53 = vld [vmem:[#allocation2 + $0xc2] sm:$0xff] }
 0x1f8   :  { %v1519_v54 = vld [vmem:[#allocation2 + $0xb0] sm:$0xff]  ;;  %v6191_v10 = vld [vmem:[#allocation2 + $0xe2] sm:$0xff] }
 0x1f9   :  { %v6169_v8 = vld [vmem:[#allocation2 + $0xd0] sm:$0xff]  ;;  %v6209_v12 = vld [vmem:[#allocation2 + $0x102] sm:$0xff] }
 0x1fa   :  { %v6182_v55 = vld [vmem:[#allocation2 + $0xd2] sm:$0xff]  ;;  %v6218_v25 = vld [vmem:[#allocation2 + $0x120] sm:$0xff] }
 0x1fb   :  { %v1511_v41 = vld [vmem:[#allocation2 + $0x10] sm:$0xff]  ;;  %v6066_v24 = vld [vmem:[#allocation2 + $0x40] sm:$0xff] }
 0x1fc   :  { %1961 = vmatprep.mubr.f32.mxu0 %v1511_v41  ;;  %1822 = vmatmul.mubr.f32.gmra.mrb[66].mxu1 %v1511_v41  ;;  %v6026_v20 = vld [vmem:[#allocation2 + $0x20] sm:$0xff]  ;;  %v6036_v23 = vld [vmem:[#allocation2 + $0x12] sm:$0xff]  ;;  %v4210_v41 = vpack.c.bf16 %v1733_v2, %v1732_v49  ;;  %v1745_v49 = vld [vmem:[%s6847_s2 + $0x448] sm:$0xff] }
 0x1fd   :  { %1962 = vmatmul.mubr.f32.vlgmr.msra.gmra.mrb[80].mxu0 %v1495_v37  ;;  %1826 = vmatprep.mubr.f32.mxu1 %v5992_v35  ;;  %v6046_v46 = vld [vmem:[#allocation2 + $0x30] sm:$0xff]  ;;  %v6056_v15 = vld [vmem:[#allocation2 + $0x22] sm:$0xff] }
 0x1fe   :  { %1966 = vmatprep.mubr.f32.mxu0 %v6026_v20  ;;  %4189 = vmatpush3.bf16.msra.mxu0 %v4188_v4  ;;  %v6076_v18 = vld [vmem:[#allocation2 + $0x32] sm:$0xff]  ;;  %v6096_v30 = vld [vmem:[#allocation2 + $0x42] sm:$0xff]  ;;  %v4208_v4 = vpack.c.bf16 %v1715_v51, %v1714_v56 }
 0x1ff   :  { %4191 = vmatprep.subr.bf16.mxu0 %v4190_v50  ;;  %v6106_v37 = vld [vmem:[#allocation2 + $0x60] sm:$0xff]  ;;  %v6200_v60 = vld [vmem:[#allocation2 + $0xf2] sm:$0xff] }
 0x200   :  { %1827 = vmatmul.mubr.f32.gmra.mrb[68].mxu1 %v6026_v20  ;;  %v1716_v50 = vld [vmem:[%s6847_s2 + $0x360] sm:$0xff]  ;;  %v6222_v17 = vld [vmem:[#allocation2 + $0x112] sm:$0xff] }
 0x201   :  { %1967 = vmatmul.mubr.f32.gmra.mrb[82].mxu0 %v6036_v23  ;;  %1831 = vmatprep.mubr.f32.mxu1 %v5994_v39  ;;  %v4212_v38 = vpack.c.bf16 %v1717_v6, %v1716_v50  ;;  %v1747_v50 = vld [vmem:[%s6847_s2 + $0x458] sm:$0xff] }
 0x202   :  { %1971 = vmatprep.mubr.f32.mxu0 %v6046_v46  ;;  %4193 = vmatpush3.bf16.msra.mxu0 %v4192_v22  ;;  %v6127_v22 = vld [vmem:[#allocation2 + $0x70] sm:$0xff] }
 0x203   :  { %4195 = vmatprep.subr.bf16.mxu0 %v4194_v40  ;;  %v1487_v40 = vld [vmem:[#allocation2 + $0xa1] sm:$0xff] }
 0x204   :  { %1832 = vmatmul.mubr.f32.gmra.mrb[70].mxu1 %v6046_v46 }
 0x205   :  { %1972 = vmatmul.mubr.f32.gmra.mrb[84].mxu0 %v6056_v15  ;;  %1836 = vmatprep.mubr.f32.mxu1 %v5988_v62 }
 0x206   :  { %1976 = vmatprep.mubr.f32.mxu0 %v6066_v24  ;;  %4197 = vmatpush3.bf16.msra.mxu0 %v4196_v21  ;;  %v2572_v21 = vld [vmem:[%s6848_s3 + $0x8] sm:$0xff] }
 0x207   :  { %4199 = vmatprep.subr.bf16.mxu0 %v4198_v14  ;;  %v6146_v14 = vld [vmem:[#allocation2 + $0x80] sm:$0xff] }
 0x208   :  { %1837 = vmatmul.mubr.f32.gmra.mrb[72].mxu1 %v6066_v24 }
 0x209   :  { %1977 = vmatmul.mubr.f32.gmra.mrb[86].mxu0 %v6076_v18  ;;  %1841 = vmatprep.mubr.f32.mxu1 %v5955_v48 }
 0x20a   :  { %1981 = vmatprep.mubr.f32.mxu0 %v6086_v26  ;;  %4201 = vmatpush3.bf16.msra.mxu0 %v4200_v0  ;;  %v1503_v0 = vld [vmem:[#allocation2 + $0xa2] sm:$0xff] }
 0x20b   :  { %4203 = vmatprep.subr.bf16.mxu0 %v4202_v31  ;;  %v6160_v31 = vld [vmem:[#allocation2 + $0xc0] sm:$0xff] }
 0x20c   :  { %1842 = vmatmul.mubr.f32.gmra.mrb[74].mxu1 %v6086_v26 }
 0x20d   :  { %1982 = vmatmul.mubr.f32.gmra.mrb[88].mxu0 %v6096_v30  ;;  %1846 = vmatprep.mubr.f32.mxu1 %v5957_v32 }
 0x20e   :  { %1986 = vmatprep.mubr.f32.mxu0 %v6106_v37  ;;  %4205 = vmatpush3.bf16.msra.mxu0 %v4204_v44  ;;  %v1742_v44 = vld [vmem:[%s6847_s2 + $0x430] sm:$0xff] }
 0x20f   :  { %4207 = vmatprep.subr.bf16.mxu0 %v4206_v27  ;;  %v1743_v27 = vld [vmem:[%s6847_s2 + $0x438] sm:$0xff] }
 0x210   :  { %1847 = vmatmul.mubr.f32.gmra.mrb[76].mxu1 %v6106_v37  ;;  %v4230_v51 = vpack.c.bf16 %v1743_v27, %v1742_v44  ;;  %v4305_v44 = vld [vmem:[#allocation2] sm:$0xff] }
 0x211   :  { %1987 = vmatmul.mubr.f32.gmra.mrb[90].mxu0 %v6116_v59  ;;  %1851 = vmatprep.mubr.f32.mxu1 %v1395_v42  ;;  %v2571_v42 = vld [vmem:[%s6848_s3] sm:$0xff] }
 0x212   :  { %1991 = vmatprep.mubr.f32.mxu0 %v6127_v22  ;;  %4209 = vmatpush3.bf16.msra.mxu0 %v4208_v4  ;;  %v6149_v43 = vpack.c.bf16 %v2572_v21, %v2571_v42  ;;  %v2578_v4 = vld [vmem:[%s6848_s3 + $0x38] sm:$0xff]  ;;  %v1584_v27 = vld [vmem:[#allocation2 + $0xc1] sm:$0xff] }
 0x213   :  { %4211 = vmatprep.subr.bf16.mxu0 %v4210_v41  ;;  %v2582_v42 = vld [vmem:[%s6848_s3 + $0x58] sm:$0xff] }
 0x214   :  { %1852 = vmatmul.mubr.f32.gmra.mrb[78].mxu1 %v6127_v22 }
 0x215   :  { %1992 = vmatmul.mubr.f32.gmra.mrb[92].mxu0 %v6137_v16  ;;  %1856 = vmatprep.mubr.f32.mxu1 %v1487_v40 }
 0x216   :  { %1996 = vmatprep.mubr.f32.mxu0 %v6146_v14  ;;  %4213 = vmatpush3.bf16.msra.mxu0 %v4212_v38 }
 0x217   :  { %4215 = vmatprep.subr.bf16.mxu0 %v4214_v19  ;;  %v1748_v19 = vld [vmem:[%s6847_s2 + $0x460] sm:$0xff] }
 0x218   :  { %1857 = vmatmul.mubr.f32.gmra.mrb[80].mxu1 %v4322_v5  ;;  %v6164_v5 = vld [vmem:[#allocation2 + $0xb2] sm:$0xff]  ;;  %v4242_v21 = vpack.c.bf16 %v1749_v1, %v1748_v19 }
 0x219   :  { %1997 = vmatmul.mubr.f32.gmra.mrb[94].mxu0 %v6152_v36  ;;  %1861 = vmatprep.mubr.f32.mxu1 %v1397_v11  ;;  %v6178_v11 = vld [vmem:[#allocation2 + $0xe0] sm:$0xff] }
 0x21a   :  { %2001 = vmatprep.mubr.f32.mxu0 %v1519_v54  ;;  %4217 = vmatpush3.bf16.msra.mxu0 %v4216_v13  ;;  %v1751_v13 = vld [vmem:[%s6847_s2 + $0x478] sm:$0xff] }
 0x21b   :  { %4251 = vmatprep.subr.bf16.mxu0 %v6149_v43 }
 0x21c   :  { %1862 = vmatmul.mubr.f32.gmra.mrb[82].mxu1 %v1519_v54 }
 0x21d   :  { %2002 = vmatmul.mubr.f32.gmra.mrb[96].mxu0 %v1503_v0  ;;  %1866 = vmatprep.mubr.f32.mxu1 %v1398_v34  ;;  %v6187_v34 = vld [vmem:[#allocation2 + $0xf0] sm:$0xff] }
 0x21e   :  { %2006 = vmatprep.mubr.f32.mxu0 %v6160_v31  ;;  %v1581_v0 = vld [vmem:[#allocation2 + $0x71] sm:$0xff] }
 0x220   :  { %1867 = vmatmul.mubr.f32.gmra.mrb[84].mxu1 %v6160_v31 }
 0x221   :  { %2007 = vmatmul.mubr.f32.gmra.mrb[98].mxu0 %v6164_v5  ;;  %1871 = vmatprep.mubr.f32.mxu1 %v1399_v58  ;;  %v6196_v58 = vld [vmem:[#allocation2 + $0x100] sm:$0xff] }
 0x222   :  { %2011 = vmatprep.mubr.f32.mxu0 %v6169_v8 }
 0x224   :  { %1872 = vmatmul.mubr.f32.gmra.mrb[86].mxu1 %v6169_v8 }
 0x225   :  { %2012 = vmatmul.mubr.f32.gmra.mrb[100].mxu0 %v6173_v53  ;;  %1876 = vmatprep.mubr.f32.mxu1 %v1400_v45  ;;  %v6205_v45 = vld [vmem:[#allocation2 + $0x110] sm:$0xff] }
 0x226   :  { %2016 = vmatprep.mubr.f32.mxu0 %v6178_v11 }
 0x228   :  { %1877 = vmatmul.mubr.f32.gmra.mrb[88].mxu1 %v6178_v11 }
 0x229   :  { %2017 = vmatmul.mubr.f32.gmra.mrb[102].mxu0 %v6182_v55  ;;  %1881 = vmatprep.mubr.f32.mxu1 %v1401_v3  ;;  %v1738_v3 = vld [vmem:[%s6847_s2 + $0x410] sm:$0xff] }
 0x22a   :  { %2021 = vmatprep.mubr.f32.mxu0 %v6187_v34 }
 0x22c   :  { %1882 = vmatmul.mubr.f32.gmra.mrb[90].mxu1 %v6187_v34 }
 0x22d   :  { %2022 = vmatmul.mubr.f32.gmra.mrb[104].mxu0 %v6191_v10  ;;  %1886 = vmatprep.mubr.f32.mxu1 %v1402_v61  ;;  %v1739_v61 = vld [vmem:[%s6847_s2 + $0x418] sm:$0xff] }
 0x22e   :  { %2026 = vmatprep.mubr.f32.mxu0 %v6196_v58 }
 0x230   :  { %1887 = vmatmul.mubr.f32.gmra.mrb[92].mxu1 %v6196_v58 }
 0x231   :  { %2027 = vmatmul.mubr.f32.gmra.mrb[106].mxu0 %v6200_v60  ;;  %1891 = vmatprep.mubr.f32.mxu1 %v1403_v29  ;;  %v4222_v29 = vpack.c.bf16 %v1739_v61, %v1738_v3  ;;  %v2584_v3 = vld [vmem:[%s6848_s3 + $0x68] sm:$0xff] }
 0x232   :  { %2031 = vmatprep.mubr.f32.mxu0 %v6205_v45 }
 0x234   :  { %1892 = vmatmul.mubr.f32.gmra.mrb[94].mxu1 %v6205_v45 }
 0x235   :  { %2032 = vmatmul.mubr.f32.gmra.mrb[108].mxu0 %v6209_v12  ;;  %2106 = vmatprep.mubr.f32.mxu1 %v6036_v23  ;;  %v2573_v23 = vld [vmem:[%s6848_s3 + $0x10] sm:$0xff] }
 0x236   :  { %2036 = vmatprep.mubr.f32.mxu0 %v6218_v25 }
 0x238   :  { %2107 = vmatmul.mubr.f32.vlgmr.msra.gmra.mrb[96].mxu1 %v5990_v9  ;;  %v2574_v9 = vld [vmem:[%s6848_s3 + $0x18] sm:$0xff] }
 0x239   :  { %2037 = vmatmul.mubr.f32.gmra.mrb[110].mxu0 %v6222_v17  ;;  %2111 = vmatprep.mubr.f32.mxu1 %v6056_v15  ;;  %v6248_v56 = vpack.c.bf16 %v2574_v9, %v2573_v23  ;;  %v2586_v23 = vld [vmem:[%s6848_s3 + $0x78] sm:$0xff] }
 0x23a   :  { %2251 = vmatprep.mubr.f32.mxu0 %v5992_v35  ;;  %4221 = vmatpush3.bf16.msra.mxu1 %v5907_v47  ;;  %v2575_v47 = vld [vmem:[%s6848_s3 + $0x20] sm:$0xff]  ;;  %v1583_v9 = vld [vmem:[#allocation2 + $0x91] sm:$0xff] }
 0x23b   :  { %4223 = vmatprep.subr.bf16.mxu1 %v4222_v29 }
 0x23c   :  { %2112 = vmatmul.mubr.f32.gmra.mrb[98].mxu1 %v5992_v35  ;;  %v2576_v35 = vld [vmem:[%s6848_s3 + $0x28] sm:$0xff] }
 0x23d   :  { %2252 = vmatmul.mubr.f32.vlgmr.msra.gmra.mrb[112].mxu0 %v6026_v20  ;;  %2116 = vmatprep.mubr.f32.mxu1 %v6076_v18  ;;  %v1744_v20 = vld [vmem:[%s6847_s2 + $0x440] sm:$0xff]  ;;  %v6268_v2 = vpack.c.bf16 %v2576_v35, %v2575_v47  ;;  %v1587_v47 = vld [vmem:[#allocation2 + $0xf1] sm:$0xff] }
 0x23e   :  { %2256 = vmatprep.mubr.f32.mxu0 %v5994_v39  ;;  %4225 = vmatpush3.bf16.msra.mxu1 %v4222_v29  ;;  %v4234_v41 = vpack.c.bf16 %v1745_v49, %v1744_v20  ;;  %v6341_v29 = vld [vmem:[#allocation2 + $0x82] sm:$0xff] }
 0x23f   :  { %4227 = vmatprep.subr.bf16.mxu1 %v4226_v33  ;;  %4253 = vmatpush3.bf16.msra.mxu0 %v6149_v43  ;;  %v1590_v35 = vld [vmem:[#allocation2 + $0x121] sm:$0xff] }
 0x240   :  { %2117 = vmatmul.mubr.f32.gmra.mrb[100].mxu1 %v5994_v39  ;;  %4255 = vmatprep.subr.bf16.mxu0 %v6248_v56  ;;  %v2577_v39 = vld [vmem:[%s6848_s3 + $0x30] sm:$0xff] }
 0x241   :  { %2257 = vmatmul.mubr.f32.gmra.mrb[114].mxu0 %v6046_v46  ;;  %2121 = vmatprep.mubr.f32.mxu1 %v6096_v30  ;;  %v1746_v46 = vld [vmem:[%s6847_s2 + $0x450] sm:$0xff]  ;;  %v6288_v6 = vpack.c.bf16 %v2578_v4, %v2577_v39 }
 0x242   :  { %2261 = vmatprep.mubr.f32.mxu0 %v5988_v62  ;;  %4229 = vmatpush3.bf16.msra.mxu1 %v4226_v33  ;;  %v3410_v63 = vpop.f32.mrb[64].mxu1  ;;  %v1535_v33 = vld [vmem:[#allocation2 + $0xb1] sm:$0xff] }
 0x243   :  { %4231 = vmatprep.subr.bf16.mxu1 %v4230_v51  ;;  %4257 = vmatpush3.bf16.msra.mxu0 %v6248_v56  ;;  %v3411_v40 = vpop.f32.mrb[65].mxu1 }
 0x244   :  { %2122 = vmatmul.mubr.f32.gmra.mrb[102].mxu1 %v5988_v62  ;;  %4259 = vmatprep.subr.bf16.mxu0 %v6268_v2  ;;  %v2579_v62 = vld [vmem:[%s6848_s3 + $0x40] sm:$0xff]  ;;  %v6299_v38 = vadd.f32 %v3411_v40, %v3410_v63 }
 0x245   :  { %2262 = vmatmul.mubr.f32.gmra.mrb[116].mxu0 %v6066_v24  ;;  %2126 = vmatprep.mubr.f32.mxu1 %v6116_v59  ;;  %v4238_v24 = vpack.c.bf16 %v1747_v50, %v1746_v46  ;;  %v6310_v57 = vpack.c.bf16 %v2580_v52, %v2579_v62 }
 0x246   :  { %2266 = vmatprep.mubr.f32.mxu0 %v5955_v48  ;;  %4233 = vmatpush3.bf16.msra.mxu1 %v4230_v51  ;;  %v1591_v51 = vld [vmem:[#allocation2 + $0x131] sm:$0xff] }
 0x247   :  { %4235 = vmatprep.subr.bf16.mxu1 %v4234_v41  ;;  %4261 = vmatpush3.bf16.msra.mxu0 %v6268_v2 }
 0x248   :  { %2127 = vmatmul.mubr.f32.gmra.mrb[104].mxu1 %v5955_v48  ;;  %4263 = vmatprep.subr.bf16.mxu0 %v6288_v6  ;;  %v2581_v48 = vld [vmem:[%s6848_s3 + $0x50] sm:$0xff] }
 0x249   :  { %2267 = vmatmul.mubr.f32.gmra.mrb[118].mxu0 %v6086_v26  ;;  %2131 = vmatprep.mubr.f32.mxu1 %v6137_v16  ;;  %v1750_v26 = vld [vmem:[%s6847_s2 + $0x470] sm:$0xff]  ;;  %v6330_v54 = vpack.c.bf16 %v2582_v42, %v2581_v48 }
 0x24a   :  { %2271 = vmatprep.mubr.f32.mxu0 %v5957_v32  ;;  %4237 = vmatpush3.bf16.msra.mxu1 %v4234_v41  ;;  %v4246_v61 = vpack.c.bf16 %v1751_v13, %v1750_v26 }
 0x24b   :  { %4239 = vmatprep.subr.bf16.mxu1 %v4238_v24  ;;  %4265 = vmatpush3.bf16.msra.mxu0 %v6288_v6 }
 0x24c   :  { %2132 = vmatmul.mubr.f32.gmra.mrb[106].mxu1 %v5957_v32  ;;  %4267 = vmatprep.subr.bf16.mxu0 %v6310_v57  ;;  %v2583_v32 = vld [vmem:[%s6848_s3 + $0x60] sm:$0xff] }
 0x24d   :  { %2272 = vmatmul.mubr.f32.gmra.mrb[120].mxu0 %v6106_v37  ;;  %2136 = vmatprep.mubr.f32.mxu1 %v6152_v36  ;;  %v6344_v37 = vpack.c.bf16 %v2584_v3, %v2583_v32 }
 0x24e   :  { %2276 = vmatprep.mubr.f32.mxu0 %v1581_v0  ;;  %4241 = vmatpush3.bf16.msra.mxu1 %v4238_v24 }
 0x24f   :  { %4243 = vmatprep.subr.bf16.mxu1 %v4242_v21  ;;  %4269 = vmatpush3.bf16.msra.mxu0 %v6310_v57 }
 0x250   :  { %2137 = vmatmul.mubr.f32.gmra.mrb[108].mxu1 %v1581_v0  ;;  %4271 = vmatprep.subr.bf16.mxu0 %v6330_v54 }
 0x251   :  { %2277 = vmatmul.mubr.f32.gmra.mrb[122].mxu0 %v6127_v22  ;;  %2141 = vmatprep.mubr.f32.mxu1 %v6341_v29  ;;  %v6356_v22 = vpack.c.bf16 %v2586_v23, %v2585_v28 }
 0x252   :  { %2281 = vmatprep.mubr.f32.mxu0 %v1582_v7  ;;  %4245 = vmatpush3.bf16.msra.mxu1 %v4242_v21 }
 0x253   :  { %4247 = vmatprep.subr.bf16.mxu1 %v4246_v61  ;;  %4273 = vmatpush3.bf16.msra.mxu0 %v6330_v54 }
 0x254   :  { %2142 = vmatmul.mubr.f32.gmra.mrb[110].mxu1 %v1582_v7  ;;  %4275 = vmatprep.subr.bf16.mxu0 %v6344_v37 }
 0x255   :  { %2282 = vmatmul.mubr.f32.gmra.mrb[124].mxu0 %v6146_v14  ;;  %2146 = vmatprep.mubr.f32.mxu1 %v6164_v5  ;;  %v1585_v14 = vld [vmem:[#allocation2 + $0xd1] sm:$0xff]  ;;  %v1586_v5 = vld [vmem:[#allocation2 + $0xe1] sm:$0xff] }
 0x256   :  { %2286 = vmatprep.mubr.f32.mxu0 %v1583_v9  ;;  %4249 = vmatpush3.bf16.msra.mxu1 %v4246_v61 }
 0x257   :  { %4282 = vmatprep.subr.bf16.mxu1 %v6149_v43  ;;  %4277 = vmatpush3.bf16.msra.mxu0 %v6344_v37 }
 0x258   :  { %2147 = vmatmul.mubr.f32.gmra.mrb[112].mxu1 %v1535_v33  ;;  %4279 = vmatprep.subr.bf16.mxu0 %v6356_v22 }
 0x259   :  { %2287 = vmatmul.mubr.f32.gmra.mrb[126].mxu0 %v4305_v44  ;;  %2151 = vmatprep.mubr.f32.mxu1 %v6173_v53 }
 0x25a   :  { %2291 = vmatprep.mubr.f32.mxu0 %v1584_v27 }
 0x25b   :  { %4281 = vmatpush3.bf16.msra.mxu0 %v6356_v22 }
 0x25c   :  { %2152 = vmatmul.mubr.f32.gmra.mrb[114].mxu1 %v1584_v27 }
 0x25d   :  { %2292 = vmatmul.mubr.f32.gmra.mrb[128].mxu0 %v6160_v31  ;;  %2156 = vmatprep.mubr.f32.mxu1 %v6182_v55  ;;  %v1588_v31 = vld [vmem:[#allocation2 + $0x101] sm:$0xff] }
 0x25e   :  { %2296 = vmatprep.mubr.f32.mxu0 %v1585_v14 }
 0x260   :  { %2157 = vmatmul.mubr.f32.gmra.mrb[116].mxu1 %v1585_v14 }
 0x261   :  { %2297 = vmatmul.mubr.f32.gmra.mrb[130].mxu0 %v6169_v8  ;;  %2161 = vmatprep.mubr.f32.mxu1 %v6191_v10  ;;  %v1589_v8 = vld [vmem:[#allocation2 + $0x111] sm:$0xff] }
 0x262   :  { %2301 = vmatprep.mubr.f32.mxu0 %v1586_v5 }
 0x264   :  { %2162 = vmatmul.mubr.f32.gmra.mrb[118].mxu1 %v1586_v5 }
 0x265   :  { %2302 = vmatmul.mubr.f32.gmra.mrb[132].mxu0 %v6178_v11  ;;  %2166 = vmatprep.mubr.f32.mxu1 %v6200_v60  ;;  %v1558_v11 = vld [vmem:[#allocation2 + $0x122] sm:$0xff] }
 0x266   :  { %2306 = vmatprep.mubr.f32.mxu0 %v1587_v47 }
 0x268   :  { %2167 = vmatmul.mubr.f32.gmra.mrb[120].mxu1 %v1587_v47 }
 0x269   :  { %2307 = vmatmul.mubr.f32.gmra.mrb[134].mxu0 %v6187_v34  ;;  %2171 = vmatprep.mubr.f32.mxu1 %v6209_v12  ;;  %v4306_v34 = vld [vmem:[%s6846_s0 + $0x19] ss:$2 sm:$0xff] }
 0x26a   :  { %2311 = vmatprep.mubr.f32.mxu0 %v1588_v31 }
 0x26c   :  { %2172 = vmatmul.mubr.f32.gmra.mrb[122].mxu1 %v1588_v31 }
 0x26d   :  { %2312 = vmatmul.mubr.f32.gmra.mrb[136].mxu0 %v6196_v58  ;;  %2176 = vmatprep.mubr.f32.mxu1 %v6222_v17  ;;  %v4315_v58 = vld [vmem:[%s6846_s0 + $0x1f9] ss:$2 sm:$0xff] }
 0x26e   :  { %2316 = vmatprep.mubr.f32.mxu0 %v1589_v8 }
 0x270   :  { %2177 = vmatmul.mubr.f32.gmra.mrb[124].mxu1 %v1589_v8 }
 0x271   :  { %2317 = vmatmul.mubr.f32.gmra.mrb[138].mxu0 %v6205_v45  ;;  %2181 = vmatprep.mubr.f32.mxu1 %v1558_v11  ;;  %v4317_v45 = vld [vmem:[%s6846_s0 + $0x259] ss:$2 sm:$0xff] }
 0x272   :  { %2321 = vmatprep.mubr.f32.mxu0 %v1590_v35 }
 0x274   :  { %2182 = vmatmul.mubr.f32.gmra.mrb[126].mxu1 %v1590_v35 }
 0x275   :  { %2322 = vmatmul.mubr.f32.gmra.mrb[140].mxu0 %v6218_v25  ;;  %3850 = vmatprep.mubr.f32.mxu1 %v6056_v15  ;;  %v4307_v15 = vld [vmem:[%s6846_s0 + $0x49] ss:$2 sm:$0xff]  ;;  %v4319_v25 = vld [vmem:[%s6846_s0 + $0x2b9] ss:$2 sm:$0xff] }
 0x276   :  { %2326 = vmatprep.mubr.f32.mxu0 %v1591_v51 }
 0x278   :  { %3851 = vmatmul.mubr.f32.vlgmr.msra.gmra.mrb[128].mxu1 %v6076_v18  ;;  %v4308_v18 = vld [vmem:[%s6846_s0 + $0x79] ss:$2 sm:$0xff] }
 0x279   :  { %2327 = vmatmul.mubr.f32.gmra.mrb[142].mxu0 %v4305_v44  ;;  %3853 = vmatprep.mubr.f32.mxu1 %v6096_v30  ;;  %v1599_v30 = vld [vmem:[#allocation2 + $0x92] sm:$0xff] }
 0x27a   :  { %4290 = vmatpush3.bf16.msra.mxu1 %v6149_v43  ;;  %3906 = vmatprep.mubr.f32.mxu0 %v4306_v34  ;;  %v4311_v43 = vld [vmem:[%s6846_s0 + $0x109] ss:$2 sm:$0xff] }
 0x27b   :  { %4283 = vmatprep.subr.bf16.mxu1 %v6248_v56 }
 0x27c   :  { %3854 = vmatmul.mubr.f32.gmra.mrb[130].mxu1 %v6116_v59  ;;  %v4309_v59 = vld [vmem:[%s6846_s0 + $0xa9] ss:$2 sm:$0xff] }
 0x27d   :  { %3856 = vmatprep.mubr.f32.mxu1 %v6137_v16  ;;  %3907 = vmatmul.mubr.f32.vlgmr.msra.gmra.mrb[144].mxu0 %v4307_v15  ;;  %v4310_v16 = vld [vmem:[%s6846_s0 + $0xd9] ss:$2 sm:$0xff] }
 0x27e   :  { %4291 = vmatpush3.bf16.msra.mxu1 %v6248_v56  ;;  %3909 = vmatprep.mubr.f32.mxu0 %v4308_v18  ;;  %v4321_v56 = vld [vmem:[%s6846_s0 + $0x319] ss:$2 sm:$0xff] }
 0x27f   :  { %4284 = vmatprep.subr.bf16.mxu1 %v6268_v2 }
 0x280   :  { %3857 = vmatmul.mubr.f32.gmra.mrb[132].mxu1 %v6152_v36  ;;  %v4312_v36 = vld [vmem:[%s6846_s0 + $0x139] ss:$2 sm:$0xff] }
 0x281   :  { %3859 = vmatprep.mubr.f32.mxu1 %v6341_v29  ;;  %3910 = vmatmul.mubr.f32.gmra.mrb[146].mxu0 %v4309_v59 }
 0x282   :  { %4292 = vmatpush3.bf16.msra.mxu1 %v6268_v2  ;;  %3912 = vmatprep.mubr.f32.mxu0 %v4310_v16 }
 0x283   :  { %4285 = vmatprep.subr.bf16.mxu1 %v6288_v6 }
 0x284   :  { %3860 = vmatmul.mubr.f32.gmra.mrb[134].mxu1 %v1599_v30 }
 0x285   :  { %3862 = vmatprep.mubr.f32.mxu1 %v6173_v53  ;;  %3913 = vmatmul.mubr.f32.gmra.mrb[148].mxu0 %v4311_v43  ;;  %v4313_v53 = vld [vmem:[%s6846_s0 + $0x169] ss:$2 sm:$0xff] }
 0x286   :  { %4293 = vmatpush3.bf16.msra.mxu1 %v6288_v6  ;;  %3915 = vmatprep.mubr.f32.mxu0 %v4312_v36 }
 0x287   :  { %4286 = vmatprep.subr.bf16.mxu1 %v6310_v57 }
 0x288   :  { %3863 = vmatmul.mubr.f32.gmra.mrb[136].mxu1 %v6182_v55  ;;  %v1607_v55 = vld [vmem:[#allocation2 + $0x132] sm:$0xff] }
 0x289   :  { %3865 = vmatprep.mubr.f32.mxu1 %v6191_v10  ;;  %3916 = vmatmul.mubr.f32.gmra.mrb[150].mxu0 %v4313_v53  ;;  %v4314_v10 = vld [vmem:[%s6846_s0 + $0x1c9] ss:$2 sm:$0xff] }
 0x28a   :  { %4294 = vmatpush3.bf16.msra.mxu1 %v6310_v57 }
 0x28b   :  { %4287 = vmatprep.subr.bf16.mxu1 %v6330_v54 }
 0x28c   :  { %3866 = vmatmul.mubr.f32.gmra.mrb[138].mxu1 %v6200_v60  ;;  %v4316_v60 = vld [vmem:[%s6846_s0 + $0x229] ss:$2 sm:$0xff] }
 0x28d   :  { %3868 = vmatprep.mubr.f32.mxu1 %v6209_v12  ;;  %v4318_v12 = vld [vmem:[%s6846_s0 + $0x289] ss:$2 sm:$0xff] }
 0x28e   :  { %4295 = vmatpush3.bf16.msra.mxu1 %v6330_v54 }
 0x28f   :  { %4288 = vmatprep.subr.bf16.mxu1 %v6344_v37 }
 0x290   :  { %3869 = vmatmul.mubr.f32.gmra.mrb[140].mxu1 %v6222_v17  ;;  %v4320_v17 = vld [vmem:[%s6846_s0 + $0x2e9] ss:$2 sm:$0xff] }
 0x291   :  { %3871 = vmatprep.mubr.f32.mxu1 %v1558_v11 }
 0x292   :  { %4296 = vmatpush3.bf16.msra.mxu1 %v6344_v37 }
 0x293   :  { %4289 = vmatprep.subr.bf16.mxu1 %v6356_v22 }
 0x294   :  { %3872 = vmatmul.mubr.f32.gmra.mrb[142].mxu1 %v1607_v55 }
 0x295   :  { %3918 = vmatprep.mubr.f32.mxu1 %v4314_v10 }
 0x296   :  { %4297 = vmatpush3.bf16.msra.mxu1 %v6356_v22 }
 0x299   :  { %3919 = vmatmul.mubr.f32.vlgmr.msra.gmra.mrb[144].mxu1 %v4315_v58 }
 0x29a   :  { %3921 = vmatprep.mubr.f32.mxu1 %v4316_v60 }
 0x29d   :  { %3922 = vmatmul.mubr.f32.gmra.mrb[146].mxu1 %v4317_v45 }
 0x29e   :  { %3924 = vmatprep.mubr.f32.mxu1 %v4318_v12 }
 0x2a1   :  { %3925 = vmatmul.mubr.f32.gmra.mrb[148].mxu1 %v4319_v25 }
 0x2a2   :  { %3927 = vmatprep.mubr.f32.mxu1 %v4320_v17 }
 0x2a5   :  { %3928 = vmatmul.mubr.f32.gmra.mrb[150].mxu1 %v4321_v56 }
 0x2cf   :  { %v3413_v20 = vpop.f32.mrb[66].mxu1 }
 0x2d0   :  { %v3490_v49 = vpop.f32.mrb[80].mxu0  ;;  %v3414_v2 = vpop.f32.mrb[67].mxu1 }
 0x2d1   :  { %v3415_v39 = vadd.f32 %v3414_v2, %v3413_v20  ;;  %v3491_v4 = vpop.f32.mrb[81].mxu0 }
 0x2d2   :  { %v3492_v41 = vadd.f32 %v3491_v4, %v3490_v49 }
 0x2d3   :  { %v3416_v46 = vpop.f32.mrb[68].mxu1 }
 0x2d4   :  { %v6454_v50 = vadd.f32 %v3492_v41, %v6299_v38  ;;  %v3493_v6 = vpop.f32.mrb[82].mxu0  ;;  %v3417_v63 = vpop.f32.mrb[69].mxu1 }
 0x2d5   :  { %v3418_v62 = vadd.f32 %v3417_v63, %v3416_v46  ;;  %v3494_v52 = vpop.f32.mrb[83].mxu0 }
 0x2d6   :  { %v3495_v40 = vadd.f32 %v3494_v52, %v3493_v6 }
 0x2d7   :  { %v3419_v24 = vpop.f32.mrb[70].mxu1 }
 0x2d8   :  { %v6456_v19 = vadd.f32 %v3495_v40, %v3415_v39  ;;  %v3496_v1 = vpop.f32.mrb[84].mxu0  ;;  %v3420_v57 = vpop.f32.mrb[71].mxu1 }
 0x2d9   :  { %v3421_v48 = vadd.f32 %v3420_v57, %v3419_v24  ;;  %v3497_v42 = vpop.f32.mrb[85].mxu0 }
 0x2da   :  { %v3498_v21 = vadd.f32 %v3497_v42, %v3496_v1 }
 0x2db   :  { %v3422_v26 = vpop.f32.mrb[72].mxu1 }
 0x2dc   :  { %v6458_v13 = vadd.f32 %v3498_v21, %v3418_v62  ;;  %v3499_v54 = vpop.f32.mrb[86].mxu0  ;;  %v3423_v0 = vpop.f32.mrb[73].mxu1 }
 0x2dd   :  { %v3424_v38 = vadd.f32 %v3423_v0, %v3422_v26  ;;  %v3500_v32 = vpop.f32.mrb[87].mxu0 }
 0x2de   :  { %v3501_v3 = vadd.f32 %v3500_v32, %v3499_v54 }
 0x2df   :  { %v3425_v61 = vpop.f32.mrb[74].mxu1 }
 0x2e0   :  { %v6460_v29 = vadd.f32 %v3501_v3, %v3421_v48  ;;  %v3502_v37 = vpop.f32.mrb[88].mxu0  ;;  %v3426_v7 = vpop.f32.mrb[75].mxu1 }
 0x2e1   :  { %v3427_v28 = vadd.f32 %v3426_v7, %v3425_v61  ;;  %v3503_v23 = vpop.f32.mrb[89].mxu0 }
 0x2e2   :  { %v3504_v9 = vadd.f32 %v3503_v23, %v3502_v37 }
 0x2e3   :  { %v3428_v22 = vpop.f32.mrb[76].mxu1 }
 0x2e4   :  { %v6462_v33 = vadd.f32 %v3504_v9, %v3424_v38  ;;  %v3505_v44 = vpop.f32.mrb[90].mxu0  ;;  %v3429_v27 = vpop.f32.mrb[77].mxu1 }
 0x2e5   :  { %v3430_v14 = vadd.f32 %v3429_v27, %v3428_v22  ;;  %v3506_v5 = vpop.f32.mrb[91].mxu0 }
 0x2e6   :  { %v3507_v47 = vadd.f32 %v3506_v5, %v3505_v44 }
 0x2e7   :  { %v3431_v31 = vpop.f32.mrb[78].mxu1 }
 0x2e8   :  { %v6464_v8 = vadd.f32 %v3507_v47, %v3427_v28  ;;  %v3508_v11 = vpop.f32.mrb[92].mxu0  ;;  %v3432_v35 = vpop.f32.mrb[79].mxu1 }
 0x2e9   :  { %v3433_v51 = vadd.f32 %v3432_v35, %v3431_v31  ;;  %v3509_v34 = vpop.f32.mrb[93].mxu0 }
 0x2ea   :  { %v3510_v15 = vadd.f32 %v3509_v34, %v3508_v11 }
 0x2eb   :  { %v3434_v18 = vpop.f32.mrb[80].mxu1 }
 0x2ec   :  { %v6466_v30 = vadd.f32 %v3510_v15, %v3430_v14  ;;  %v3511_v59 = vpop.f32.mrb[94].mxu0  ;;  %v3435_v16 = vpop.f32.mrb[81].mxu1 }
 0x2ed   :  { %v3436_v43 = vadd.f32 %v3435_v16, %v3434_v18  ;;  %v3512_v36 = vpop.f32.mrb[95].mxu0 }
 0x2ee   :  { %v3513_v53 = vadd.f32 %v3512_v36, %v3511_v59 }
 0x2ef   :  { %v3437_v55 = vpop.f32.mrb[82].mxu1 }
 0x2f0   :  { %v6468_v10 = vadd.f32 %v3513_v53, %v3433_v51  ;;  %v3514_v58 = vpop.f32.mrb[96].mxu0  ;;  %v3438_v60 = vpop.f32.mrb[83].mxu1 }
 0x2f1   :  { %v3439_v45 = vadd.f32 %v3438_v60, %v3437_v55  ;;  %v3515_v12 = vpop.f32.mrb[97].mxu0 }
 0x2f2   :  { %v3516_v25 = vadd.f32 %v3515_v12, %v3514_v58 }
 0x2f3   :  { %v3440_v17 = vpop.f32.mrb[84].mxu1 }
 0x2f4   :  { %v6470_v56 = vadd.f32 %v3516_v25, %v3436_v43  ;;  %v3517_v20 = vpop.f32.mrb[98].mxu0  ;;  %v3441_v49 = vpop.f32.mrb[85].mxu1 }
 0x2f5   :  { %v3442_v2 = vadd.f32 %v3441_v49, %v3440_v17  ;;  %v3518_v39 = vpop.f32.mrb[99].mxu0 }
 0x2f6   :  { %v3519_v4 = vadd.f32 %v3518_v39, %v3517_v20 }
 0x2f7   :  { %v3443_v41 = vpop.f32.mrb[86].mxu1 }
 0x2f8   :  { %v6472_v46 = vadd.f32 %v3519_v4, %v3439_v45  ;;  %v3520_v6 = vpop.f32.mrb[100].mxu0  ;;  %v3444_v63 = vpop.f32.mrb[87].mxu1 }
 0x2f9   :  { %v3445_v62 = vadd.f32 %v3444_v63, %v3443_v41  ;;  %v3521_v52 = vpop.f32.mrb[101].mxu0 }
 0x2fa   :  { %v3522_v40 = vadd.f32 %v3521_v52, %v3520_v6 }
 0x2fb   :  { %v3446_v24 = vpop.f32.mrb[88].mxu1 }
 0x2fc   :  { %v6474_v1 = vadd.f32 %v3522_v40, %v3442_v2  ;;  %v3523_v57 = vpop.f32.mrb[102].mxu0  ;;  %v3447_v48 = vpop.f32.mrb[89].mxu1 }
 0x2fd   :  { %v3448_v42 = vadd.f32 %v3447_v48, %v3446_v24  ;;  %v3524_v21 = vpop.f32.mrb[103].mxu0 }
 0x2fe   :  { %v3525_v26 = vadd.f32 %v3524_v21, %v3523_v57 }
 0x2ff   :  { %v3449_v54 = vpop.f32.mrb[90].mxu1 }
 0x300   :  { %v6476_v0 = vadd.f32 %v3525_v26, %v3445_v62  ;;  %v3526_v38 = vpop.f32.mrb[104].mxu0  ;;  %v3450_v32 = vpop.f32.mrb[91].mxu1 }
 0x301   :  { %v3451_v3 = vadd.f32 %v3450_v32, %v3449_v54  ;;  %v3527_v61 = vpop.f32.mrb[105].mxu0 }
 0x302   :  { %v3528_v37 = vadd.f32 %v3527_v61, %v3526_v38 }
 0x303   :  { %v3452_v7 = vpop.f32.mrb[92].mxu1 }
 0x304   :  { %v6478_v28 = vadd.f32 %v3528_v37, %v3448_v42  ;;  %v3529_v23 = vpop.f32.mrb[106].mxu0  ;;  %v3453_v9 = vpop.f32.mrb[93].mxu1 }
 0x305   :  { %v3454_v22 = vadd.f32 %v3453_v9, %v3452_v7  ;;  %v3530_v44 = vpop.f32.mrb[107].mxu0 }
 0x306   :  { %v3531_v27 = vadd.f32 %v3530_v44, %v3529_v23 }
 0x307   :  { %v3455_v14 = vpop.f32.mrb[94].mxu1 }
 0x308   :  { %v6480_v5 = vadd.f32 %v3531_v27, %v3451_v3  ;;  %v3532_v47 = vpop.f32.mrb[108].mxu0  ;;  %v3456_v31 = vpop.f32.mrb[95].mxu1 }
 0x309   :  { %v3457_v11 = vadd.f32 %v3456_v31, %v3455_v14  ;;  %v3533_v35 = vpop.f32.mrb[109].mxu0 }
 0x30a   :  { %v3534_v51 = vadd.f32 %v3533_v35, %v3532_v47 }
 0x30b   :  { %v3570_v34 = vpop.f32.mrb[96].mxu1 }
 0x30c   :  { %v6482_v15 = vadd.f32 %v3534_v51, %v3454_v22  ;;  %v3535_v18 = vpop.f32.mrb[110].mxu0  ;;  %v3571_v59 = vpop.f32.mrb[97].mxu1 }
 0x30d   :  { %v3536_v16 = vpop.f32.mrb[111].mxu0  ;;  %v3572_v43 = vadd.f32 %v3571_v59, %v3570_v34 }
 0x30e   :  { %v3537_v36 = vadd.f32 %v3536_v16, %v3535_v18 }
 0x30f   :  { %v2109_v53 = vadd.f32 %v3572_v43, %v6454_v50  ;;  %v3573_v55 = vpop.f32.mrb[98].mxu1 }
 0x310   :  { %v6485_v58 = vadd.f32 %v3537_v36, %v3457_v11  ;;  %v3650_v60 = vpop.f32.mrb[112].mxu0  ;;  %v3574_v45 = vpop.f32.mrb[99].mxu1 }
 0x311   :  { %v3575_v12 = vadd.f32 %v3574_v45, %v3573_v55  ;;  %v3651_v25 = vpop.f32.mrb[113].mxu0 }
 0x312   :  { %v3652_v17 = vadd.f32 %v3651_v25, %v3650_v60 }
 0x313   :  { %v2114_v20 = vadd.f32 %v3575_v12, %v6456_v19  ;;  %v3576_v49 = vpop.f32.mrb[100].mxu1 }
 0x314   :  { %v3653_v2 = vpop.f32.mrb[114].mxu0  ;;  %v3577_v39 = vpop.f32.mrb[101].mxu1  ;;  %v6488_v4 = vadd.f32 %v3652_v17, %v2109_v53 }
 0x315   :  { %v3578_v41 = vadd.f32 %v3577_v39, %v3576_v49  ;;  %v3654_v6 = vpop.f32.mrb[115].mxu0 }
 0x316   :  { %v3655_v63 = vadd.f32 %v3654_v6, %v3653_v2 }
 0x317   :  { %v2119_v50 = vadd.f32 %v3578_v41, %v6458_v13  ;;  %v3579_v62 = vpop.f32.mrb[102].mxu1 }
 0x318   :  { %v3656_v52 = vpop.f32.mrb[116].mxu0  ;;  %v3580_v40 = vpop.f32.mrb[103].mxu1  ;;  %v6491_v24 = vadd.f32 %v3655_v63, %v2114_v20 }
 0x319   :  { %v3581_v57 = vadd.f32 %v3580_v40, %v3579_v62  ;;  %v3657_v48 = vpop.f32.mrb[117].mxu0 }
 0x31a   :  { %v3658_v42 = vadd.f32 %v3657_v48, %v3656_v52 }
 0x31b   :  { %v2124_v19 = vadd.f32 %v3581_v57, %v6460_v29  ;;  %v3582_v21 = vpop.f32.mrb[104].mxu1 }
 0x31c   :  { %v3659_v26 = vpop.f32.mrb[118].mxu0  ;;  %v3583_v54 = vpop.f32.mrb[105].mxu1  ;;  %v6494_v38 = vadd.f32 %v3658_v42, %v2119_v50 }
 0x31d   :  { %v3584_v32 = vadd.f32 %v3583_v54, %v3582_v21  ;;  %v3660_v3 = vpop.f32.mrb[119].mxu0 }
 0x31e   :  { %v3661_v61 = vadd.f32 %v3660_v3, %v3659_v26 }
 0x31f   :  { %v2129_v13 = vadd.f32 %v3584_v32, %v6462_v33  ;;  %v3585_v37 = vpop.f32.mrb[106].mxu1 }
 0x320   :  { %v3662_v7 = vpop.f32.mrb[120].mxu0  ;;  %v3586_v23 = vpop.f32.mrb[107].mxu1  ;;  %v6497_v9 = vadd.f32 %v3661_v61, %v2124_v19 }
 0x321   :  { %v3587_v22 = vadd.f32 %v3586_v23, %v3585_v37  ;;  %v3663_v44 = vpop.f32.mrb[121].mxu0 }
 0x322   :  { %v3664_v27 = vadd.f32 %v3663_v44, %v3662_v7 }
 0x323   :  { %v2134_v29 = vadd.f32 %v3587_v22, %v6464_v8  ;;  %v3588_v14 = vpop.f32.mrb[108].mxu1 }
 0x324   :  { %v3665_v47 = vpop.f32.mrb[122].mxu0  ;;  %v3589_v31 = vpop.f32.mrb[109].mxu1  ;;  %v6500_v11 = vadd.f32 %v3664_v27, %v2129_v13 }
 0x325   :  { %v3590_v35 = vadd.f32 %v3589_v31, %v3588_v14  ;;  %v3666_v51 = vpop.f32.mrb[123].mxu0 }
 0x326   :  { %v3667_v34 = vadd.f32 %v3666_v51, %v3665_v47 }
 0x327   :  { %v2139_v33 = vadd.f32 %v3590_v35, %v6466_v30  ;;  %v3591_v18 = vpop.f32.mrb[110].mxu1 }
 0x328   :  { %v3668_v59 = vpop.f32.mrb[124].mxu0  ;;  %v3592_v16 = vpop.f32.mrb[111].mxu1  ;;  %v6503_v43 = vadd.f32 %v3667_v34, %v2134_v29 }
 0x329   :  { %v3593_v36 = vadd.f32 %v3592_v16, %v3591_v18  ;;  %v3669_v53 = vpop.f32.mrb[125].mxu0 }
 0x32a   :  { %v3670_v55 = vadd.f32 %v3669_v53, %v3668_v59 }
 0x32b   :  { %v2144_v8 = vadd.f32 %v3593_v36, %v6468_v10  ;;  %v3594_v60 = vpop.f32.mrb[112].mxu1 }
 0x32c   :  { %v3671_v45 = vpop.f32.mrb[126].mxu0  ;;  %v3595_v12 = vpop.f32.mrb[113].mxu1  ;;  %v6506_v25 = vadd.f32 %v3670_v55, %v2139_v33 }
 0x32d   :  { %v3596_v17 = vadd.f32 %v3595_v12, %v3594_v60  ;;  %v3672_v20 = vpop.f32.mrb[127].mxu0 }
 0x32e   :  { %v3673_v49 = vadd.f32 %v3672_v20, %v3671_v45 }
 0x32f   :  { %v2149_v30 = vadd.f32 %v3596_v17, %v6470_v56  ;;  %v3597_v2 = vpop.f32.mrb[114].mxu1 }
 0x330   :  { %v3674_v39 = vpop.f32.mrb[128].mxu0  ;;  %v3598_v41 = vpop.f32.mrb[115].mxu1  ;;  %v6509_v6 = vadd.f32 %v3673_v49, %v2144_v8 }
 0x331   :  { %v3599_v63 = vadd.f32 %v3598_v41, %v3597_v2  ;;  %v3675_v50 = vpop.f32.mrb[129].mxu0 }
 0x332   :  { %v3676_v62 = vadd.f32 %v3675_v50, %v3674_v39 }
 0x333   :  { %v2154_v10 = vadd.f32 %v3599_v63, %v6472_v46  ;;  %v3600_v52 = vpop.f32.mrb[116].mxu1 }
 0x334   :  { %v3677_v40 = vpop.f32.mrb[130].mxu0  ;;  %v3601_v57 = vpop.f32.mrb[117].mxu1  ;;  %v6512_v48 = vadd.f32 %v3676_v62, %v2149_v30 }
 0x335   :  { %v3602_v42 = vadd.f32 %v3601_v57, %v3600_v52  ;;  %v3678_v19 = vpop.f32.mrb[131].mxu0 }
 0x336   :  { %v3679_v21 = vadd.f32 %v3678_v19, %v3677_v40 }
 0x337   :  { %v2159_v56 = vadd.f32 %v3602_v42, %v6474_v1  ;;  %v3603_v26 = vpop.f32.mrb[118].mxu1 }
 0x338   :  { %v3680_v54 = vpop.f32.mrb[132].mxu0  ;;  %v3604_v32 = vpop.f32.mrb[119].mxu1  ;;  %v6515_v3 = vadd.f32 %v3679_v21, %v2154_v10 }
 0x339   :  { %v3605_v61 = vadd.f32 %v3604_v32, %v3603_v26  ;;  %v3681_v13 = vpop.f32.mrb[133].mxu0 }
 0x33a   :  { %v3682_v37 = vadd.f32 %v3681_v13, %v3680_v54 }
 0x33b   :  { %v2164_v46 = vadd.f32 %v3605_v61, %v6476_v0  ;;  %v3606_v7 = vpop.f32.mrb[120].mxu1 }
 0x33c   :  { %v3683_v23 = vpop.f32.mrb[134].mxu0  ;;  %v3607_v22 = vpop.f32.mrb[121].mxu1  ;;  %v6518_v44 = vadd.f32 %v3682_v37, %v2159_v56 }
 0x33d   :  { %v3608_v27 = vadd.f32 %v3607_v22, %v3606_v7  ;;  %v3684_v29 = vpop.f32.mrb[135].mxu0 }
 0x33e   :  { %v3685_v14 = vadd.f32 %v3684_v29, %v3683_v23 }
 0x33f   :  { %v2169_v1 = vadd.f32 %v3608_v27, %v6478_v28  ;;  %v3609_v47 = vpop.f32.mrb[122].mxu1 }
 0x340   :  { %v3686_v31 = vpop.f32.mrb[136].mxu0  ;;  %v3610_v35 = vpop.f32.mrb[123].mxu1  ;;  %v6521_v51 = vadd.f32 %v3685_v14, %v2164_v46 }
 0x341   :  { %v3611_v34 = vadd.f32 %v3610_v35, %v3609_v47  ;;  %v3687_v33 = vpop.f32.mrb[137].mxu0 }
 0x342   :  { %v3688_v18 = vadd.f32 %v3687_v33, %v3686_v31 }
 0x343   :  { %v2174_v0 = vadd.f32 %v3611_v34, %v6480_v5  ;;  %v3612_v59 = vpop.f32.mrb[124].mxu1 }
 0x344   :  { %v3689_v16 = vpop.f32.mrb[138].mxu0  ;;  %v3613_v36 = vpop.f32.mrb[125].mxu1  ;;  %v6524_v53 = vadd.f32 %v3688_v18, %v2169_v1 }
 0x345   :  { %v3614_v55 = vadd.f32 %v3613_v36, %v3612_v59  ;;  %v3690_v8 = vpop.f32.mrb[139].mxu0 }
 0x346   :  { %v3691_v60 = vadd.f32 %v3690_v8, %v3689_v16 }
 0x347   :  { %v2179_v28 = vadd.f32 %v3614_v55, %v6482_v15  ;;  %v3615_v45 = vpop.f32.mrb[126].mxu1 }
 0x348   :  { %v3692_v12 = vpop.f32.mrb[140].mxu0  ;;  %v3616_v17 = vpop.f32.mrb[127].mxu1  ;;  %v2319_v20 = vadd.f32 %v3691_v60, %v2174_v0 }
 0x349   :  { %v3617_v49 = vadd.f32 %v3616_v17, %v3615_v45  ;;  %v3693_v30 = vpop.f32.mrb[141].mxu0 }
 0x34a   :  { %v3694_v2 = vadd.f32 %v3693_v30, %v3692_v12 }
 0x34b   :  { %v2184_v39 = vadd.f32 %v3617_v49, %v6485_v58  ;;  %v3852_v5 = vpop.f32.mrb[128].mxu1 }
 0x34c   :  { %v3695_v41 = vpop.f32.mrb[142].mxu0  ;;  %v6529_v63 = vadd.f32 %v3852_v5, %v6491_v24  ;;  %v2398_v50 = vpop.f32.mrb[129].mxu1  ;;  %v2324_v62 = vadd.f32 %v3694_v2, %v2179_v28 }
 0x34d   :  { %v3696_v10 = vpop.f32.mrb[143].mxu0  ;;  %v6532_v52 = vadd.f32 %v2398_v50, %v6488_v4 }
 0x34e   :  { %v3697_v15 = vadd.f32 %v3696_v10, %v3695_v41 }
 0x34f   :  { %v2477_v40 = vadd.f32 %v6529_v63, %v6532_v52  ;;  %v3855_v57 = vpop.f32.mrb[130].mxu1 }
 0x350   :  { %v6537_v42 = vadd.f32 %v3855_v57, %v6497_v9  ;;  %v2408_v58 = vpop.f32.mrb[131].mxu1  ;;  %v6539_v19 = vpop.f32.mrb[144].mxu0  ;;  %v2329_v21 = vadd.f32 %v3697_v15, %v2184_v39 }
 0x351   :  { %v6542_v24 = vadd.f32 %v2408_v58, %v6494_v38  ;;  %v6544_v56 = vpop.f32.mrb[145].mxu0 }
 0x352   :  { %v2732_v4 = vadd.f32 %v6539_v19, %v6544_v56 }
 0x353   :  { %v2478_v26 = vadd.f32 %v2477_v40, %v6542_v24  ;;  %v3858_v54 = vpop.f32.mrb[132].mxu1 }
 0x354   :  { %v6550_v32 = vadd.f32 %v3858_v54, %v6503_v43  ;;  %v2418_v9 = vpop.f32.mrb[133].mxu1  ;;  %v6552_v61 = vpop.f32.mrb[146].mxu0 }
 0x355   :  { %v6555_v13 = vadd.f32 %v2418_v9, %v6500_v11  ;;  %v2479_v38 = vadd.f32 %v2478_v26, %v6537_v42  ;;  %v6558_v37 = vpop.f32.mrb[147].mxu0 }
 0x356   :  { %v2733_v46 = vadd.f32 %v2732_v4, %v6558_v37 }
 0x357   :  { %v2480_v7 = vadd.f32 %v2479_v38, %v6555_v13  ;;  %v3861_v23 = vpop.f32.mrb[134].mxu1 }
 0x358   :  { %v6563_v22 = vadd.f32 %v3861_v23, %v6509_v6  ;;  %v2428_v43 = vpop.f32.mrb[135].mxu1  ;;  %v6565_v27 = vpop.f32.mrb[148].mxu0  ;;  %v2734_v29 = vadd.f32 %v6552_v61, %v2733_v46 }
 0x359   :  { %v6569_v11 = vadd.f32 %v2428_v43, %v6506_v25  ;;  %v2481_v14 = vadd.f32 %v2480_v7, %v6550_v32  ;;  %v6572_v1 = vpop.f32.mrb[149].mxu0 }
 0x35a   :  { %v2735_v47 = vadd.f32 %v2734_v29, %v6572_v1 }
 0x35b   :  { %v2482_v31 = vadd.f32 %v2481_v14, %v6569_v11  ;;  %v3864_v35 = vpop.f32.mrb[136].mxu1 }
 0x35c   :  { %v2444_v6 = vadd.f32 %v3864_v35, %v6515_v3  ;;  %v2438_v34 = vpop.f32.mrb[137].mxu1  ;;  %v6577_v33 = vpop.f32.mrb[150].mxu0  ;;  %v2736_v18 = vadd.f32 %v6565_v27, %v2735_v47 }
 0x35d   :  { %v2439_v0 = vadd.f32 %v2438_v34, %v6512_v48  ;;  %v2483_v25 = vadd.f32 %v2482_v31, %v6563_v22  ;;  %v6582_v59 = vpop.f32.mrb[151].mxu0 }
 0x35e   :  { %v2737_v16 = vadd.f32 %v2736_v18, %v6582_v59 }
 0x35f   :  { %v2484_v36 = vadd.f32 %v2483_v25, %v2439_v0  ;;  %v3867_v55 = vpop.f32.mrb[138].mxu1 }
 0x360   :  { %v2454_v8 = vadd.f32 %v3867_v55, %v6521_v51  ;;  %v2448_v60 = vpop.f32.mrb[139].mxu1  ;;  %v2738_v3 = vadd.f32 %v6577_v33, %v2737_v16 }
 0x361   :  { %v2449_v28 = vadd.f32 %v2448_v60, %v6518_v44  ;;  %v2485_v45 = vadd.f32 %v2484_v36, %v2444_v6 }
 0x363   :  { %v2486_v12 = vadd.f32 %v2485_v45, %v2449_v28  ;;  %v3870_v17 = vpop.f32.mrb[140].mxu1 }
 0x364   :  { %v2464_v49 = vadd.f32 %v3870_v17, %v2319_v20  ;;  %v2458_v48 = vpop.f32.mrb[141].mxu1 }
 0x365   :  { %v2459_v30 = vadd.f32 %v2458_v48, %v6524_v53  ;;  %v2487_v2 = vadd.f32 %v2486_v12, %v2454_v8 }
 0x367   :  { %v2488_v39 = vadd.f32 %v2487_v2, %v2459_v30  ;;  %v3873_v5 = vpop.f32.mrb[142].mxu1 }
 0x368   :  { %v2474_v41 = vadd.f32 %v3873_v5, %v2329_v21  ;;  %v2468_v50 = vpop.f32.mrb[143].mxu1 }
 0x369   :  { %v2469_v10 = vadd.f32 %v2468_v50, %v2324_v62  ;;  %v2489_v15 = vadd.f32 %v2488_v39, %v2464_v49 }
 0x36b   :  { %v2490_v51 = vadd.f32 %v2489_v15, %v2469_v10 }
 0x36c   :  { %v6589_v40 = vpop.f32.mrb[144].mxu1 }
 0x36d   :  { %v2491_v57 = vadd.f32 %v2490_v51, %v2474_v41  ;;  %v6591_v58 = vpop.f32.mrb[145].mxu1 }
 0x36e   :  { %v2739_v44 = vadd.f32 %v2738_v3, %v6591_v58 }
 0x36f   :  { %v2492_v4 = vrot.slane %v2491_v57, 4 }
 0x370   :  { %v6594_v20 = vpop.f32.mrb[146].mxu1  ;;  %v2740_v53 = vadd.f32 %v6589_v40, %v2739_v44 }
 0x371   :  { %v2493_v26 = vadd.f32 %v2492_v4, %v2491_v57  ;;  %v6597_v54 = vpop.f32.mrb[147].mxu1 }
 0x372   :  { %v2741_v21 = vadd.f32 %v2740_v53, %v6597_v54 }
 0x373   :  { %v2494_v62 = vrot.slane %v2493_v26, 2 }
 0x374   :  { %v6600_v9 = vpop.f32.mrb[148].mxu1  ;;  %v2742_v38 = vadd.f32 %v6594_v20, %v2741_v21 }
 0x375   :  { %v2495_v46 = vadd.f32 %v2494_v62, %v2493_v26  ;;  %v6603_v7 = vpop.f32.mrb[149].mxu1 }
 0x376   :  { %v2743_v23 = vadd.f32 %v2742_v38, %v6603_v7 }
 0x377   :  { %v2496_v43 = vrot.slane %v2495_v46, 1 }
 0x378   :  { %v6606_v29 = vpop.f32.mrb[150].mxu1  ;;  %v2744_v14 = vadd.f32 %v6600_v9, %v2743_v23 }
 0x379   :  { %v2497_v47 = vadd.f32 %v2496_v43, %v2495_v46  ;;  %v6609_v31 = vpop.f32.mrb[151].mxu1 }
 0x37a   :  { %v2745_v35 = vadd.f32 %v2744_v14, %v6609_v31 }
 0x37b   :  { %v2498_v34 = vmul.f32 0.0078125, %v2497_v47 }
 0x37c   :  { %v2746_v18 = vadd.f32 %v6606_v29, %v2745_v35 }
 0x37d   :  { %v6614_v25 = vsub.f32 %v6532_v52, %v2498_v34  ;;  %v6617_v16 = vsub.f32 %v6529_v63, %v2498_v34  ;;  %v6620_v36 = vsub.f32 %v6542_v24, %v2498_v34  ;;  %v6623_v55 = vsub.f32 %v6537_v42, %v2498_v34 }
 0x37e   :  { %v6626_v60 = vsub.f32 %v6555_v13, %v2498_v34  ;;  %v6629_v3 = vsub.f32 %v6550_v32, %v2498_v34  ;;  %v6632_v45 = vsub.f32 %v6569_v11, %v2498_v34  ;;  %v6635_v52 = vsub.f32 %v6563_v22, %v2498_v34 }
 0x37f   :  { %v6637_v63 = vsub.f32 %v2439_v0, %v2498_v34  ;;  %v6639_v12 = vsub.f32 %v2444_v6, %v2498_v34  ;;  %v6641_v24 = vsub.f32 %v2449_v28, %v2498_v34  ;;  %v6643_v42 = vsub.f32 %v2454_v8, %v2498_v34 }
 0x380   :  { %v6645_v17 = vsub.f32 %v2459_v30, %v2498_v34  ;;  %v6647_v13 = vsub.f32 %v2464_v49, %v2498_v34  ;;  %v6649_v32 = vsub.f32 %v2469_v10, %v2498_v34  ;;  %v6651_v48 = vsub.f32 %v2474_v41, %v2498_v34 }
 0x381   :  { %v2515_v22 = vmul.f32 %v6614_v25, %v6614_v25  ;;  %v2516_v11 = vmul.f32 %v6617_v16, %v6617_v16  ;;  %v2517_v6 = vmul.f32 %v6620_v36, %v6620_v36  ;;  %v2747_v8 = vrot.slane %v2746_v18, 4 }
 0x382   :  { %v2518_v28 = vmul.f32 %v6623_v55, %v6623_v55  ;;  %v2519_v2 = vmul.f32 %v6626_v60, %v6626_v60  ;;  %v2520_v41 = vmul.f32 %v6629_v3, %v6629_v3  ;;  %v2521_v15 = vmul.f32 %v6632_v45, %v6632_v45 }
 0x383   :  { %v2531_v0 = vadd.f32 %v2516_v11, %v2515_v22  ;;  %v2748_v30 = vadd.f32 %v2747_v8, %v2746_v18  ;;  %v2522_v44 = vmul.f32 %v6635_v52, %v6635_v52  ;;  %v2523_v26 = vmul.f32 %v6637_v63, %v6637_v63 }
 0x384   :  { %v2524_v38 = vmul.f32 %v6639_v12, %v6639_v12  ;;  %v2525_v46 = vmul.f32 %v6641_v24, %v6641_v24 }
 0x385   :  { %v2532_v49 = vadd.f32 %v2531_v0, %v2517_v6  ;;  %v2749_v5 = vrot.slane %v2748_v30, 2  ;;  %v2528_v0 = vmul.f32 %v6647_v13, %v6647_v13 }
 0x387   :  { %v2533_v39 = vadd.f32 %v2532_v49, %v2518_v28  ;;  %v2750_v10 = vadd.f32 %v2749_v5, %v2748_v30 }
 0x389   :  { %v2534_v50 = vadd.f32 %v2533_v39, %v2519_v2  ;;  %v2751_v57 = vrot.slane %v2750_v10, 1  ;;  %v2530_v39 = vmul.f32 %v6651_v48, %v6651_v48 }
 0x38b   :  { %v2535_v51 = vadd.f32 %v2534_v50, %v2520_v41  ;;  %v2752_v53 = vadd.f32 %v2751_v57, %v2750_v10 }
 0x38d   :  { %v2536_v4 = vadd.f32 %v2535_v51, %v2521_v15  ;;  %v2753_v62 = vmul.f32 0.0078125, %v2752_v53 }
 0x38f   :  { %v2537_v21 = vadd.f32 %v2536_v4, %v2522_v44  ;;  %v6676_v43 = vsub.f32 %v6544_v56, %v2753_v62  ;;  %v6679_v14 = vsub.f32 %v6539_v19, %v2753_v62  ;;  %v6682_v47 = vsub.f32 %v6558_v37, %v2753_v62 }
 0x390   :  { %v6685_v35 = vsub.f32 %v6552_v61, %v2753_v62  ;;  %v6688_v34 = vsub.f32 %v6572_v1, %v2753_v62  ;;  %v6691_v18 = vsub.f32 %v6565_v27, %v2753_v62  ;;  %v6694_v22 = vsub.f32 %v6582_v59, %v2753_v62 }
 0x391   :  { %v2538_v23 = vadd.f32 %v2537_v21, %v2523_v26  ;;  %v6697_v11 = vsub.f32 %v6577_v33, %v2753_v62  ;;  %v6700_v19 = vsub.f32 %v6591_v58, %v2753_v62  ;;  %v6703_v37 = vsub.f32 %v6589_v40, %v2753_v62 }
 0x392   :  { %v6706_v61 = vsub.f32 %v6597_v54, %v2753_v62  ;;  %v6709_v1 = vsub.f32 %v6594_v20, %v2753_v62  ;;  %v6712_v27 = vsub.f32 %v6603_v7, %v2753_v62  ;;  %v6715_v59 = vsub.f32 %v6600_v9, %v2753_v62 }
 0x393   :  { %v2539_v56 = vadd.f32 %v2538_v23, %v2524_v38  ;;  %v2526_v33 = vmul.f32 %v6643_v42, %v6643_v42  ;;  %v6720_v6 = vsub.f32 %v6609_v31, %v2753_v62  ;;  %v6723_v40 = vsub.f32 %v6606_v29, %v2753_v62 }
 0x394   :  { %v2770_v20 = vmul.f32 %v6676_v43, %v6676_v43  ;;  %v2771_v54 = vmul.f32 %v6679_v14, %v6679_v14  ;;  %v2527_v9 = vmul.f32 %v6645_v17, %v6645_v17  ;;  %v2772_v31 = vmul.f32 %v6682_v47, %v6682_v47 }
 0x395   :  { %v2540_v58 = vadd.f32 %v2539_v56, %v2525_v46  ;;  %v2529_v29 = vmul.f32 %v6649_v32, %v6649_v32  ;;  %v2773_v30 = vmul.f32 %v6685_v35, %v6685_v35  ;;  %v2774_v41 = vmul.f32 %v6688_v34, %v6688_v34 }
 0x396   :  { %v2786_v28 = vadd.f32 %v2771_v54, %v2770_v20  ;;  %v2775_v15 = vmul.f32 %v6691_v18, %v6691_v18  ;;  %v2776_v44 = vmul.f32 %v6694_v22, %v6694_v22  ;;  %v2777_v26 = vmul.f32 %v6697_v11, %v6697_v11 }
 0x397   :  { %v2541_v7 = vadd.f32 %v2540_v58, %v2526_v33  ;;  %v2778_v38 = vmul.f32 %v6700_v19, %v6700_v19  ;;  %v2779_v56 = vmul.f32 %v6703_v37, %v6703_v37  ;;  %v2780_v20 = vmul.f32 %v6706_v61, %v6706_v61 }
 0x398   :  { %v2787_v2 = vadd.f32 %v2786_v28, %v2772_v31  ;;  %v2782_v31 = vmul.f32 %v6712_v27, %v6712_v27 }
 0x399   :  { %v2542_v8 = vadd.f32 %v2541_v7, %v2527_v9  ;;  %v2781_v7 = vmul.f32 %v6709_v1, %v6709_v1 }
 0x39a   :  { %v2788_v50 = vadd.f32 %v2787_v2, %v2773_v30  ;;  %v2784_v2 = vmul.f32 %v6720_v6, %v6720_v6 }
 0x39b   :  { %v2543_v49 = vadd.f32 %v2542_v8, %v2528_v0 }
 0x39c   :  { %v2789_v51 = vadd.f32 %v2788_v50, %v2774_v41 }
 0x39d   :  { %v2544_v5 = vadd.f32 %v2543_v49, %v2529_v29  ;;  %v2783_v49 = vmul.f32 %v6715_v59, %v6715_v59 }
 0x39e   :  { %v2790_v4 = vadd.f32 %v2789_v51, %v2775_v15 }
 0x39f   :  { %v2545_v10 = vadd.f32 %v2544_v5, %v2530_v39  ;;  %v2785_v5 = vmul.f32 %v6723_v40, %v6723_v40 }
 0x3a0   :  { %v2791_v21 = vadd.f32 %v2790_v4, %v2776_v44 }
 0x3a1   :  { %v2546_v57 = vrot.slane %v2545_v10, 4 }
 0x3a2   :  { %v2792_v46 = vadd.f32 %v2791_v21, %v2777_v26 }
 0x3a3   :  { %v2547_v53 = vadd.f32 %v2546_v57, %v2545_v10 }
 0x3a4   :  { %v2793_v33 = vadd.f32 %v2792_v46, %v2778_v38 }
 0x3a5   :  { %v2548_v62 = vrot.slane %v2547_v53, 2 }
 0x3a6   :  { %v2794_v54 = vadd.f32 %v2793_v33, %v2779_v56 }
 0x3a7   :  { %v2549_v23 = vadd.f32 %v2548_v62, %v2547_v53 }
 0x3a8   :  { %v2795_v0 = vadd.f32 %v2794_v54, %v2780_v20 }
 0x3a9   :  { %v2550_v58 = vrot.slane %v2549_v23, 1 }
 0x3aa   :  { %v2796_v28 = vadd.f32 %v2795_v0, %v2781_v7 }
 0x3ab   :  { %v2551_v9 = vadd.f32 %v2550_v58, %v2549_v23 }
 0x3ac   :  { %v2797_v30 = vadd.f32 %v2796_v28, %v2782_v31 }
 0x3ad   :  { %v2552_v8 = vmul.f32 0.0078125, %v2551_v9 }
 0x3ae   :  { %v2798_v39 = vadd.f32 %v2797_v30, %v2783_v49 }
 0x3af   :  { %v2553_v29 = vadd.f32 1e-05, %v2552_v8 }
 0x3b0   :  { %v2799_v41 = vadd.f32 %v2798_v39, %v2784_v2 }
 0x3b1   :  { %4301 = vrsqrt.f32 %v2553_v29 }
 0x3b2   :  { %v2800_v50 = vadd.f32 %v2799_v41, %v2785_v5 }
 0x3b4   :  { %v2801_v10 = vrot.slane %v2800_v50, 4 }
 0x3b6   :  { %v2802_v51 = vadd.f32 %v2801_v10, %v2800_v50 }
 0x3b8   :  { %v2803_v56 = vrot.slane %v2802_v51, 2 }
 0x3bb   :  { %v4302_v15 = vpop.eup %4301 }
 0x3bc   :  { %v2555_v57 = vmul.f32 %v4302_v15, %v6614_v25  ;;  %v2556_v44 = vmul.f32 %v4302_v15, %v6617_v16  ;;  %v2557_v4 = vmul.f32 %v4302_v15, %v6620_v36  ;;  %v2558_v53 = vmul.f32 %v4302_v15, %v6623_v55 }
 0x3bd   :  { %v2559_v26 = vmul.f32 %v4302_v15, %v6626_v60  ;;  %v2560_v21 = vmul.f32 %v4302_v15, %v6629_v3  ;;  %v2561_v62 = vmul.f32 %v4302_v15, %v6632_v45  ;;  %v2562_v38 = vmul.f32 %v4302_v15, %v6635_v52 }
 0x3be   :  { %v2563_v46 = vmul.f32 %v4302_v15, %v6637_v63  ;;  %v2564_v23 = vmul.f32 %v4302_v15, %v6639_v12  ;;  %v2565_v25 = vmul.f32 %v4302_v15, %v6641_v24  ;;  %v2566_v16 = vmul.f32 %v4302_v15, %v6643_v42 }
 0x3bf   :  { %v2567_v36 = vmul.f32 %v4302_v15, %v6645_v17  ;;  %v2568_v55 = vmul.f32 %v4302_v15, %v6647_v13  ;;  %v2569_v60 = vmul.f32 %v4302_v15, %v6649_v32  ;;  %v2570_v3 = vmul.f32 %v4302_v15, %v6651_v48 }
 0x3c0   :  { %v2804_v45 = vadd.f32 %v2803_v56, %v2802_v51 }
 0x3c2   :  { %v2805_v33 = vrot.slane %v2804_v45, 1 }
 0x3c4   :  { %v2806_v52 = vadd.f32 %v2805_v33, %v2804_v45 }
 0x3c6   :  { %v2807_v58 = vmul.f32 0.0078125, %v2806_v52 }
 0x3c8   :  { %v2808_v63 = vadd.f32 1e-05, %v2807_v58 }
 0x3ca   :  { %4303 = vrsqrt.f32 %v2808_v63 }
 0x3d4   :  { %v4304_v12 = vpop.eup %4303 }
 0x3d5   :  { %v2810_v24 = vmul.f32 %v4304_v12, %v6676_v43  ;;  %v2811_v42 = vmul.f32 %v4304_v12, %v6679_v14  ;;  %v2812_v17 = vmul.f32 %v4304_v12, %v6682_v47  ;;  %v2813_v13 = vmul.f32 %v4304_v12, %v6685_v35 }
 0x3d6   :  { %v2814_v32 = vmul.f32 %v4304_v12, %v6688_v34  ;;  %v2815_v48 = vmul.f32 %v4304_v12, %v6691_v18  ;;  %v2816_v20 = vmul.f32 %v4304_v12, %v6694_v22  ;;  %v2817_v54 = vmul.f32 %v4304_v12, %v6697_v11 }
 0x3d7   :  { %v2818_v9 = vmul.f32 %v4304_v12, %v6700_v19  ;;  %v2819_v7 = vmul.f32 %v4304_v12, %v6703_v37  ;;  %v2820_v43 = vmul.f32 %v4304_v12, %v6706_v61  ;;  %v2821_v14 = vmul.f32 %v4304_v12, %v6709_v1 }
 0x3d8   :  { %v2822_v47 = vmul.f32 %v4304_v12, %v6712_v27  ;;  %v2823_v35 = vmul.f32 %v4304_v12, %v6715_v59  ;;  %v2824_v34 = vmul.f32 %v4304_v12, %v6720_v6  ;;  %v2825_v18 = vmul.f32 %v4304_v12, %v6723_v40 }
 0x3d9   :  { %v2826_v0 = vadd.f32 %v2810_v24, %v2555_v57  ;;  %v2827_v22 = vadd.f32 %v2811_v42, %v2556_v44  ;;  %v2828_v8 = vadd.f32 %v2812_v17, %v2557_v4  ;;  %v2829_v11 = vadd.f32 %v2813_v13, %v2558_v53 }
 0x3da   :  { %v2830_v31 = vadd.f32 %v2814_v32, %v2559_v26  ;;  %v2831_v19 = vadd.f32 %v2815_v48, %v2560_v21  ;;  %v2832_v28 = vadd.f32 %v2816_v20, %v2561_v62  ;;  %v2833_v37 = vadd.f32 %v2817_v54, %v2562_v38 }
 0x3db   :  { %v2834_v29 = vadd.f32 %v2818_v9, %v2563_v46  ;;  %v2835_v61 = vadd.f32 %v2819_v7, %v2564_v23  ;;  %v2836_v49 = vadd.f32 %v2820_v43, %v2565_v25  ;;  %v2837_v1 = vadd.f32 %v2821_v14, %v2566_v16 }
 0x3dc   :  { %v2838_v30 = vadd.f32 %v2822_v47, %v2567_v36  ;;  %v2839_v27 = vadd.f32 %v2823_v35, %v2568_v55  ;;  %v2840_v2 = vadd.f32 %v2824_v34, %v2569_v60  ;;  %v2841_v59 = vadd.f32 %v2825_v18, %v2570_v3 }
 0x3dd   :  { %v2842_v39 = vmax.f32 %v2826_v0, 0.0  ;;  %v2843_v6 = vmax.f32 %v2827_v22, 0.0  ;;  %v2844_v5 = vmax.f32 %v2828_v8, 0.0  ;;  %v2845_v40 = vmax.f32 %v2829_v11, 0.0 }
 0x3de   :  { %v2846_v41 = vmax.f32 %v2830_v31, 0.0  ;;  %v2847_v50 = vmax.f32 %v2831_v19, 0.0  ;;  %v2848_v10 = vmax.f32 %v2832_v28, 0.0  ;;  %v2849_v15 = vmax.f32 %v2833_v37, 0.0 }
 0x3df   :  { %v2850_v51 = vmax.f32 %v2834_v29, 0.0  ;;  %v2851_v57 = vmax.f32 %v2835_v61, 0.0  ;;  %v2852_v44 = vmax.f32 %v2836_v49, 0.0  ;;  %v2853_v4 = vmax.f32 %v2837_v1, 0.0  ;;  %2858 = vst [vmem:[%s6849_s4] sm:$0xff] %v2842_v39  ;;  %2859 = vst [vmem:[%s6849_s4 + $0x8] sm:$0xff] %v2843_v6 }
 0x3e0   :  { %2860 = vst [vmem:[%s6849_s4 + $0x10] sm:$0xff] %v2844_v5  ;;  %2861 = vst [vmem:[%s6849_s4 + $0x18] sm:$0xff] %v2845_v40  ;;  %v2854_v53 = vmax.f32 %v2838_v30, 0.0  ;;  %v2855_v26 = vmax.f32 %v2839_v27, 0.0  ;;  %v2856_v21 = vmax.f32 %v2840_v2, 0.0  ;;  %v2857_v62 = vmax.f32 %v2841_v59, 0.0 }
 0x3e1   :  { %2862 = vst [vmem:[%s6849_s4 + $0x20] sm:$0xff] %v2846_v41  ;;  %2863 = vst [vmem:[%s6849_s4 + $0x28] sm:$0xff] %v2847_v50 }
 0x3e2   :  { %2864 = vst [vmem:[%s6849_s4 + $0x30] sm:$0xff] %v2848_v10  ;;  %2865 = vst [vmem:[%s6849_s4 + $0x38] sm:$0xff] %v2849_v15 }
 0x3e3   :  { %2866 = vst [vmem:[%s6849_s4 + $0x40] sm:$0xff] %v2850_v51  ;;  %2867 = vst [vmem:[%s6849_s4 + $0x48] sm:$0xff] %v2851_v57 }
 0x3e4   :  { %2868 = vst [vmem:[%s6849_s4 + $0x50] sm:$0xff] %v2852_v44  ;;  %2869 = vst [vmem:[%s6849_s4 + $0x58] sm:$0xff] %v2853_v4 }
 0x3e5   :  { %2870 = vst [vmem:[%s6849_s4 + $0x60] sm:$0xff] %v2854_v53  ;;  %2871 = vst [vmem:[%s6849_s4 + $0x68] sm:$0xff] %v2855_v26 }
 0x3e6   :  { %2872 = vst [vmem:[%s6849_s4 + $0x70] sm:$0xff] %v2856_v21  ;;  %2873 = vst [vmem:[%s6849_s4 + $0x78] sm:$0xff] %v2857_v62 }

</bundles_post_ra>
